<compile_context>
chip_gen: v7x
topology: tpu7x:2x2x1
jax: 0.10.0
libtpu: 0.0.40
codegen_flags: <defaults>
</compile_context>

<pallas_src>
import functools

import jax
import jax.numpy as jnp
from jax import lax
from jax.experimental import pallas as pl
from jax.experimental.pallas import tpu as pltpu


def _round_up(x, m):
    return (x + m - 1) // m * m


def _fill_reflect_padded(pad_ref, y2d, C, H, W):
    """Write y2d (C, H*W) into pad_ref (C, H+2, W+2) with 1-px reflection halo."""
    y3 = y2d.reshape(C, H, W)
    pad_ref[:, 1:H + 1, 1:W + 1] = y3
    # top / bottom halo rows: padded[0] = orig[1], padded[H+1] = orig[H-2]
    pad_ref[:, 0:1, 1:W + 1] = y3[:, 1:2, :]
    pad_ref[:, H + 1:H + 2, 1:W + 1] = y3[:, H - 2:H - 1, :]
    # left / right halo columns (incl. corners), read back the padded rows
    pad_ref[:, :, 0:1] = pad_ref[:, :, 2:3]
    pad_ref[:, :, W + 1:W + 2] = pad_ref[:, :, W - 1:W]


def _im2col_3x3(xp, C, H, W):
    """xp: (C, H+2, W+2) -> (9C, H*W); tap-major (di*3+dj), channel-minor."""
    cols = [xp[:, di:di + H, dj:dj + W].reshape(C, H * W)
            for di in range(3) for dj in range(3)]
    return jnp.concatenate(cols, axis=0)


def _instance_norm_1pass(y, hw, eps=1e-5):
    """Per-channel instance norm over the lane axis, single sweep. y: (C, HW)."""
    inv_hw = 1.0 / hw
    mean = jnp.sum(y, axis=1, keepdims=True) * inv_hw
    ex2 = jnp.sum(y * y, axis=1, keepdims=True) * inv_hw
    var = ex2 - mean * mean            # biased, like PyTorch InstanceNorm2d
    return (y - mean) * lax.rsqrt(var + eps)


def resnet_block_kernel(x_ref, w1_ref, b1_ref, w2_ref, b2_ref, o_ref, pad_ref,
                        *, H, W):
    C = x_ref.shape[1]
    HW = H * W

    x = x_ref[0]                                           # (C, HW) lane-dense

    # ---- conv1: reflect-pad (scratch halo) -> im2col -> one K=9C matmul ----
    _fill_reflect_padded(pad_ref, x, C, H, W)
    cols = _im2col_3x3(pad_ref[...], C, H, W)              # (9C, HW)
    y = jnp.dot(w1_ref[...], cols, preferred_element_type=jnp.float32)
    y = y + b1_ref[...]                                    # (C,1) bcast over lanes

    y = _instance_norm_1pass(y, HW)
    y = jnp.where(y > 0, y, 0.01 * y)                      # LeakyReLU(0.01)

    # ---- conv2 ----
    _fill_reflect_padded(pad_ref, y, C, H, W)
    cols = _im2col_3x3(pad_ref[...], C, H, W)
    y = jnp.dot(w2_ref[...], cols, preferred_element_type=jnp.float32)
    y = y + b2_ref[...]
    y = _instance_norm_1pass(y, HW)

    o_ref[0] = (x + y).astype(o_ref.dtype)                 # residual add


def resnet_block(x, w1, b1, w2, b2):
    B, C, H, W = x.shape
    assert H >= 2 and W >= 2, "reflection pad of 1 needs H, W >= 2"
    HW = H * W

    xf = x.reshape(B, C, HW).astype(jnp.float32)
    # (O, C, 3, 3) -> (O, 9C), tap-major / channel-minor, matching _im2col_3x3
    w1m = jnp.transpose(w1, (0, 2, 3, 1)).reshape(C, 9 * C).astype(jnp.float32)
    w2m = jnp.transpose(w2, (0, 2, 3, 1)).reshape(C, 9 * C).astype(jnp.float32)
    b1c = b1.reshape(C, 1).astype(jnp.float32)
    b2c = b2.reshape(C, 1).astype(jnp.float32)

    # explicit VMEM budget: double-buffered in/out + weights/biases + pad scratch
    f = 4
    act = C * max(HW, 128) * f
    pad_b = C * _round_up(H + 2, 8) * _round_up(W + 2, 128) * f
    wgt = _round_up(C, 8) * _round_up(9 * C, 128) * f
    bia = _round_up(C, 8) * 128 * f
    est = 4 * act + 4 * (wgt + bia) + pad_b + (4 << 20)
    vmem_limit = int(min(max(est, 32 << 20), 64 << 20))

    kern = functools.partial(resnet_block_kernel, H=H, W=W)
    out = pl.pallas_call(
        kern,
        out_shape=jax.ShapeDtypeStruct((B, C, HW), x.dtype),
        grid_spec=pltpu.PrefetchScalarGridSpec(
            num_scalar_prefetch=0,
            grid=(B,),
            in_specs=[
                pl.BlockSpec((1, C, HW), lambda b: (b, 0, 0)),
                pl.BlockSpec((C, 9 * C), lambda b: (0, 0)),
                pl.BlockSpec((C, 1), lambda b: (0, 0)),
                pl.BlockSpec((C, 9 * C), lambda b: (0, 0)),
                pl.BlockSpec((C, 1), lambda b: (0, 0)),
            ],
            out_specs=pl.BlockSpec((1, C, HW), lambda b: (b, 0, 0)),
            scratch_shapes=[pltpu.VMEM((C, H + 2, W + 2), jnp.float32)],
        ),
        compiler_params=pltpu.CompilerParams(
            dimension_semantics=("parallel",),
            vmem_limit_bytes=vmem_limit),
    )(xf, w1m, b1c, w2m, b2c)
    return out.reshape(B, C, H, W)


# ------------------- pure-JAX reference for validation -------------------
def _ref_reflect_pad(x):  # x: (B, C, H, W)
    x = jnp.concatenate([x[:, :, 1:2, :], x, x[:, :, -2:-1, :]], axis=2)
    x = jnp.concatenate([x[:, :, :, 1:2], x, x[:, :, :, -2:-1]], axis=3)
    return x


def _ref_conv3x3(x, w, b):
    y = lax.conv_general_dilated(
        x, w, window_strides=(1, 1), padding='VALID',
        dimension_numbers=('NCHW', 'OIHW', 'NCHW'))
    return y + b.reshape(1, -1, 1, 1)


def _ref_instance_norm(y, eps=1e-5):
    mean = jnp.mean(y, axis=(2, 3), keepdims=True)
    var = jnp.mean((y - mean) ** 2, axis=(2, 3), keepdims=True)
    return (y - mean) * lax.rsqrt(var + eps)


def resnet_block_ref(x, w1, b1, w2, b2):
    y = _ref_conv3x3(_ref_reflect_pad(x), w1, b1)
    y = _ref_instance_norm(y)
    y = jnp.where(y > 0, y, 0.01 * y)
    y = _ref_conv3x3(_ref_reflect_pad(y), w2, b2)
    y = _ref_instance_norm(y)
    return x + y


if __name__ == "__main__":
    B, C, H, W = 2, 4, 16, 16
    key = jax.random.PRNGKey(0)
    kx, k1, k2, k3, k4 = jax.random.split(key, 5)

    x = jax.random.normal(kx, (B, C, H, W), dtype=jnp.float32)
    w1 = 0.1 * jax.random.normal(k1, (C, C, 3, 3), dtype=jnp.float32)
    b1 = 0.1 * jax.random.normal(k2, (C,), dtype=jnp.float32)
    w2 = 0.1 * jax.random.normal(k3, (C, C, 3, 3), dtype=jnp.float32)
    b2 = 0.1 * jax.random.normal(k4, (C,), dtype=jnp.float32)

    out = resnet_block(x, w1, b1, w2, b2)
    out = jax.block_until_ready(out)

    ref = jax.block_until_ready(resnet_block_ref(x, w1, b1, w2, b2))
    assert out.shape == (B, C, H, W)
    assert jnp.max(jnp.abs(out - ref)) < 1e-4, "mismatch vs reference"

    print("KERNEL_OK")
</pallas_src>

<mosaic_0001>
module attributes {stable_mosaic.version = 11 : i64} {
  func.func @resnet_block_kernel(%arg0: i32, %arg1: memref<1x4x256xf32, #tpu.memory_space<vmem>>, %arg2: memref<4x36xf32, #tpu.memory_space<vmem>>, %arg3: memref<4x1xf32, #tpu.memory_space<vmem>>, %arg4: memref<4x36xf32, #tpu.memory_space<vmem>>, %arg5: memref<4x1xf32, #tpu.memory_space<vmem>>, %arg6: memref<1x4x256xf32, #tpu.memory_space<vmem>>, %arg7: memref<4x18x18xf32, #tpu.memory_space<vmem>>) attributes {dimension_semantics = [#tpu.dimension_semantics<parallel>], iteration_bounds = array<i64: 2>, scalar_prefetch = 0 : i64, scratch_operands = 1 : i64, tpu.core_type = #tpu.core_type<tc>, window_params = [{transform_indices = @transform_0, window_bounds = array<i64: 1, 4, 256>}, {pipeline_mode = #tpu.pipeline_mode<synchronous>, transform_indices = @transform_1, window_bounds = array<i64: 4, 36>}, {pipeline_mode = #tpu.pipeline_mode<synchronous>, transform_indices = @transform_2, window_bounds = array<i64: 4, 1>}, {pipeline_mode = #tpu.pipeline_mode<synchronous>, transform_indices = @transform_3, window_bounds = array<i64: 4, 36>}, {pipeline_mode = #tpu.pipeline_mode<synchronous>, transform_indices = @transform_4, window_bounds = array<i64: 4, 1>}, {transform_indices = @transform_5, window_bounds = array<i64: 1, 4, 256>}]} {
    %c0 = arith.constant 0 : index
    %c0_0 = arith.constant 0 : index
    %c0_1 = arith.constant 0 : index
    %0 = vector.load %arg1[%c0, %c0_0, %c0_1] : memref<1x4x256xf32, #tpu.memory_space<vmem>>, vector<1x4x256xf32>
    %1 = vector.shape_cast %0 : vector<1x4x256xf32> to vector<4x256xf32>
    %2 = vector.shape_cast %1 : vector<4x256xf32> to vector<4x16x16xf32>
    %c0_2 = arith.constant 0 : index
    %c1 = arith.constant 1 : index
    %c1_3 = arith.constant 1 : index
    %3 = vector.load %arg7[%c0_2, %c1, %c1_3] : memref<4x18x18xf32, #tpu.memory_space<vmem>>, vector<4x16x16xf32>
    tpu.vector_store %arg7[%c0_2, %c1, %c1_3], %2 {strides = array<i32>} : memref<4x18x18xf32, #tpu.memory_space<vmem>>, vector<4x16x16xf32>,
    %4 = vector.extract_strided_slice %2 {offsets = [0, 1, 0], sizes = [4, 1, 16], strides = [1, 1, 1]} : vector<4x16x16xf32> to vector<4x1x16xf32>
    %c0_4 = arith.constant 0 : index
    %c0_5 = arith.constant 0 : index
    %c1_6 = arith.constant 1 : index
    %5 = vector.load %arg7[%c0_4, %c0_5, %c1_6] : memref<4x18x18xf32, #tpu.memory_space<vmem>>, vector<4x1x16xf32>
    tpu.vector_store %arg7[%c0_4, %c0_5, %c1_6], %4 {strides = array<i32>} : memref<4x18x18xf32, #tpu.memory_space<vmem>>, vector<4x1x16xf32>,
    %6 = vector.extract_strided_slice %2 {offsets = [0, 14, 0], sizes = [4, 1, 16], strides = [1, 1, 1]} : vector<4x16x16xf32> to vector<4x1x16xf32>
    %c0_7 = arith.constant 0 : index
    %c17 = arith.constant 17 : index
    %c1_8 = arith.constant 1 : index
    %7 = vector.load %arg7[%c0_7, %c17, %c1_8] : memref<4x18x18xf32, #tpu.memory_space<vmem>>, vector<4x1x16xf32>
    tpu.vector_store %arg7[%c0_7, %c17, %c1_8], %6 {strides = array<i32>} : memref<4x18x18xf32, #tpu.memory_space<vmem>>, vector<4x1x16xf32>,
    %c0_9 = arith.constant 0 : index
    %c0_10 = arith.constant 0 : index
    %c2 = arith.constant 2 : index
    %8 = vector.load %arg7[%c0_9, %c0_10, %c2] : memref<4x18x18xf32, #tpu.memory_space<vmem>>, vector<4x18x1xf32>
    %c0_11 = arith.constant 0 : index
    %c0_12 = arith.constant 0 : index
    %c0_13 = arith.constant 0 : index
    %9 = vector.load %arg7[%c0_11, %c0_12, %c0_13] : memref<4x18x18xf32, #tpu.memory_space<vmem>>, vector<4x18x1xf32>
    tpu.vector_store %arg7[%c0_11, %c0_12, %c0_13], %8 {strides = array<i32>} : memref<4x18x18xf32, #tpu.memory_space<vmem>>, vector<4x18x1xf32>,
    %c0_14 = arith.constant 0 : index
    %c0_15 = arith.constant 0 : index
    %c15 = arith.constant 15 : index
    %10 = vector.load %arg7[%c0_14, %c0_15, %c15] : memref<4x18x18xf32, #tpu.memory_space<vmem>>, vector<4x18x1xf32>
    %c0_16 = arith.constant 0 : index
    %c0_17 = arith.constant 0 : index
    %c17_18 = arith.constant 17 : index
    %11 = vector.load %arg7[%c0_16, %c0_17, %c17_18] : memref<4x18x18xf32, #tpu.memory_space<vmem>>, vector<4x18x1xf32>
    tpu.vector_store %arg7[%c0_16, %c0_17, %c17_18], %10 {strides = array<i32>} : memref<4x18x18xf32, #tpu.memory_space<vmem>>, vector<4x18x1xf32>,
    %c0_19 = arith.constant 0 : index
    %c0_20 = arith.constant 0 : index
    %c0_21 = arith.constant 0 : index
    %12 = vector.load %arg7[%c0_19, %c0_20, %c0_21] : memref<4x18x18xf32, #tpu.memory_space<vmem>>, vector<4x18x18xf32>
    %13 = vector.extract_strided_slice %12 {offsets = [0, 0, 0], sizes = [4, 16, 16], strides = [1, 1, 1]} : vector<4x18x18xf32> to vector<4x16x16xf32>
    %14 = vector.shape_cast %13 : vector<4x16x16xf32> to vector<4x256xf32>
    %15 = vector.extract_strided_slice %12 {offsets = [0, 0, 1], sizes = [4, 16, 16], strides = [1, 1, 1]} : vector<4x18x18xf32> to vector<4x16x16xf32>
    %16 = vector.shape_cast %15 : vector<4x16x16xf32> to vector<4x256xf32>
    %17 = vector.extract_strided_slice %12 {offsets = [0, 0, 2], sizes = [4, 16, 16], strides = [1, 1, 1]} : vector<4x18x18xf32> to vector<4x16x16xf32>
    %18 = vector.shape_cast %17 : vector<4x16x16xf32> to vector<4x256xf32>
    %19 = vector.extract_strided_slice %12 {offsets = [0, 1, 0], sizes = [4, 16, 16], strides = [1, 1, 1]} : vector<4x18x18xf32> to vector<4x16x16xf32>
    %20 = vector.shape_cast %19 : vector<4x16x16xf32> to vector<4x256xf32>
    %21 = vector.extract_strided_slice %12 {offsets = [0, 1, 1], sizes = [4, 16, 16], strides = [1, 1, 1]} : vector<4x18x18xf32> to vector<4x16x16xf32>
    %22 = vector.shape_cast %21 : vector<4x16x16xf32> to vector<4x256xf32>
    %23 = vector.extract_strided_slice %12 {offsets = [0, 1, 2], sizes = [4, 16, 16], strides = [1, 1, 1]} : vector<4x18x18xf32> to vector<4x16x16xf32>
    %24 = vector.shape_cast %23 : vector<4x16x16xf32> to vector<4x256xf32>
    %25 = vector.extract_strided_slice %12 {offsets = [0, 2, 0], sizes = [4, 16, 16], strides = [1, 1, 1]} : vector<4x18x18xf32> to vector<4x16x16xf32>
    %26 = vector.shape_cast %25 : vector<4x16x16xf32> to vector<4x256xf32>
    %27 = vector.extract_strided_slice %12 {offsets = [0, 2, 1], sizes = [4, 16, 16], strides = [1, 1, 1]} : vector<4x18x18xf32> to vector<4x16x16xf32>
    %28 = vector.shape_cast %27 : vector<4x16x16xf32> to vector<4x256xf32>
    %29 = vector.extract_strided_slice %12 {offsets = [0, 2, 2], sizes = [4, 16, 16], strides = [1, 1, 1]} : vector<4x18x18xf32> to vector<4x16x16xf32>
    %30 = vector.shape_cast %29 : vector<4x16x16xf32> to vector<4x256xf32>
    %31 = tpu.concatenate %14, %16, %18, %20, %22, %24, %26, %28, %30 in 0 : vector<4x256xf32>, vector<4x256xf32>, vector<4x256xf32>, vector<4x256xf32>, vector<4x256xf32>, vector<4x256xf32>, vector<4x256xf32>, vector<4x256xf32>, vector<4x256xf32> -> vector<36x256xf32>
    %c0_22 = arith.constant 0 : index
    %c0_23 = arith.constant 0 : index
    %32 = vector.load %arg2[%c0_22, %c0_23] : memref<4x36xf32, #tpu.memory_space<vmem>>, vector<4x36xf32>
    %cst = arith.constant dense<0.000000e+00> : vector<4x256xf32>
    %33 = tpu.matmul %32, %31, %cst {dimension_numbers = #tpu.dot_dimension_numbers<[1], [0], [0], [1], [0, 0, 1, 1], [], []>} : vector<4x36xf32>, vector<36x256xf32>, vector<4x256xf32> -> vector<4x256xf32>
    %c0_24 = arith.constant 0 : index
    %c0_25 = arith.constant 0 : index
    %34 = vector.load %arg3[%c0_24, %c0_25] : memref<4x1xf32, #tpu.memory_space<vmem>>, vector<4x1xf32>
    %35 = vector.broadcast %34 : vector<4x1xf32> to vector<4x256xf32>
    %36 = arith.addf %33, %35 : vector<4x256xf32>
    %cst_26 = arith.constant dense<0.000000e+00> : vector<4xf32>
    %37 = vector.multi_reduction <add>, %36, %cst_26 [1] : vector<4x256xf32> to vector<4xf32>
    %38 = vector.shape_cast %37 : vector<4xf32> to vector<4x1xf32>
    %cst_27 = arith.constant 3.906250e-03 : f32
    %39 = vector.broadcast %cst_27 : f32 to vector<4x1xf32>
    %40 = arith.mulf %38, %39 : vector<4x1xf32>
    %41 = arith.mulf %36, %36 : vector<4x256xf32>
    %cst_28 = arith.constant dense<0.000000e+00> : vector<4xf32>
    %42 = vector.multi_reduction <add>, %41, %cst_28 [1] : vector<4x256xf32> to vector<4xf32>
    %43 = vector.shape_cast %42 : vector<4xf32> to vector<4x1xf32>
    %cst_29 = arith.constant 3.906250e-03 : f32
    %44 = vector.broadcast %cst_29 : f32 to vector<4x1xf32>
    %45 = arith.mulf %43, %44 : vector<4x1xf32>
    %46 = arith.mulf %40, %40 : vector<4x1xf32>
    %47 = arith.subf %45, %46 : vector<4x1xf32>
    %48 = vector.broadcast %40 : vector<4x1xf32> to vector<4x256xf32>
    %49 = arith.subf %36, %48 : vector<4x256xf32>
    %cst_30 = arith.constant 9.99999974E-6 : f32
    %50 = vector.broadcast %cst_30 : f32 to vector<4x1xf32>
    %51 = arith.addf %47, %50 : vector<4x1xf32>
    %52 = math.rsqrt %51 : vector<4x1xf32>
    %53 = vector.broadcast %52 : vector<4x1xf32> to vector<4x256xf32>
    %54 = arith.mulf %49, %53 : vector<4x256xf32>
    %cst_31 = arith.constant 0.000000e+00 : f32
    %55 = vector.broadcast %cst_31 : f32 to vector<4x256xf32>
    %56 = arith.cmpf ogt, %54, %55 : vector<4x256xf32>
    %cst_32 = arith.constant 0.00999999977 : f32
    %57 = vector.broadcast %cst_32 : f32 to vector<4x256xf32>
    %58 = arith.mulf %57, %54 : vector<4x256xf32>
    %59 = arith.select %56, %54, %58 : vector<4x256xi1>, vector<4x256xf32>
    %60 = vector.shape_cast %59 : vector<4x256xf32> to vector<4x16x16xf32>
    %c0_33 = arith.constant 0 : index
    %c1_34 = arith.constant 1 : index
    %c1_35 = arith.constant 1 : index
    %61 = vector.load %arg7[%c0_33, %c1_34, %c1_35] : memref<4x18x18xf32, #tpu.memory_space<vmem>>, vector<4x16x16xf32>
    tpu.vector_store %arg7[%c0_33, %c1_34, %c1_35], %60 {strides = array<i32>} : memref<4x18x18xf32, #tpu.memory_space<vmem>>, vector<4x16x16xf32>,
    %62 = vector.extract_strided_slice %60 {offsets = [0, 1, 0], sizes = [4, 1, 16], strides = [1, 1, 1]} : vector<4x16x16xf32> to vector<4x1x16xf32>
    %c0_36 = arith.constant 0 : index
    %c0_37 = arith.constant 0 : index
    %c1_38 = arith.constant 1 : index
    %63 = vector.load %arg7[%c0_36, %c0_37, %c1_38] : memref<4x18x18xf32, #tpu.memory_space<vmem>>, vector<4x1x16xf32>
    tpu.vector_store %arg7[%c0_36, %c0_37, %c1_38], %62 {strides = array<i32>} : memref<4x18x18xf32, #tpu.memory_space<vmem>>, vector<4x1x16xf32>,
    %64 = vector.extract_strided_slice %60 {offsets = [0, 14, 0], sizes = [4, 1, 16], strides = [1, 1, 1]} : vector<4x16x16xf32> to vector<4x1x16xf32>
    %c0_39 = arith.constant 0 : index
    %c17_40 = arith.constant 17 : index
    %c1_41 = arith.constant 1 : index
    %65 = vector.load %arg7[%c0_39, %c17_40, %c1_41] : memref<4x18x18xf32, #tpu.memory_space<vmem>>, vector<4x1x16xf32>
    tpu.vector_store %arg7[%c0_39, %c17_40, %c1_41], %64 {strides = array<i32>} : memref<4x18x18xf32, #tpu.memory_space<vmem>>, vector<4x1x16xf32>,
    %c0_42 = arith.constant 0 : index
    %c0_43 = arith.constant 0 : index
    %c2_44 = arith.constant 2 : index
    %66 = vector.load %arg7[%c0_42, %c0_43, %c2_44] : memref<4x18x18xf32, #tpu.memory_space<vmem>>, vector<4x18x1xf32>
    %c0_45 = arith.constant 0 : index
    %c0_46 = arith.constant 0 : index
    %c0_47 = arith.constant 0 : index
    %67 = vector.load %arg7[%c0_45, %c0_46, %c0_47] : memref<4x18x18xf32, #tpu.memory_space<vmem>>, vector<4x18x1xf32>
    tpu.vector_store %arg7[%c0_45, %c0_46, %c0_47], %66 {strides = array<i32>} : memref<4x18x18xf32, #tpu.memory_space<vmem>>, vector<4x18x1xf32>,
    %c0_48 = arith.constant 0 : index
    %c0_49 = arith.constant 0 : index
    %c15_50 = arith.constant 15 : index
    %68 = vector.load %arg7[%c0_48, %c0_49, %c15_50] : memref<4x18x18xf32, #tpu.memory_space<vmem>>, vector<4x18x1xf32>
    %c0_51 = arith.constant 0 : index
    %c0_52 = arith.constant 0 : index
    %c17_53 = arith.constant 17 : index
    %69 = vector.load %arg7[%c0_51, %c0_52, %c17_53] : memref<4x18x18xf32, #tpu.memory_space<vmem>>, vector<4x18x1xf32>
    tpu.vector_store %arg7[%c0_51, %c0_52, %c17_53], %68 {strides = array<i32>} : memref<4x18x18xf32, #tpu.memory_space<vmem>>, vector<4x18x1xf32>,
    %c0_54 = arith.constant 0 : index
    %c0_55 = arith.constant 0 : index
    %c0_56 = arith.constant 0 : index
    %70 = vector.load %arg7[%c0_54, %c0_55, %c0_56] : memref<4x18x18xf32, #tpu.memory_space<vmem>>, vector<4x18x18xf32>
    %71 = vector.extract_strided_slice %70 {offsets = [0, 0, 0], sizes = [4, 16, 16], strides = [1, 1, 1]} : vector<4x18x18xf32> to vector<4x16x16xf32>
    %72 = vector.shape_cast %71 : vector<4x16x16xf32> to vector<4x256xf32>
    %73 = vector.extract_strided_slice %70 {offsets = [0, 0, 1], sizes = [4, 16, 16], strides = [1, 1, 1]} : vector<4x18x18xf32> to vector<4x16x16xf32>
    %74 = vector.shape_cast %73 : vector<4x16x16xf32> to vector<4x256xf32>
    %75 = vector.extract_strided_slice %70 {offsets = [0, 0, 2], sizes = [4, 16, 16], strides = [1, 1, 1]} : vector<4x18x18xf32> to vector<4x16x16xf32>
    %76 = vector.shape_cast %75 : vector<4x16x16xf32> to vector<4x256xf32>
    %77 = vector.extract_strided_slice %70 {offsets = [0, 1, 0], sizes = [4, 16, 16], strides = [1, 1, 1]} : vector<4x18x18xf32> to vector<4x16x16xf32>
    %78 = vector.shape_cast %77 : vector<4x16x16xf32> to vector<4x256xf32>
    %79 = vector.extract_strided_slice %70 {offsets = [0, 1, 1], sizes = [4, 16, 16], strides = [1, 1, 1]} : vector<4x18x18xf32> to vector<4x16x16xf32>
    %80 = vector.shape_cast %79 : vector<4x16x16xf32> to vector<4x256xf32>
    %81 = vector.extract_strided_slice %70 {offsets = [0, 1, 2], sizes = [4, 16, 16], strides = [1, 1, 1]} : vector<4x18x18xf32> to vector<4x16x16xf32>
    %82 = vector.shape_cast %81 : vector<4x16x16xf32> to vector<4x256xf32>
    %83 = vector.extract_strided_slice %70 {offsets = [0, 2, 0], sizes = [4, 16, 16], strides = [1, 1, 1]} : vector<4x18x18xf32> to vector<4x16x16xf32>
    %84 = vector.shape_cast %83 : vector<4x16x16xf32> to vector<4x256xf32>
    %85 = vector.extract_strided_slice %70 {offsets = [0, 2, 1], sizes = [4, 16, 16], strides = [1, 1, 1]} : vector<4x18x18xf32> to vector<4x16x16xf32>
    %86 = vector.shape_cast %85 : vector<4x16x16xf32> to vector<4x256xf32>
    %87 = vector.extract_strided_slice %70 {offsets = [0, 2, 2], sizes = [4, 16, 16], strides = [1, 1, 1]} : vector<4x18x18xf32> to vector<4x16x16xf32>
    %88 = vector.shape_cast %87 : vector<4x16x16xf32> to vector<4x256xf32>
    %89 = tpu.concatenate %72, %74, %76, %78, %80, %82, %84, %86, %88 in 0 : vector<4x256xf32>, vector<4x256xf32>, vector<4x256xf32>, vector<4x256xf32>, vector<4x256xf32>, vector<4x256xf32>, vector<4x256xf32>, vector<4x256xf32>, vector<4x256xf32> -> vector<36x256xf32>
    %c0_57 = arith.constant 0 : index
    %c0_58 = arith.constant 0 : index
    %90 = vector.load %arg4[%c0_57, %c0_58] : memref<4x36xf32, #tpu.memory_space<vmem>>, vector<4x36xf32>
    %cst_59 = arith.constant dense<0.000000e+00> : vector<4x256xf32>
    %91 = tpu.matmul %90, %89, %cst_59 {dimension_numbers = #tpu.dot_dimension_numbers<[1], [0], [0], [1], [0, 0, 1, 1], [], []>} : vector<4x36xf32>, vector<36x256xf32>, vector<4x256xf32> -> vector<4x256xf32>
    %c0_60 = arith.constant 0 : index
    %c0_61 = arith.constant 0 : index
    %92 = vector.load %arg5[%c0_60, %c0_61] : memref<4x1xf32, #tpu.memory_space<vmem>>, vector<4x1xf32>
    %93 = vector.broadcast %92 : vector<4x1xf32> to vector<4x256xf32>
    %94 = arith.addf %91, %93 : vector<4x256xf32>
    %cst_62 = arith.constant dense<0.000000e+00> : vector<4xf32>
    %95 = vector.multi_reduction <add>, %94, %cst_62 [1] : vector<4x256xf32> to vector<4xf32>
    %96 = vector.shape_cast %95 : vector<4xf32> to vector<4x1xf32>
    %cst_63 = arith.constant 3.906250e-03 : f32
    %97 = vector.broadcast %cst_63 : f32 to vector<4x1xf32>
    %98 = arith.mulf %96, %97 : vector<4x1xf32>
    %99 = arith.mulf %94, %94 : vector<4x256xf32>
    %cst_64 = arith.constant dense<0.000000e+00> : vector<4xf32>
    %100 = vector.multi_reduction <add>, %99, %cst_64 [1] : vector<4x256xf32> to vector<4xf32>
    %101 = vector.shape_cast %100 : vector<4xf32> to vector<4x1xf32>
    %cst_65 = arith.constant 3.906250e-03 : f32
    %102 = vector.broadcast %cst_65 : f32 to vector<4x1xf32>
    %103 = arith.mulf %101, %102 : vector<4x1xf32>
    %104 = arith.mulf %98, %98 : vector<4x1xf32>
    %105 = arith.subf %103, %104 : vector<4x1xf32>
    %106 = vector.broadcast %98 : vector<4x1xf32> to vector<4x256xf32>
    %107 = arith.subf %94, %106 : vector<4x256xf32>
    %cst_66 = arith.constant 9.99999974E-6 : f32
    %108 = vector.broadcast %cst_66 : f32 to vector<4x1xf32>
    %109 = arith.addf %105, %108 : vector<4x1xf32>
    %110 = math.rsqrt %109 : vector<4x1xf32>
    %111 = vector.broadcast %110 : vector<4x1xf32> to vector<4x256xf32>
    %112 = arith.mulf %107, %111 : vector<4x256xf32>
    %113 = arith.addf %1, %112 : vector<4x256xf32>
    %c0_67 = arith.constant 0 : index
    %c0_68 = arith.constant 0 : index
    %c0_69 = arith.constant 0 : index
    %114 = vector.load %arg6[%c0_67, %c0_68, %c0_69] : memref<1x4x256xf32, #tpu.memory_space<vmem>>, vector<1x4x256xf32>
    %115 = vector.shape_cast %114 : vector<1x4x256xf32> to vector<4x256xf32>
    %116 = vector.shape_cast %113 : vector<4x256xf32> to vector<1x4x256xf32>
    tpu.vector_store %arg6[%c0_67, %c0_68, %c0_69], %116 {strides = array<i32>} : memref<1x4x256xf32, #tpu.memory_space<vmem>>, vector<1x4x256xf32>,
    return
  }
  func.func @transform_0(%arg0: i32) -> (i32, i32, i32) {
    %c0_i32 = arith.constant 0 : i32
    %c0_i32_0 = arith.constant 0 : i32
    %c0_i32_1 = arith.constant 0 : i32
    return %arg0, %c0_i32, %c0_i32_0 : i32, i32, i32
  }
  func.func @transform_1(%arg0: i32) -> (i32, i32) {
    %c0_i32 = arith.constant 0 : i32
    %c0_i32_0 = arith.constant 0 : i32
    %c0_i32_1 = arith.constant 0 : i32
    return %c0_i32, %c0_i32_0 : i32, i32
  }
  func.func @transform_2(%arg0: i32) -> (i32, i32) {
    %c0_i32 = arith.constant 0 : i32
    %c0_i32_0 = arith.constant 0 : i32
    %c0_i32_1 = arith.constant 0 : i32
    return %c0_i32, %c0_i32_0 : i32, i32
  }
  func.func @transform_3(%arg0: i32) -> (i32, i32) {
    %c0_i32 = arith.constant 0 : i32
    %c0_i32_0 = arith.constant 0 : i32
    %c0_i32_1 = arith.constant 0 : i32
    return %c0_i32, %c0_i32_0 : i32, i32
  }
  func.func @transform_4(%arg0: i32) -> (i32, i32) {
    %c0_i32 = arith.constant 0 : i32
    %c0_i32_0 = arith.constant 0 : i32
    %c0_i32_1 = arith.constant 0 : i32
    return %c0_i32, %c0_i32_0 : i32, i32
  }
  func.func @transform_5(%arg0: i32) -> (i32, i32, i32) {
    %c0_i32 = arith.constant 0 : i32
    %c0_i32_0 = arith.constant 0 : i32
    %c0_i32_1 = arith.constant 0 : i32
    return %arg0, %c0_i32, %c0_i32_0 : i32, i32, i32
  }
}

</mosaic_0001>

<bundles_post_ra>
// kernel: tpu_custom_call.1
= control target key start
LH: loop header
LB: loop body
LE: loop exit
PB: predicated region body
PF: predicated region fallthrough
CT: control target
= control target key end

     0   :  { %10 = vsyncpa [#allocation4], 0  ;;  %s9808_s0 = inlined_call_operand.hbm [shape: f32[2,4,256], index: 0, kind: input, shape index: {}]   ;;  %s9809_s1 = inlined_call_operand.vmem [shape: f32[4,36], index: 1, kind: input, shape index: {}]   ;;  %s9810_s2 = inlined_call_operand.vmem [shape: f32[4,1], index: 2, kind: input, shape index: {}]   ;;  %s9811_s3 = inlined_call_operand.vmem [shape: f32[4,36], index: 3, kind: input, shape index: {}]   ;;  %s9812_s4 = inlined_call_operand.vmem [shape: f32[4,1], index: 4, kind: input, shape index: {}]   ;;  %s9813_s5 = inlined_call_operand.hbm [shape: f32[2,4,256], index: 5, kind: output, shape index: {}]  }
   0x1   :  { %12 = vsyncpa [#allocation4 + $0x1], 0 }
   0x2   :  { %13 = vsyncpa [#allocation5], 0 }
   0x3   :  { %15 = vsyncpa [#allocation5 + $0x1], 0  ;;  %s6425_s18 = smov 0   ;;  %s6427_s19 = smov 0  }
   0x4   :  { %s6429_s20 = smov 0   ;;  %s6431_s21 = smov 0  }
   0x5 LB: > { %s6446_s22 = sadd.s32 4294967295, %s6376_s21   ;;  %s5606_s23 = sadd.s32 4294967294, %s6376_s21   ;;  %s6376_s21 = sphi %s6431_s21, %s9993_s21   ;;  %s6372_s20 = sphi %s6429_s20, %s9992_s20   ;;  %s6368_s19 = sphi %s6427_s19, %s9991_s19   ;;  %s6364_s18 = sphi %s6425_s18, %s9990_s18  }
   0x6   : > { %s6450_s24 = sadd.s32 1, %s6376_s21   ;;  %s28_s25 = sadd.s32 1, %s6372_s20 }
   0x7   : > { %s25_s26 = ssub.s32 %s6376_s21, %s6450_s24  ;;  %p35_p0 = scmp.ne.s32.totalorder %s6372_s20, %s6368_s19 }
   0x8   : > { %p26_p1 = scmp.eq.s32.totalorder %s25_s26, 0  ;;  %p36_p2 = scmp.eq.s32.totalorder %s6376_s21, 0 }
   0x9   : > { %p41_p3 = scmp.ne.s32.totalorder %s6368_s19, %s6364_s18  ;;  %p42_p4 = scmp.eq.s32.totalorder %s6446_s22, 0 }
   0xa   : > { %s6462_s27 = scalar_select %p26_p1, %s6372_s20, %s28_s25  }
   0xb   : > { %p6464_p5 = por %p36_p2, %p35_p0  ;;  %p6468_p6 = por %p42_p4, %p41_p3 }
   0xc   : > { %p149_p7 = scmp.eq.s32.totalorder %s6446_s22, 1  ;;  %p155_p8 = scmp.eq.s32.totalorder %s5606_s23, 1 }
   0xd   : > { %p5660_p10 = scmp.lt.s32.totalorder %s6376_s21, 2  ;;  %s187_s7 = sand.u32 1, %s6372_s20  }
   0xe   : > { %p6475_p11 = por %p149_p7, %p35_p0  ;;  %p6479_p12 = por %p155_p8, %p41_p3 }
   0xf   : > { %s5630_s8 = sshll.u32 %s6376_s21, 7  ;;  %s5609_s9 = sshll.u32 %s187_s7, 3 }
  0x10   : > { %s9857_s30 = scalar_select %p6475_p11, 1, 0 }
  0x11   : > { %s9858_s6 = scalar_select %p6479_p12, 1, 0 }
  0x12   : > { %s6488_s12 = scalar_lea.hbm %s9808_s0, %s5630_s8  ;;  %s191_s13 = scalar_lea.vmem [#allocation3], %s5609_s9 }
  0x13   : > { %s199_s14 = sshll.u32 %s191_s13, 4  ;;  %p6492_p13 = pnand %p5660_p10, %p6464_p5  ;;  %s6496_s14 = int_to_ptr.vmem [resolvable:$true] %s199_s14 }
  0x14   : > { %s188_s16 = scalar_lea.sflag [#allocation4], %s187_s7  ;;  %s6280_s17 = scalar_lea.hbm %s6488_s12, 128 }
  0x15   : > { %p6281_p2 = scmp.ne.s32.totalorder %s6488_s12, %s6280_s17  ;;  %p6282_p3 = pneg %p6492_p13 }
  0x16   : > { %s6285_s26 = scalar_lea.hbm %s9808_s0, 256  ;;  %p6286_p5 = scmp.lt.u32.totalorder %s6488_s12, %s9808_s0 }
  0x17   : > { %p6283_p4 = pnand %p6282_p3, %p6281_p2  ;;  %p6287_p8 = scmp.lt.u32.totalorder %s6285_s26, %s6280_s17 }
  0x18   : > { %p6289_p9 = scmp.lt.u32.totalorder %s6280_s17, %s6488_s12 }
  0x19   : > { %p6284_p7 = pneg %p6283_p4  ;;  %p6288_p10 = por %p6287_p8, %p6286_p5 }
  0x1b   : > { %p6290_p0 = por %p6289_p9, %p6288_p10 }
  0x1d   : > { %p6291_p1 = pnand %p6290_p0, %p6284_p7 }
  0x1f   : > { %6294 = shalt.err (!%p6291_p1)
}
  0x20   : > { %s6295_s7 = scalar_lea.vmem %s6496_s14, 128  ;;  %s6378_s9 = smov [#allocation3]  }
  0x21   : > { %p6296_p2 = scmp.ne.s32.totalorder %s6496_s14, %s6295_s7  ;;  %s6300_s10 = sshll.u32 %s6378_s9, 4  ;;  %s6301_s10 = int_to_ptr.vmem [resolvable:$false] %s6300_s10 }
  0x22   : > { %s6302_s11 = scalar_lea.vmem %s6301_s10, 256  ;;  %p6303_p11 = scmp.lt.s32.totalorder %s6496_s14, %s6301_s10 }
  0x23   : > { %p6298_p4 = pnand %p6296_p2, %p6282_p3  ;;  %p6304_p5 = scmp.lt.s32.totalorder %s6302_s11, %s6295_s7 }
  0x25   : > { %p6299_p12 = pneg %p6298_p4  ;;  %p6305_p8 = por %p6304_p5, %p6303_p11 }
  0x27   : > { %p6306_p9 = pnand %p6305_p8, %p6299_p12 }
  0x29   : > { %6309 = shalt.err (!%p6306_p9)
}
  0x2a   : > { %5655 = dma.hbm_to_vmem [thread:$0]  (!%p6492_p13), %s6488_s12, 128, %s6496_s14, %s188_s16  }
  0x2b   : > { %p9860_p0 = scmp.lt.s32.totalorder %s6376_s21, 3  ;;  %p9861_p1 = scmp.ge.s32.totalorder %s6376_s21, 1 }
  0x2d   : > { %p205_p3 = pnand %p9861_p1, %p9860_p0 }
  0x2f   : > { %208 = sbr.rel (%p205_p3) target bundleno = 2701 (0xa8d), region = 40 }
  0x36   : > { %s6530_s13 = sand.u32 1, %s6368_s19  }
  0x37   : > { %s5613_s17 = sshll.u32 %s6530_s13, 3  ;;  %s211_s23 = scalar_lea.sflag [#allocation4], %s6530_s13 }
  0x38   : > { %s6536_s15 = scalar_lea.vmem [#allocation3], %s5613_s17 }
  0x39   : > { %6355 = dma.done.wait (%p6468_p6), %s211_s23, 128  }
  0x3a   : > { %6357 = vsyncadd (%p6468_p6), %s211_s23, 4294967168  ;;  %v241_v0 = vld [vmem:[%s6536_s15] sm:$0xff]  ;;  %s6379_s12 = smov 32   ;;  %s6380_s14 = smov 64   ;;  %v9815_v1 = vmov 0.0   ;;  %v284_v5 = vlaneseq  ;;  %vm464_vm0 = vcmask 138248  }
  0x3b   : > { %265 = vrot.lane.b32.xlu1 %v241_v0, %s6379_s12  ;;  %257 = vrot.lane.b32.xlu0 %v241_v0, %s6380_s14  ;;  %s6382_s16 = smov 16   ;;  %s6383_s25 = smov 48   ;;  %v6387_v3 = vmov 1983009808   ;;  %v6388_v15 = vmov 1934713408  }
  0x3c   : > { %2888 = vmatprep.mubr.f32.mxu0 %v9815_v1  ;;  %5486 = vmatprep.mubr.f32.mxu1 %v9815_v1  ;;  %s6384_s29 = smov 112   ;;  %s6385_s26 = smov 96   ;;  %v282_v4 = vunpack.c.l.s4 %v6387_v3  ;;  %v6552_v8 = vshrl.u32 %v284_v5, 7  ;;  %v299_v16 = vunpack.c.l.s4 %v6388_v15  ;;  %v243_v23 = vrot.slane %v241_v0, 4 }
  0x3d   : > { %s6386_s28 = smov 80   ;;  %s6389_s8 = smov 1   ;;  %vm501_vm1 = vcmask 132105   ;;  %vm534_vm2 = vcmask 133130   ;;  %vm599_vm3 = vcmask 7168   ;;  %vm602_vm4 = vcmask 1024  }
  0x3e   : > { %v283_v7 = vunpack.c.0.s8 %v282_v4  ;;  %v300_v25 = vunpack.c.0.s8 %v299_v16  ;;  %v475_v3 = vsub.s32 1, %v6552_v8  ;;  %s6390_s7 = smov 126   ;;  %s6391_s9 = smov 2   ;;  %vm673_vm5 = vcmask 146568  }
  0x3f   : > { %269 = vrot.lane.b32.xlu1 %v241_v0, %s6382_s16  ;;  %261 = vrot.lane.b32.xlu0 %v241_v0, %s6383_s25  ;;  %s6392_s10 = smov 127   ;;  %vm676_vm6 = vcmask 140424   ;;  %vm1384_vm7 = vcmask 1046528   ;;  %vm2079_vm8 = vcmask 1045504   ;;  %vm891_vm9 = vcmask 130048   ;;  %p9987_p11 = scmp.ne.s32.totalorder %s9857_s30, 0 }
  0x40   : > { %v6555_v18 = vsub.s32 %v283_v7, %v6552_v8  ;;  %v6563_v38 = vsub.s32 %v300_v25, %v6552_v8  ;;  %vm893_vm10 = vcmask 261120   ;;  %vm9832_vm11 = vcmask 392192  }
  0x41   : > { %vm897_vm12 = vcmask 523264   ;;  %vm899_vm13 = vcmask 654336   ;;  %vm901_vm14 = vcmask 785408   ;;  %vm903_vm15 = vcmask 916480  }
  0x43   : > { %245 = vrot.lane.b32.xlu0 %v241_v0, %s6384_s29  ;;  %249 = vrot.lane.b32.xlu1 %v241_v0, %s6385_s26 }
  0x47   : > { %253 = vrot.lane.b32.xlu0 %v241_v0, %s6386_s28 }
  0xad   : > { %v266_v2 = vpop.permute.xlu1 %265  ;;  %v258_v6 = vpop.permute.xlu0 %257 }
  0xae   : > { %v267_v13 = vrot.slane %v266_v2, 4  ;;  %v259_v14 = vrot.slane %v258_v6, 4  ;;  %v314_v19 = vcombine.low %v258_v6, %v266_v2 }
  0xb0   : > { %v382_v24 = vcombine.low %v259_v14, %v267_v13  ;;  %v321_v29 = vrot.slane %v314_v19, %v6555_v18 }
  0xb1   : > { %v270_v9 = vpop.permute.xlu1 %269  ;;  %v262_v10 = vpop.permute.xlu0 %261 }
  0xb2   : > { %v271_v11 = vrot.slane %v270_v9, 4  ;;  %v263_v12 = vrot.slane %v262_v10, 4  ;;  %v322_v17 = vcombine.low %v262_v10, %v270_v9  ;;  %v389_v37 = vrot.slane %v382_v24, %v6555_v18 }
  0xb4   : > { %v390_v20 = vcombine.low %v263_v12, %v271_v11  ;;  %v329_v28 = vrot.slane %v322_v17, %v6555_v18  ;;  %v508_v11 = vsub.s32 2, %v6552_v8 }
  0xb5   : > { %v246_v21 = vpop.permute.xlu0 %245  ;;  %v250_v22 = vpop.permute.xlu1 %249 }
  0xb6   : > { %v251_v26 = vrot.slane %v250_v22, 4  ;;  %v280_v27 = vcombine.low %v241_v0, %v250_v22  ;;  %v397_v30 = vrot.slane %v390_v20, %v6555_v18  ;;  %v247_v33 = vrot.slane %v246_v21, 4 }
  0xb7   : > { %v330_v39 = vcombine.low %v321_v29, %v329_v28  ;;  %v331_v53 = vcombine.high %v321_v29, %v329_v28 }
  0xb8   : > { %v348_v31 = vcombine.low %v243_v23, %v251_v26  ;;  %v287_v34 = vrot.slane %v280_v27, %v6555_v18  ;;  %v398_v43 = vcombine.low %v389_v37, %v397_v30  ;;  %v399_v56 = vcombine.high %v389_v37, %v397_v30 }
  0xb9   : > { %v254_v32 = vpop.permute.xlu0 %253  ;;  %v338_v47 = vrot.slane %v330_v39, %v6563_v38  ;;  %v345_v60 = vrot.slane %v331_v53, %v6563_v38 }
  0xba   : > { %v255_v35 = vrot.slane %v254_v32, 4  ;;  %v288_v36 = vcombine.low %v246_v21, %v254_v32  ;;  %v355_v40 = vrot.slane %v348_v31, %v6555_v18  ;;  %v406_v49 = vrot.slane %v398_v43, %v6563_v38 }
  0xbb   : > { %v413_v62 = vrot.slane %v399_v56, %v6563_v38 }
  0xbc   : > { %v295_v41 = vrot.slane %v288_v36, %v6555_v18  ;;  %v356_v42 = vcombine.low %v247_v33, %v255_v35  ;;  %v414_v13 = vcombine.high %v406_v49, %v9815_v1  ;;  %v509_v14 = vrot.slane %v406_v49, %v508_v11 }
  0xbd   : > { %v415_v16 = vcombine.high %v413_v62, %v9815_v1  ;;  %v517_v17 = vrot.slane %v413_v62, %v508_v11 }
  0xbe   : > { %v296_v44 = vcombine.low %v287_v34, %v295_v41  ;;  %v363_v45 = vrot.slane %v356_v42, %v6555_v18  ;;  %v297_v50 = vcombine.high %v287_v34, %v295_v41  ;;  %v513_v15 = vrot.slane %v414_v13, %v508_v11 }
  0xbf   : > { %v521_v19 = vrot.slane %v415_v16, %v508_v11 }
  0xc0   : > { %v304_v46 = vrot.slane %v296_v44, %v6563_v38  ;;  %v364_v48 = vcombine.low %v355_v40, %v363_v45  ;;  %v365_v55 = vcombine.high %v355_v40, %v363_v45  ;;  %v311_v57 = vrot.slane %v297_v50, %v6563_v38 }
  0xc2   : > { %v432_v51 = vcombine.low %v304_v46, %v338_v47  ;;  %v372_v52 = vrot.slane %v364_v48, %v6563_v38  ;;  %v5615_v58 = vcombine.high %v304_v46, %v338_v47  ;;  %v379_v61 = vrot.slane %v365_v55, %v6563_v38 }
  0xc3   : > { %v436_v63 = vcombine.low %v311_v57, %v345_v60  ;;  %v5617_v2 = vcombine.high %v311_v57, %v345_v60  ;;  %v312_v5 = vcombine.high %v304_v46, %v9815_v1  ;;  %v476_v6 = vrot.slane %v304_v46, %v475_v3 }
  0xc4   : > { %440 = vrot.lane.b32.xlu1 %v432_v51, %s6389_s8  ;;  %v433_v54 = vcombine.low %v372_v52, %v406_v49  ;;  %v5616_v59 = vcombine.high %v372_v52, %v406_v49  ;;  %v437_v0 = vcombine.low %v379_v61, %v413_v62  ;;  %v5618_v4 = vcombine.high %v379_v61, %v413_v62 }
  0xc5   : > { %v480_v7 = vrot.slane %v312_v5, %v475_v3  ;;  %v313_v9 = vcombine.high %v311_v57, %v9815_v1  ;;  %v484_v10 = vrot.slane %v311_v57, %v475_v3 }
  0xc6   : > { %442 = vrot.lane.b32.xlu0 %v433_v54, %s6389_s8 }
  0xc7   : > { %v488_v12 = vrot.slane %v313_v9, %v475_v3 }
  0xc8   : > { %444 = vrot.lane.b32.xlu1 %v5615_v58, %s6389_s8 }
  0xca   : > { %446 = vrot.lane.b32.xlu0 %v5616_v59, %s6389_s8 }
  0xcc   : > { %448 = vrot.lane.b32.xlu1 %v436_v63, %s6389_s8 }
  0xce   : > { %450 = vrot.lane.b32.xlu0 %v437_v0, %s6389_s8 }
  0xd0   : > { %452 = vrot.lane.b32.xlu1 %v5617_v2, %s6389_s8 }
  0xd2   : > { %454 = vrot.lane.b32.xlu0 %v5618_v4, %s6389_s8 }
  0xd4   : > { %489 = vrot.lane.b32.xlu1 %v476_v6, %s6389_s8 }
  0xd6   : > { %491 = vrot.lane.b32.xlu0 %v480_v7, %s6389_s8 }
  0xd8   : > { %493 = vrot.lane.b32.xlu1 %v484_v10, %s6389_s8 }
  0xda   : > { %495 = vrot.lane.b32.xlu0 %v488_v12, %s6389_s8 }
  0xdc   : > { %522 = vrot.lane.b32.xlu1 %v509_v14, %s6389_s8 }
  0xde   : > { %524 = vrot.lane.b32.xlu0 %v513_v15, %s6389_s8 }
  0xe0   : > { %526 = vrot.lane.b32.xlu1 %v517_v17, %s6389_s8 }
  0xe2   : > { %528 = vrot.lane.b32.xlu0 %v521_v19, %s6389_s8 }
 0x136   : > { %v441_v8 = vpop.permute.xlu1 %440 }
 0x137   : > { %465 = vst.msk [vmem:[#allocation2 + $0x1] sm:$0xff] %vm464_vm0, %v441_v8 }
 0x138   : > { %v443_v20 = vpop.permute.xlu0 %442 }
 0x139   : > { %466 = vst.msk [vmem:[#allocation2 + $0x9] sm:$0xff] %vm464_vm0, %v443_v20 }
 0x13a   : > { %v445_v21 = vpop.permute.xlu1 %444 }
 0x13b   : > { %467 = vst.msk [vmem:[#allocation2 + $0x19] sm:$0xff] %vm464_vm0, %v445_v21 }
 0x13c   : > { %v447_v22 = vpop.permute.xlu0 %446 }
 0x13d   : > { %468 = vst.msk [vmem:[#allocation2 + $0x21] sm:$0xff] %vm464_vm0, %v447_v22 }
 0x13e   : > { %v449_v23 = vpop.permute.xlu1 %448 }
 0x13f   : > { %469 = vst.msk [vmem:[#allocation2 + $0x31] sm:$0xff] %vm464_vm0, %v449_v23 }
 0x140   : > { %v451_v24 = vpop.permute.xlu0 %450  ;;  %v540_v40 = vld [vmem:[#allocation2 + $0x8] sm:$0xff] }
 0x141   : > { %470 = vst.msk [vmem:[#allocation2 + $0x39] sm:$0xff] %vm464_vm0, %v451_v24 }
 0x142   : > { %v453_v25 = vpop.permute.xlu1 %452 }
 0x143   : > { %471 = vst.msk [vmem:[#allocation2 + $0x49] sm:$0xff] %vm464_vm0, %v453_v25 }
 0x144   : > { %v455_v26 = vpop.permute.xlu0 %454  ;;  %v543_v27 = vld [vmem:[#allocation2 + $0x20] sm:$0xff] }
 0x145   : > { %472 = vst.msk [vmem:[#allocation2 + $0x51] sm:$0xff] %vm464_vm0, %v455_v26  ;;  %571 = vrot.lane.b32.xlu0 %v543_v27, %s6390_s7 }
 0x146   : > { %v490_v28 = vpop.permute.xlu1 %489 }
 0x147   : > { %502 = vst.msk [vmem:[#allocation2 - $0x1] sm:$0x2] %vm501_vm1, %v490_v28 }
 0x148   : > { %v492_v29 = vpop.permute.xlu0 %491  ;;  %v546_v42 = vld [vmem:[#allocation2 + $0x38] sm:$0xff] }
 0x149   : > { %503 = vst.msk [vmem:[#allocation2 + $0x17] sm:$0x2] %vm501_vm1, %v492_v29 }
 0x14a   : > { %v494_v30 = vpop.permute.xlu1 %493 }
 0x14b   : > { %504 = vst.msk [vmem:[#allocation2 + $0x2f] sm:$0x2] %vm501_vm1, %v494_v30 }
 0x14c   : > { %v496_v31 = vpop.permute.xlu0 %495  ;;  %v549_v32 = vld [vmem:[#allocation2 + $0x50] sm:$0xff] }
 0x14d   : > { %505 = vst.msk [vmem:[#allocation2 + $0x47] sm:$0x2] %vm501_vm1, %v496_v31  ;;  %583 = vrot.lane.b32.xlu0 %v549_v32, %s6390_s7 }
 0x14e   : > { %v523_v33 = vpop.permute.xlu1 %522  ;;  %v539_v34 = vld [vmem:[#allocation2] sm:$0xff] }
 0x14f   : > { %535 = vst.msk [vmem:[#allocation2 + $0xf] sm:$0x4] %vm534_vm2, %v523_v33  ;;  %563 = vrot.lane.b32.xlu1 %v539_v34, %s6390_s7 }
 0x150   : > { %v525_v35 = vpop.permute.xlu0 %524  ;;  %v542_v44 = vld [vmem:[#allocation2 + $0x18] sm:$0xff] }
 0x151   : > { %536 = vst.msk [vmem:[#allocation2 + $0x27] sm:$0x4] %vm534_vm2, %v525_v35 }
 0x152   : > { %v527_v36 = vpop.permute.xlu1 %526  ;;  %v545_v37 = vld [vmem:[#allocation2 + $0x30] sm:$0xff] }
 0x153   : > { %537 = vst.msk [vmem:[#allocation2 + $0x3f] sm:$0x4] %vm534_vm2, %v527_v36  ;;  %575 = vrot.lane.b32.xlu1 %v545_v37, %s6390_s7 }
 0x154   : > { %v529_v39 = vpop.permute.xlu0 %528  ;;  %v548_v46 = vld [vmem:[#allocation2 + $0x48] sm:$0xff] }
 0x155   : > { %538 = vst.msk [vmem:[#allocation2 + $0x57] sm:$0x4] %vm534_vm2, %v529_v39  ;;  %vm9834_vm2 = vcmask 1043456  }
 0x156   : > { %v541_v41 = vld [vmem:[#allocation2 + $0x10] sm:$0x3] }
 0x157   : > { %565 = vrot.lane.b32.xlu1 %v540_v40, %s6390_s7  ;;  %567 = vrot.lane.b32.xlu0 %v541_v41, %s6390_s7 }
 0x158   : > { %v544_v45 = vld [vmem:[#allocation2 + $0x28] sm:$0x3] }
 0x15a   : > { %v547_v43 = vld [vmem:[#allocation2 + $0x40] sm:$0x3] }
 0x15b   : > { %577 = vrot.lane.b32.xlu1 %v546_v42, %s6390_s7  ;;  %579 = vrot.lane.b32.xlu0 %v547_v43, %s6390_s7 }
 0x15c   : > { %v550_v47 = vld [vmem:[#allocation2 + $0x58] sm:$0x3] }
 0x15f   : > { %569 = vrot.lane.b32.xlu1 %v542_v44, %s6390_s7  ;;  %573 = vrot.lane.b32.xlu0 %v544_v45, %s6390_s7 }
 0x163   : > { %581 = vrot.lane.b32.xlu1 %v548_v46, %s6390_s7  ;;  %585 = vrot.lane.b32.xlu0 %v550_v47, %s6390_s7 }
 0x1b7   : > { %v572_v48 = vpop.permute.xlu0 %571 }
 0x1b8   : > { %605 = vst.msk [vmem:[#allocation2 + $0x20] sm:$0xff] %vm599_vm3, %v572_v48 }
 0x1bf   : > { %v584_v49 = vpop.permute.xlu0 %583  ;;  %v617_v50 = vld [vmem:[#allocation2 + $0x20] sm:$0xff] }
 0x1c0   : > { %611 = vst.msk [vmem:[#allocation2 + $0x50] sm:$0xff] %vm599_vm3, %v584_v49  ;;  %645 = vrot.lane.b32.xlu0 %v617_v50, %s6391_s9 }
 0x1c1   : > { %v564_v51 = vpop.permute.xlu1 %563 }
 0x1c2   : > { %600 = vst.msk [vmem:[#allocation2] sm:$0xff] %vm599_vm3, %v564_v51 }
 0x1c5   : > { %v576_v52 = vpop.permute.xlu1 %575 }
 0x1c6   : > { %607 = vst.msk [vmem:[#allocation2 + $0x30] sm:$0xff] %vm599_vm3, %v576_v52 }
 0x1c7   : > { %v623_v53 = vld [vmem:[#allocation2 + $0x50] sm:$0xff] }
 0x1c8   : > { %657 = vrot.lane.b32.xlu0 %v623_v53, %s6391_s9 }
 0x1c9   : > { %v566_v54 = vpop.permute.xlu1 %565  ;;  %v568_v55 = vpop.permute.xlu0 %567  ;;  %v613_v56 = vld [vmem:[#allocation2] sm:$0xff] }
 0x1ca   : > { %601 = vst.msk [vmem:[#allocation2 + $0x8] sm:$0xff] %vm599_vm3, %v566_v54  ;;  %637 = vrot.lane.b32.xlu1 %v613_v56, %s6391_s9 }
 0x1cb   : > { %603 = vst.msk [vmem:[#allocation2 + $0x10] sm:$0x3] %vm602_vm4, %v568_v55 }
 0x1cd   : > { %v578_v57 = vpop.permute.xlu1 %577  ;;  %v580_v58 = vpop.permute.xlu0 %579  ;;  %v619_v59 = vld [vmem:[#allocation2 + $0x30] sm:$0xff] }
 0x1ce   : > { %608 = vst.msk [vmem:[#allocation2 + $0x38] sm:$0xff] %vm599_vm3, %v578_v57  ;;  %649 = vrot.lane.b32.xlu1 %v619_v59, %s6391_s9 }
 0x1cf   : > { %609 = vst.msk [vmem:[#allocation2 + $0x40] sm:$0x3] %vm602_vm4, %v580_v58 }
 0x1d1   : > { %v570_v60 = vpop.permute.xlu1 %569  ;;  %v574_v61 = vpop.permute.xlu0 %573  ;;  %v614_v62 = vld [vmem:[#allocation2 + $0x8] sm:$0xff] }
 0x1d2   : > { %v615_v63 = vld [vmem:[#allocation2 + $0x10] sm:$0x3]  ;;  %604 = vst.msk [vmem:[#allocation2 + $0x18] sm:$0xff] %vm599_vm3, %v570_v60  ;;  %639 = vrot.lane.b32.xlu1 %v614_v62, %s6391_s9 }
 0x1d3   : > { %606 = vst.msk [vmem:[#allocation2 + $0x28] sm:$0x3] %vm602_vm4, %v574_v61  ;;  %641 = vrot.lane.b32.xlu0 %v615_v63, %s6391_s9 }
 0x1d5   : > { %v582_v0 = vpop.permute.xlu1 %581  ;;  %v586_v2 = vpop.permute.xlu0 %585  ;;  %v620_v3 = vld [vmem:[#allocation2 + $0x38] sm:$0xff] }
 0x1d6   : > { %v621_v4 = vld [vmem:[#allocation2 + $0x40] sm:$0x3]  ;;  %610 = vst.msk [vmem:[#allocation2 + $0x48] sm:$0xff] %vm599_vm3, %v582_v0  ;;  %651 = vrot.lane.b32.xlu1 %v620_v3, %s6391_s9 }
 0x1d7   : > { %612 = vst.msk [vmem:[#allocation2 + $0x58] sm:$0x3] %vm602_vm4, %v586_v2  ;;  %653 = vrot.lane.b32.xlu0 %v621_v4, %s6391_s9 }
 0x1d9   : > { %v616_v5 = vld [vmem:[#allocation2 + $0x18] sm:$0xff] }
 0x1da   : > { %v618_v6 = vld [vmem:[#allocation2 + $0x28] sm:$0x3]  ;;  %643 = vrot.lane.b32.xlu1 %v616_v5, %s6391_s9 }
 0x1db   : > { %647 = vrot.lane.b32.xlu0 %v618_v6, %s6391_s9 }
 0x1dd   : > { %v622_v7 = vld [vmem:[#allocation2 + $0x48] sm:$0xff] }
 0x1de   : > { %v624_v9 = vld [vmem:[#allocation2 + $0x58] sm:$0x3]  ;;  %655 = vrot.lane.b32.xlu1 %v622_v7, %s6391_s9 }
 0x1df   : > { %659 = vrot.lane.b32.xlu0 %v624_v9, %s6391_s9 }
 0x232   : > { %v646_v10 = vpop.permute.xlu0 %645 }
 0x233   : > { %679 = vst.msk [vmem:[#allocation2 + $0x20] sm:$0xff] %vm673_vm5, %v646_v10 }
 0x23a   : > { %v658_v11 = vpop.permute.xlu0 %657  ;;  %v6647_v12 = vld [vmem:[#allocation2 + $0x20] sm:$0xff] }
 0x23b   : > { %685 = vst.msk [vmem:[#allocation2 + $0x50] sm:$0xff] %vm673_vm5, %v658_v11  ;;  %926 = vrot.lane.b32.xlu0 %v6647_v12, %s6392_s10  ;;  %v1391_v49 = vrot.slane %v6647_v12, 1  ;;  %v2086_v52 = vrot.slane %v6647_v12, 2 }
 0x23c   : > { %v638_v13 = vpop.permute.xlu1 %637 }
 0x23d   : > { %674 = vst.msk [vmem:[#allocation2] sm:$0xff] %vm673_vm5, %v638_v13 }
 0x240   : > { %v650_v14 = vpop.permute.xlu1 %649 }
 0x241   : > { %681 = vst.msk [vmem:[#allocation2 + $0x30] sm:$0xff] %vm673_vm5, %v650_v14 }
 0x242   : > { %v6654_v15 = vld [vmem:[#allocation2 + $0x50] sm:$0xff] }
 0x243   : > { %934 = vrot.lane.b32.xlu0 %v6654_v15, %s6392_s10  ;;  %v1401_v51 = vrot.slane %v6654_v15, 1  ;;  %v2096_v57 = vrot.slane %v6654_v15, 2 }
 0x244   : > { %v640_v16 = vpop.permute.xlu1 %639  ;;  %v6658_v19 = vld [vmem:[#allocation2] sm:$0xff] }
 0x245   : > { %v642_v17 = vpop.permute.xlu0 %641  ;;  %675 = vst.msk [vmem:[#allocation2 + $0x8] sm:$0xff] %vm673_vm5, %v640_v16  ;;  %920 = vrot.lane.b32.xlu1 %v6658_v19, %s6392_s10  ;;  %v1385_v35 = vrot.slane %v6658_v19, 1 }
 0x246   : > { %677 = vst.msk [vmem:[#allocation2 + $0x10] sm:$0x3] %vm676_vm6, %v642_v17 }
 0x248   : > { %v652_v8 = vpop.permute.xlu1 %651  ;;  %v6664_v21 = vld [vmem:[#allocation2 + $0x30] sm:$0xff] }
 0x249   : > { %v654_v20 = vpop.permute.xlu0 %653  ;;  %682 = vst.msk [vmem:[#allocation2 + $0x38] sm:$0xff] %vm673_vm5, %v652_v8  ;;  %928 = vrot.lane.b32.xlu1 %v6664_v21, %s6392_s10  ;;  %v1395_v34 = vrot.slane %v6664_v21, 1 }
 0x24a   : > { %683 = vst.msk [vmem:[#allocation2 + $0x40] sm:$0x3] %vm676_vm6, %v654_v20 }
 0x24c   : > { %v644_v22 = vpop.permute.xlu1 %643  ;;  %v6670_v24 = vld [vmem:[#allocation2 + $0x8] sm:$0xff] }
 0x24d   : > { %v648_v23 = vpop.permute.xlu0 %647  ;;  %v6672_v25 = vld [vmem:[#allocation2 + $0x10] sm:$0x3]  ;;  %678 = vst.msk [vmem:[#allocation2 + $0x18] sm:$0xff] %vm673_vm5, %v644_v22  ;;  %1150 = vrot.lane.b32.xlu1 %v6658_v19, %s6390_s7  ;;  %v1386_v26 = vrot.slane %v6670_v24, 1 }
 0x24e   : > { %680 = vst.msk [vmem:[#allocation2 + $0x28] sm:$0x3] %vm676_vm6, %v648_v23  ;;  %v1388_v27 = vrot.slane %v6672_v25, 1 }
 0x24f   : > { %v6708_v43 = vsel %vm1384_vm7, %v1385_v35, %v1386_v26 }
 0x250   : > { %v656_v28 = vpop.permute.xlu1 %655  ;;  %v6680_v30 = vld [vmem:[#allocation2 + $0x38] sm:$0xff]  ;;  %v6693_v36 = vsel %vm1384_vm7, %v1386_v26, %v1388_v27 }
 0x251   : > { %v660_v29 = vpop.permute.xlu0 %659  ;;  %v6682_v31 = vld [vmem:[#allocation2 + $0x40] sm:$0x3]  ;;  %684 = vst.msk [vmem:[#allocation2 + $0x48] sm:$0xff] %vm673_vm5, %v656_v28  ;;  %1158 = vrot.lane.b32.xlu1 %v6664_v21, %s6390_s7  ;;  %v1396_v32 = vrot.slane %v6680_v30, 1 }
 0x252   : > { %686 = vst.msk [vmem:[#allocation2 + $0x58] sm:$0x3] %vm676_vm6, %v660_v29  ;;  %v1398_v33 = vrot.slane %v6682_v31, 1 }
 0x253   : > { %v6699_v39 = vsel %vm1384_vm7, %v1395_v34, %v1396_v32  ;;  %v784_v34 = vcombine.high %v6647_v12, %v6654_v15 }
 0x254   : > { %v6696_v37 = vsel %vm1384_vm7, %v1396_v32, %v1398_v33  ;;  %v6701_v40 = vld [vmem:[#allocation2 + $0x18] sm:$0xff]  ;;  %v1413_v44 = vcombine.low %v6708_v43, %v6699_v39  ;;  %v1414_v45 = vcombine.high %v6708_v43, %v6699_v39  ;;  %v2081_v32 = vrot.slane %v6670_v24, 2 }
 0x255   : > { %v1481_v41 = vcombine.low %v6693_v36, %v6696_v37  ;;  %v1482_v42 = vcombine.high %v6693_v36, %v6696_v37  ;;  %922 = vrot.lane.b32.xlu1 %v6670_v24, %s6392_s10  ;;  %924 = vrot.lane.b32.xlu0 %v6701_v40, %s6392_s10  ;;  %v6718_v46 = vld [vmem:[#allocation2 + $0x28] sm:$0x3]  ;;  %v1390_v47 = vrot.slane %v6701_v40, 1  ;;  %v2085_v48 = vrot.slane %v6701_v40, 2 }
 0x256   : > { %v1393_v53 = vrot.slane %v6718_v46, 1  ;;  %v6772_v10 = vrot.slane %v1413_v44, %v6555_v18  ;;  %v6798_v22 = vrot.slane %v1414_v45, %v6555_v18  ;;  %v2083_v33 = vrot.slane %v6672_v25, 2 }
 0x257   : > { %v1392_v59 = vsel %vm1384_vm7, %v1390_v47, %v1391_v49  ;;  %v6742_v60 = vsel %vm2079_vm8, %v2085_v48, %v2086_v52  ;;  %v6775_v11 = vrot.slane %v1481_v41, %v6555_v18  ;;  %v6795_v20 = vrot.slane %v1482_v42, %v6555_v18 }
 0x258   : > { %v6723_v50 = vld [vmem:[#allocation2 + $0x48] sm:$0xff]  ;;  %v6751_v63 = vsel %vm1384_vm7, %v1391_v49, %v1393_v53  ;;  %v6823_v35 = vsel %vm2079_vm8, %v2081_v32, %v2083_v33  ;;  %v2091_v41 = vrot.slane %v6680_v30, 2  ;;  %v2093_v42 = vrot.slane %v6682_v31, 2 }
 0x259   : > { %v6728_v54 = vld [vmem:[#allocation2 + $0x58] sm:$0x3]  ;;  %930 = vrot.lane.b32.xlu1 %v6680_v30, %s6392_s10  ;;  %932 = vrot.lane.b32.xlu0 %v6723_v50, %s6392_s10  ;;  %v1400_v55 = vrot.slane %v6723_v50, 1  ;;  %v2095_v56 = vrot.slane %v6723_v50, 2  ;;  %v2080_v31 = vrot.slane %v6658_v19, 2  ;;  %v2090_v45 = vrot.slane %v6664_v21, 2 }
 0x25a   : > { %v1403_v58 = vrot.slane %v6728_v54, 1  ;;  %v6831_v25 = vsel %vm2079_vm8, %v2091_v41, %v2093_v42  ;;  %v2088_v48 = vrot.slane %v6718_v46, 2  ;;  %v767_v33 = vcombine.low %v6670_v24, %v6680_v30 }
 0x25b   : > { %v1402_v61 = vsel %vm1384_vm7, %v1400_v55, %v1401_v51  ;;  %v6748_v62 = vsel %vm2079_vm8, %v2095_v56, %v2096_v57  ;;  %v6846_v44 = vsel %vm2079_vm8, %v2080_v31, %v2081_v32  ;;  %v6853_v47 = vsel %vm2079_vm8, %v2090_v45, %v2091_v41 }
 0x25c   : > { %v6754_v0 = vsel %vm1384_vm7, %v1401_v51, %v1403_v58  ;;  %v1429_v2 = vcombine.low %v1392_v59, %v1402_v61  ;;  %v1430_v3 = vcombine.high %v1392_v59, %v1402_v61  ;;  %v783_v42 = vcombine.low %v6647_v12, %v6654_v15 }
 0x25d   : > { %1152 = vrot.lane.b32.xlu1 %v6670_v24, %s6390_s7  ;;  %1156 = vrot.lane.b32.xlu0 %v6647_v12, %s6390_s7  ;;  %v1497_v6 = vcombine.low %v6751_v63, %v6754_v0  ;;  %v1498_v7 = vcombine.high %v6751_v63, %v6754_v0  ;;  %v716_v23 = vcombine.high %v6701_v40, %v6723_v50 }
 0x25e   : > { %v6769_v9 = vrot.slane %v1429_v2, %v6555_v18  ;;  %v6778_v13 = vrot.slane %v1430_v3, %v6555_v18 }
 0x25f   : > { %v6781_v14 = vrot.slane %v1497_v6, %v6555_v18  ;;  %v6784_v16 = vrot.slane %v1498_v7, %v6555_v18  ;;  %v7026_v12 = vrot.slane %v716_v23, %v6555_v18 }
 0x260   : > { %v1446_v8 = vcombine.high %v6772_v10, %v6769_v9 }
 0x261   : > { %1160 = vrot.lane.b32.xlu1 %v6680_v30, %s6390_s7  ;;  %1164 = vrot.lane.b32.xlu0 %v6654_v15, %s6390_s7  ;;  %v1514_v26 = vcombine.high %v6775_v11, %v6781_v14  ;;  %v1529_v27 = vcombine.low %v6795_v20, %v6784_v16 }
 0x265   : > { %1154 = vrot.lane.b32.xlu0 %v6701_v40, %s6390_s7  ;;  %1851 = vrot.lane.b32.xlu1 %v6693_v36, %s6390_s7 }
 0x269   : > { %1162 = vrot.lane.b32.xlu0 %v6723_v50, %s6390_s7  ;;  %1859 = vrot.lane.b32.xlu1 %v6696_v37, %s6390_s7 }
 0x26d   : > { %1853 = vrot.lane.b32.xlu0 %v1392_v59, %s6390_s7  ;;  %2316 = vrot.lane.b32.xlu1 %v6823_v35, %s6392_s10 }
 0x271   : > { %1861 = vrot.lane.b32.xlu0 %v1402_v61, %s6390_s7  ;;  %2324 = vrot.lane.b32.xlu1 %v6831_v25, %s6392_s10 }
 0x275   : > { %2318 = vrot.lane.b32.xlu0 %v6742_v60, %s6392_s10  ;;  %1849 = vrot.lane.b32.xlu1 %v6708_v43, %s6390_s7 }
 0x279   : > { %2326 = vrot.lane.b32.xlu0 %v6748_v62, %s6392_s10  ;;  %1857 = vrot.lane.b32.xlu1 %v6699_v39, %s6390_s7 }
 0x27d   : > { %1623 = vrot.lane.b32.xlu0 %v1392_v59, %s6392_s10  ;;  %2314 = vrot.lane.b32.xlu1 %v6846_v44, %s6392_s10 }
 0x281   : > { %1631 = vrot.lane.b32.xlu0 %v1402_v61, %s6392_s10  ;;  %2322 = vrot.lane.b32.xlu1 %v6853_v47, %s6392_s10 }
 0x285   : > { %2548 = vrot.lane.b32.xlu0 %v6742_v60, %s6390_s7  ;;  %1621 = vrot.lane.b32.xlu1 %v6693_v36, %s6392_s10  ;;  %v6878_v36 = vsel %vm2079_vm8, %v2086_v52, %v2088_v48 }
 0x289   : > { %2556 = vrot.lane.b32.xlu0 %v6748_v62, %s6390_s7  ;;  %1629 = vrot.lane.b32.xlu1 %v6696_v37, %s6392_s10  ;;  %v2098_v37 = vrot.slane %v6728_v54, 2 }
 0x28d   : > { %1619 = vrot.lane.b32.xlu1 %v6708_v43, %s6392_s10  ;;  %1855 = vrot.lane.b32.xlu0 %v6751_v63, %s6390_s7 }
 0x291   : > { %1627 = vrot.lane.b32.xlu1 %v6699_v39, %s6392_s10  ;;  %1863 = vrot.lane.b32.xlu0 %v6754_v0, %s6390_s7  ;;  %v6888_v39 = vsel %vm2079_vm8, %v2096_v57, %v2098_v37 }
 0x295   : > { %2546 = vrot.lane.b32.xlu1 %v6823_v35, %s6390_s7  ;;  %2320 = vrot.lane.b32.xlu0 %v6878_v36, %s6392_s10 }
 0x299   : > { %2554 = vrot.lane.b32.xlu1 %v6831_v25, %s6390_s7  ;;  %2328 = vrot.lane.b32.xlu0 %v6888_v39, %s6392_s10 }
 0x29d   : > { %2544 = vrot.lane.b32.xlu1 %v6846_v44, %s6390_s7  ;;  %1625 = vrot.lane.b32.xlu0 %v6751_v63, %s6392_s10 }
 0x2a1   : > { %2552 = vrot.lane.b32.xlu1 %v6853_v47, %s6390_s7  ;;  %1633 = vrot.lane.b32.xlu0 %v6754_v0, %s6392_s10 }
 0x2a5   : > { %2550 = vrot.lane.b32.xlu0 %v6878_v36, %s6390_s7 }
 0x2a9   : > { %2558 = vrot.lane.b32.xlu0 %v6888_v39, %s6390_s7 }
 0x2ad   : > { %v927_v49 = vpop.permute.xlu0 %926 }
 0x2b5   : > { %v935_v52 = vpop.permute.xlu0 %934 }
 0x2b6   : > { %v1028_v56 = vcombine.low %v927_v49, %v935_v52  ;;  %v1029_v37 = vcombine.high %v927_v49, %v935_v52  ;;  %v6961_v49 = vrot.slane %v783_v42, %v6555_v18  ;;  %v6983_v42 = vrot.slane %v1446_v8, %v6563_v38 }
 0x2b7   : > { %v6906_v43 = vpop.permute.xlu1 %920  ;;  %v715_v8 = vcombine.low %v6701_v40, %v6723_v50 }
 0x2b8   : > { %v6917_v0 = vrot.slane %v1028_v56, %v6555_v18 }
 0x2bb   : > { %v6908_v46 = vpop.permute.xlu1 %928 }
 0x2bc   : > { %v944_v57 = vcombine.low %v6906_v43, %v6908_v46 }
 0x2be   : > { %v6926_v6 = vrot.slane %v944_v57, %v6555_v18 }
 0x2bf   : > { %v6910_v51 = vpop.permute.xlu1 %1150 }
 0x2c3   : > { %v6912_v53 = vpop.permute.xlu1 %1158 }
 0x2c4   : > { %v1174_v29 = vcombine.low %v6910_v51, %v6912_v53  ;;  %v1175_v40 = vcombine.high %v6910_v51, %v6912_v53  ;;  %v7032_v51 = vrot.slane %v715_v8, %v6555_v18 }
 0x2c6   : > { %v7046_v8 = vrot.slane %v1174_v29, %v6555_v18  ;;  %v7064_v29 = vrot.slane %v1529_v27, %v6563_v38 }
 0x2c7   : > { %v923_v54 = vpop.permute.xlu1 %922  ;;  %v925_v55 = vpop.permute.xlu0 %924 }
 0x2cb   : > { %v931_v58 = vpop.permute.xlu1 %930  ;;  %v933_v59 = vpop.permute.xlu0 %932 }
 0x2cc   : > { %v1012_v61 = vcombine.low %v923_v54, %v931_v58  ;;  %v960_v63 = vcombine.low %v925_v55, %v933_v59  ;;  %v1013_v31 = vcombine.high %v923_v54, %v931_v58 }
 0x2ce   : > { %v6920_v2 = vrot.slane %v1012_v61, %v6555_v18  ;;  %v6923_v3 = vrot.slane %v960_v63, %v6555_v18  ;;  %v6951_v61 = vrot.slane %v1514_v26, %v6563_v38  ;;  %v6954_v63 = vrot.slane %v767_v33, %v6555_v18 }
 0x2cf   : > { %v6928_v7 = vpop.permute.xlu1 %1152  ;;  %v6930_v32 = vpop.permute.xlu0 %1156  ;;  %v6964_v52 = vrot.slane %v1013_v31, %v6555_v18  ;;  %v700_v33 = vcombine.high %v6658_v19, %v6664_v21  ;;  %v699_v31 = vcombine.low %v6658_v19, %v6664_v21  ;;  %v945_v19 = vcombine.high %v6906_v43, %v6908_v46 }
 0x2d0   : > { %v1045_v41 = vcombine.high %v6920_v2, %v6917_v0  ;;  %v977_v45 = vcombine.high %v6926_v6, %v6923_v3  ;;  %v961_v21 = vcombine.high %v925_v55, %v933_v59 }
 0x2d1   : > { %v7017_v43 = vrot.slane %v700_v33, %v6555_v18  ;;  %v7029_v15 = vrot.slane %v699_v31, %v6555_v18  ;;  %v959_v53 = vrot.slane %v945_v19, %v6555_v18  ;;  %v7049_v19 = vrot.slane %v1175_v40, %v6555_v18 }
 0x2d2   : > { %v6941_v48 = vrot.slane %v1045_v41, %v6563_v38  ;;  %v6969_v26 = vrot.slane %v977_v45, %v6563_v38  ;;  %v6988_v45 = vrot.slane %v1029_v37, %v6555_v18  ;;  %v975_v33 = vrot.slane %v961_v21, %v6555_v18 }
 0x2d3   : > { %v6943_v56 = vpop.permute.xlu1 %1160  ;;  %v6945_v57 = vpop.permute.xlu0 %1164  ;;  %v732_v21 = vcombine.high %v7029_v15, %v7032_v51 }
 0x2d4   : > { %v1242_v54 = vcombine.low %v6928_v7, %v6943_v56  ;;  %v1258_v58 = vcombine.low %v6930_v32, %v6945_v57  ;;  %v5709_v41 = vpack.i.bf16 %v6951_v61, %v6941_v48  ;;  %v5714_v17 = vpack.i.bf16 %v6983_v42, %v6969_v26 }
 0x2d5   : > { %v1243_v28 = vcombine.high %v6928_v7, %v6943_v56  ;;  %v992_v40 = vcombine.low %v959_v53, %v975_v33 }
 0x2d6   : > { %v6974_v5 = vrot.slane %v1242_v54, %v6555_v18  ;;  %v6977_v4 = vrot.slane %v1258_v58, %v6555_v18  ;;  %5710 = vrot.lane.b32.xlu1 %v5709_v41, %s6379_s12  ;;  %v800_v58 = vcombine.high %v6954_v63, %v6961_v49  ;;  %v1060_v41 = vcombine.low %v6964_v52, %v6988_v45 }
 0x2d7   : > { %v6991_v1 = vpop.permute.xlu1 %1851  ;;  %v1155_v54 = vpop.permute.xlu0 %1154 }
 0x2d8   : > { %9862 = vst [vmem:[#allocation9_spill] sm:$0xff] %v6991_v1  ;;  %v1275_v37 = vcombine.high %v6974_v5, %v6977_v4  ;;  %v7023_v59 = vrot.slane %v800_v58, %v6563_v38  ;;  %v1259_v58 = vcombine.high %v6930_v32, %v6945_v57  ;;  %v7043_v31 = vrot.slane %v1060_v41, %v6563_v38 }
 0x2d9   : > { %v747_v57 = vcombine.low %v7017_v43, %v7026_v12  ;;  %v768_v41 = vcombine.high %v6670_v24, %v6680_v30 }
 0x2da   : > { %v7014_v50 = vrot.slane %v1275_v37, %v6563_v38  ;;  %5715 = vrot.lane.b32.xlu1 %v5714_v17, %s6379_s12  ;;  %v1273_v27 = vrot.slane %v1259_v58, %v6555_v18 }
 0x2db   : > { %v7020_v46 = vpop.permute.xlu1 %1859  ;;  %v1163_v55 = vpop.permute.xlu0 %1162 }
 0x2dc   : > { %9863 = vst [vmem:[#allocation10_spill] sm:$0xff] %v7020_v46  ;;  %v1190_v17 = vcombine.low %v1155_v54, %v1163_v55  ;;  %v1191_v37 = vcombine.high %v1155_v54, %v1163_v55  ;;  %v5719_v23 = vpack.i.bf16 %v7014_v50, %v7023_v59  ;;  %v993_v55 = vcombine.high %v959_v53, %v975_v33 }
 0x2dd   : > { %v7091_v53 = vrot.slane %v747_v57, %v6563_v38  ;;  %v782_v33 = vrot.slane %v768_v41, %v6555_v18 }
 0x2de   : > { %v7052_v54 = vrot.slane %v1190_v17, %v6555_v18  ;;  %v1205_v7 = vrot.slane %v1191_v37, %v6555_v18  ;;  %5720 = vrot.lane.b32.xlu0 %v5719_v23, %s6379_s12  ;;  %v1257_v23 = vrot.slane %v1243_v28, %v6555_v18  ;;  %v7094_v28 = vrot.slane %v732_v21, %v6563_v38 }
 0x2df   : > { %v7056_v32 = vpop.permute.xlu1 %2316  ;;  %v7058_v56 = vpop.permute.xlu0 %1853  ;;  %v7098_v58 = vrot.slane %v993_v55, %v6563_v38  ;;  %v9868_v21 = vcombine.high %v6798_v22, %v6778_v13  ;;  %v9871_v55 = vcombine.low %v6798_v22, %v6778_v13 }
 0x2e0   : > { %9864 = vst [vmem:[#allocation11_spill] sm:$0xff] %v7056_v32  ;;  %9865 = vst [vmem:[#allocation12_spill] sm:$0xff] %v7058_v56  ;;  %v1207_v17 = vcombine.high %v7046_v8, %v7052_v54  ;;  %v1222_v37 = vcombine.low %v7049_v19, %v1205_v7  ;;  %v5724_v32 = vpack.i.bf16 %v7064_v29, %v7043_v31 }
 0x2e1   : > { %v7112_v41 = vrot.slane %v9868_v21, %v6563_v38  ;;  %v1044_v21 = vcombine.low %v6920_v2, %v6917_v0 }
 0x2e2   : > { %v7080_v1 = vrot.slane %v1222_v37, %v6563_v38  ;;  %v7083_v46 = vrot.slane %v1207_v17, %v6563_v38  ;;  %5725 = vrot.lane.b32.xlu0 %v5724_v32, %s6380_s14  ;;  %v7101_v17 = vrot.slane %v992_v40, %v6563_v38  ;;  %v798_v32 = vrot.slane %v784_v34, %v6555_v18 }
 0x2e3   : > { %v7086_v24 = vpop.permute.xlu1 %2324  ;;  %v7088_v30 = vpop.permute.xlu0 %1861  ;;  %v1290_v37 = vcombine.low %v1257_v23, %v1273_v27 }
 0x2e4   : > { %9866 = vst [vmem:[#allocation13_spill] sm:$0xff] %v7086_v24  ;;  %9867 = vst [vmem:[#allocation14_spill] sm:$0xff] %v7088_v30  ;;  %v1291_v24 = vcombine.high %v1257_v23, %v1273_v27  ;;  %v5749_v56 = vpack.i.bf16 %v7080_v1, %v7091_v53  ;;  %v5729_v57 = vpack.i.bf16 %v7083_v46, %v7094_v28 }
 0x2e5   : > { %v7124_v23 = vrot.slane %v9871_v55, %v6563_v38  ;;  %v816_v27 = vcombine.high %v782_v33, %v798_v32  ;;  %v815_v30 = vcombine.low %v782_v33, %v798_v32  ;;  %v7141_v33 = vrot.slane %v1290_v37, %v6563_v38 }
 0x2e6   : > { %5750 = vrot.lane.b32.xlu0 %v5749_v56, %s6380_s14  ;;  %5730 = vrot.lane.b32.xlu1 %v5729_v57, %s6379_s12  ;;  %v1061_v56 = vcombine.high %v6964_v52, %v6988_v45  ;;  %v976_v57 = vcombine.low %v6926_v6, %v6923_v3  ;;  %v7138_v22 = vrot.slane %v1291_v24, %v6563_v38 }
 0x2e7   : > { %v7116_v40 = vpop.permute.xlu1 %1849  ;;  %v7118_v34 = vpop.permute.xlu0 %2318  ;;  %v5734_v13 = vpack.i.bf16 %v7124_v23, %v7101_v17  ;;  %v7150_v3 = vrot.slane %v816_v27, %v6563_v38  ;;  %v7153_v6 = vrot.slane %v815_v30, %v6563_v38  ;;  %v748_v52 = vcombine.high %v7017_v43, %v7026_v12 }
 0x2e8   : > { %9869 = vst [vmem:[#allocation15_spill] sm:$0xff] %v7116_v40  ;;  %9870 = vst [vmem:[#allocation16_spill] sm:$0xff] %v7118_v34  ;;  %v5754_v34 = vpack.i.bf16 %v7112_v41, %v7098_v58  ;;  %v1223_v40 = vcombine.high %v7049_v19, %v1205_v7  ;;  %v7158_v45 = vrot.slane %v1044_v21, %v6563_v38 }
 0x2e9   : > { %v7161_v19 = vrot.slane %v976_v57, %v6563_v38  ;;  %v1274_v7 = vcombine.low %v6974_v5, %v6977_v4  ;;  %v7166_v24 = vrot.slane %v1061_v56, %v6563_v38  ;;  %v1206_v32 = vcombine.low %v7046_v8, %v7052_v54 }
 0x2ea   : > { %5755 = vrot.lane.b32.xlu0 %v5754_v34, %s6385_s26  ;;  %5735 = vrot.lane.b32.xlu1 %v5734_v13, %s6380_s14  ;;  %9872 = vst [vmem:[#allocation17_spill] sm:$0xff] %v7158_v45  ;;  %v5759_v30 = vpack.i.bf16 %v7138_v22, %v7150_v3  ;;  %v5739_v43 = vpack.i.bf16 %v7141_v33, %v7153_v6 }
 0x2eb   : > { %v7145_v0 = vpop.permute.xlu1 %1857  ;;  %v7147_v2 = vpop.permute.xlu0 %2326  ;;  %9873 = vst [vmem:[#allocation18_spill] sm:$0xff] %v7161_v19  ;;  %v7175_v12 = vrot.slane %v1223_v40, %v6563_v38  ;;  %v799_v37 = vcombine.low %v6954_v63, %v6961_v49  ;;  %v9874_v4 = vcombine.high %v6795_v20, %v6784_v16  ;;  %v9875_v8 = vcombine.low %v6772_v10, %v6769_v9 }
 0x2ec   : > { %v7198_v63 = vrot.slane %v748_v52, %v6563_v38  ;;  %v9877_v16 = vcombine.low %v6775_v11, %v6781_v14  ;;  %v731_v9 = vcombine.low %v7029_v15, %v7032_v51  ;;  %v9878_v49 = vmov 0.0  }
 0x2ed   : > { %v7183_v5 = vrot.slane %v9874_v4, %v6563_v38  ;;  %v7189_v54 = vrot.slane %v9875_v8, %v6563_v38  ;;  %v1008_v55 = vcombine.high %v7161_v19, %v9878_v49  ;;  %v7213_v27 = vrot.slane %v1274_v7, %v6563_v38 }
 0x2ee   : > { %5760 = vrot.lane.b32.xlu0 %v5759_v30, %s6385_s26  ;;  %5740 = vrot.lane.b32.xlu1 %v5739_v43, %s6380_s14  ;;  %v7204_v20 = vrot.slane %v9877_v16, %v6563_v38  ;;  %v7216_v21 = vrot.slane %v1206_v32, %v6563_v38  ;;  %v5764_v11 = vpack.i.bf16 %v7175_v12, %v7198_v63 }
 0x2ef   : > { %9876 = vst [vmem:[#allocation19_spill] sm:$0xff] %v7189_v54  ;;  %v7193_v40 = vpop.permute.xlu1 %2314  ;;  %v7195_v34 = vpop.permute.xlu0 %1623  ;;  %v5744_v10 = vpack.i.bf16 %v7183_v5, %v7166_v24  ;;  %9879 = vst [vmem:[#allocation20_spill] sm:$0xff] %v7213_v27  ;;  %v1076_v14 = vcombine.high %v7158_v45, %v9878_v49  ;;  %v7223_v15 = vrot.slane %v799_v37, %v6563_v38 }
 0x2f0   : > { %9880 = vst [vmem:[#allocation21_spill] sm:$0xff] %v7216_v21  ;;  %v1477_v57 = vcombine.high %v7189_v54, %v9878_v49  ;;  %v1545_v13 = vcombine.high %v7204_v20, %v9878_v49  ;;  %v7236_v52 = vrot.slane %v731_v9, %v6563_v38  ;;  %v1306_v30 = vcombine.high %v7213_v27, %v9878_v49 }
 0x2f1   : > { %9881 = vst [vmem:[#allocation22_spill] sm:$0xff] %v7223_v15  ;;  %v1238_v43 = vcombine.high %v7216_v21, %v9878_v49  ;;  %v831_v8 = vcombine.high %v7223_v15, %v9878_v49  ;;  %v1077_v9 = vcombine.high %v6941_v48, %v9878_v49 }
 0x2f2   : > { %5765 = vrot.lane.b32.xlu0 %v5764_v11, %s6385_s26  ;;  %5745 = vrot.lane.b32.xlu1 %v5744_v10, %s6385_s26  ;;  %9882 = vst [vmem:[#allocation23_spill] sm:$0xff] %v7236_v52  ;;  %v5774_v7 = vpack.i.bf16 %v1477_v57, %v1008_v55  ;;  %v5769_v32 = vpack.i.bf16 %v1545_v13, %v1076_v14 }
 0x2f3   : > { %v7227_v51 = vpop.permute.xlu1 %2322  ;;  %v7229_v56 = vpop.permute.xlu0 %1631  ;;  %v763_v16 = vcombine.high %v7236_v52, %v9878_v49  ;;  %v1009_v10 = vcombine.high %v6969_v26, %v9878_v49  ;;  %v5779_v55 = vpack.i.bf16 %v1306_v30, %v831_v8  ;;  %v2176_v14 = vcombine.low %v6823_v35, %v6831_v25  ;;  %v9888_v52 = vld [vmem:[#allocation12_spill] sm:$0xff] }
 0x2f4   : > { %v2108_v57 = vcombine.low %v6846_v44, %v6853_v47  ;;  %v1546_v13 = vcombine.high %v6951_v61, %v9878_v49  ;;  %v2192_v30 = vcombine.low %v6878_v36, %v6888_v39  ;;  %v1307_v61 = vcombine.high %v7014_v50, %v9878_v49 }
 0x2f5   : > { %v5789_v11 = vpack.i.bf16 %v1238_v43, %v763_v16  ;;  %v7279_v16 = vrot.slane %v2176_v14, %v6555_v18 }
 0x2f6   : > { %5775 = vrot.lane.b32.xlu0 %v5774_v7, %s6382_s16  ;;  %5770 = vrot.lane.b32.xlu1 %v5769_v32, %s6382_s16  ;;  %v1478_v7 = vcombine.high %v6983_v42, %v9878_v49  ;;  %v2109_v32 = vcombine.high %v6846_v44, %v6853_v47  ;;  %v5784_v43 = vpack.i.bf16 %v1546_v13, %v1077_v9 }
 0x2f7   : > { %v7244_v37 = vpop.permute.xlu1 %1621  ;;  %v7246_v4 = vpop.permute.xlu0 %2548  ;;  %v1308_v42 = vcombine.high %v7141_v33, %v9878_v49  ;;  %v7288_v44 = vrot.slane %v2108_v57, %v6555_v18  ;;  %v832_v47 = vcombine.high %v7023_v59, %v9878_v49  ;;  %v833_v9 = vcombine.high %v7153_v6, %v9878_v49 }
 0x2f8   : > { %v5794_v8 = vpack.i.bf16 %v1478_v7, %v1009_v10  ;;  %v9884_v10 = vcombine.high %v6742_v60, %v6748_v62  ;;  %v7307_v57 = vrot.slane %v2109_v32, %v6555_v18  ;;  %v7310_v59 = vrot.slane %v2192_v30, %v6555_v18 }
 0x2f9   : > { %v1078_v13 = vcombine.high %v7043_v31, %v9878_v49  ;;  %v5799_v7 = vpack.i.bf16 %v1307_v61, %v832_v47  ;;  %v1547_v6 = vcombine.high %v7064_v29, %v9878_v49  ;;  %v765_v32 = vcombine.high %v7091_v53, %v9878_v49 }
 0x2fa   : > { %5780 = vrot.lane.b32.xlu0 %v5779_v55, %s6382_s16  ;;  %5790 = vrot.lane.b32.xlu1 %v5789_v11, %s6382_s16  ;;  %v9883_v55 = vcombine.low %v6742_v60, %v6748_v62  ;;  %v7304_v14 = vrot.slane %v9884_v10, %v6555_v18  ;;  %v1548_v60 = vcombine.high %v7183_v5, %v9878_v49 }
 0x2fb   : > { %v7266_v48 = vpop.permute.xlu1 %1629  ;;  %v7268_v26 = vpop.permute.xlu0 %2556  ;;  %v764_v62 = vcombine.high %v7094_v28, %v9878_v49  ;;  %v1480_v5 = vcombine.high %v7112_v41, %v9878_v49  ;;  %v7336_v28 = vcombine.high %v7198_v63, %v9878_v49  ;;  %v2338_v53 = vcombine.low %v7193_v40, %v7227_v51 }
 0x2fc   : > { %v7285_v11 = vrot.slane %v9883_v55, %v6555_v18  ;;  %v5804_v61 = vpack.i.bf16 %v1547_v6, %v1078_v13  ;;  %v2156_v55 = vcombine.low %v7307_v57, %v7304_v14  ;;  %v1239_v41 = vcombine.high %v7083_v46, %v9878_v49  ;;  %v9886_v13 = vld [vmem:[#allocation16_spill] sm:$0xff] }
 0x2fd   : > { %v1240_v63 = vcombine.high %v7080_v1, %v9878_v49  ;;  %v1659_v6 = vcombine.low %v7195_v34, %v7229_v56  ;;  %v2355_v19 = vcombine.high %v9886_v13, %v7147_v2 }
 0x2fe   : > { %5785 = vrot.lane.b32.xlu0 %v5784_v43, %s6383_s25  ;;  %5795 = vrot.lane.b32.xlu1 %v5794_v8, %s6383_s25  ;;  %v5819_v43 = vpack.i.bf16 %v1308_v42, %v833_v9  ;;  %v1079_v8 = vcombine.high %v7166_v24, %v9878_v49  ;;  %v2141_v31 = vcombine.high %v7288_v44, %v7285_v11  ;;  %v9885_v9 = vld [vmem:[#allocation15_spill] sm:$0xff] }
 0x2ff   : > { %v7294_v50 = vpop.permute.xlu1 %1619  ;;  %v7296_v33 = vpop.permute.xlu0 %1855  ;;  %v1479_v24 = vcombine.high %v7124_v23, %v9878_v49  ;;  %v7342_v42 = vcombine.high %v7150_v3, %v9878_v49  ;;  %v1873_v10 = vcombine.low %v9885_v9, %v7145_v0  ;;  %v1874_v21 = vcombine.high %v9885_v9, %v7145_v0 }
 0x300   : > { %v5824_v47 = vpack.i.bf16 %v1548_v60, %v1079_v8  ;;  %v7356_v3 = vrot.slane %v2141_v31, %v6563_v38  ;;  %v1010_v8 = vcombine.high %v7101_v17, %v9878_v49  ;;  %v1011_v60 = vcombine.high %v7098_v58, %v9878_v49  ;;  %v9887_v31 = vld [vmem:[#allocation14_spill] sm:$0xff] }
 0x301   : > { %v5809_v17 = vpack.i.bf16 %v1239_v41, %v764_v62  ;;  %v5829_v27 = vpack.i.bf16 %v1240_v63, %v765_v32  ;;  %v7386_v58 = vrot.slane %v1873_v10, %v6555_v18  ;;  %v1890_v0 = vcombine.high %v9888_v52, %v9887_v31 }
 0x302   : > { %5800 = vrot.lane.b32.xlu0 %v5799_v7, %s6383_s25  ;;  %5820 = vrot.lane.b32.xlu1 %v5819_v43, %s6386_s28  ;;  %v2354_v7 = vcombine.low %v9886_v13, %v7147_v2  ;;  %v2157_v43 = vcombine.high %v7307_v57, %v7304_v14  ;;  %v1889_v14 = vcombine.low %v9888_v52, %v9887_v31  ;;  %v9889_v13 = vld [vmem:[#allocation10_spill] sm:$0xff] }
 0x303   : > { %v1628_v29 = vpop.permute.xlu1 %1627  ;;  %v7328_v30 = vpop.permute.xlu0 %1863  ;;  %v2339_v57 = vcombine.high %v7193_v40, %v7227_v51  ;;  %v1660_v51 = vcombine.high %v7195_v34, %v7229_v56  ;;  %v5814_v2 = vpack.i.bf16 %v1479_v24, %v1010_v8  ;;  %v1309_v24 = vcombine.high %v7138_v22, %v9878_v49 }
 0x304   : > { %v1643_v23 = vcombine.low %v7294_v50, %v1628_v29  ;;  %v7391_v40 = vrot.slane %v2354_v7, %v6555_v18  ;;  %v1888_v41 = vrot.slane %v1874_v21, %v6555_v18  ;;  %v2369_v9 = vrot.slane %v2355_v19, %v6555_v18  ;;  %v9890_v7 = vld [vmem:[#allocation9_spill] sm:$0xff] }
 0x305   : > { %v2353_v34 = vrot.slane %v2339_v57, %v6555_v18  ;;  %v1674_v10 = vrot.slane %v1660_v51, %v6555_v18  ;;  %v7431_v22 = vrot.slane %v2156_v55, %v6563_v38  ;;  %v7434_v21 = vrot.slane %v2157_v43, %v6563_v38  ;;  %v9892_v51 = vld [vmem:[#allocation11_spill] sm:$0xff] }
 0x306   : > { %5805 = vrot.lane.b32.xlu0 %v5804_v61, %s6386_s28  ;;  %5825 = vrot.lane.b32.xlu1 %v5824_v47, %s6384_s29  ;;  %v7377_v61 = vrot.slane %v2338_v53, %v6555_v18  ;;  %v1644_v47 = vcombine.high %v7294_v50, %v1628_v29  ;;  %v7383_v15 = vrot.slane %v1643_v23, %v6555_v18 }
 0x307   : > { %v7364_v1 = vpop.permute.xlu1 %2546  ;;  %v7366_v46 = vpop.permute.xlu0 %2320  ;;  %v7398_v50 = vrot.slane %v1659_v6, %v6555_v18  ;;  %v7407_v29 = vrot.slane %v1889_v14, %v6555_v18  ;;  %v5834_v23 = vpack.i.bf16 %v1480_v5, %v1011_v60  ;;  %v1941_v6 = vcombine.low %v9890_v7, %v9889_v13 }
 0x308   : > { %v2371_v56 = vcombine.high %v7377_v61, %v7391_v40  ;;  %v1658_v52 = vrot.slane %v1644_v47, %v6555_v18  ;;  %v1904_v19 = vrot.slane %v1890_v0, %v6555_v18  ;;  %v2386_v8 = vcombine.low %v2353_v34, %v2369_v9 }
 0x309   : > { %v1676_v53 = vcombine.high %v7383_v15, %v7398_v50  ;;  %v1906_v63 = vcombine.high %v7386_v58, %v7407_v29  ;;  %v5839_v47 = vpack.i.bf16 %v1309_v24, %v7342_v42  ;;  %v1942_v43 = vcombine.high %v9890_v7, %v9889_v13 }
 0x30a   : > { %5810 = vrot.lane.b32.xlu0 %v5809_v17, %s6383_s25  ;;  %5830 = vrot.lane.b32.xlu1 %v5829_v27, %s6386_s28  ;;  %v1241_v27 = vcombine.high %v7175_v12, %v9878_v49  ;;  %v1691_v60 = vcombine.low %v1658_v52, %v1674_v10  ;;  %v7438_v31 = vrot.slane %v2371_v56, %v6563_v38  ;;  %v9891_v17 = vld [vmem:[#allocation13_spill] sm:$0xff] }
 0x30b   : > { %v7402_v62 = vpop.permute.xlu1 %2554  ;;  %v7404_v32 = vpop.permute.xlu0 %2328  ;;  %v7445_v55 = vrot.slane %v1676_v53, %v6563_v38  ;;  %v2406_v0 = vcombine.low %v9892_v51, %v9891_v17  ;;  %v7452_v56 = vrot.slane %v1906_v63, %v6563_v38  ;;  %v2387_v54 = vcombine.high %v2353_v34, %v2369_v9 }
 0x30c   : > { %v2422_v14 = vcombine.low %v7366_v46, %v7404_v32  ;;  %v5844_v57 = vpack.i.bf16 %v1241_v27, %v7336_v28  ;;  %v1957_v28 = vcombine.low %v7296_v33, %v7328_v30  ;;  %v1692_v27 = vcombine.high %v1658_v52, %v1674_v10 }
 0x30d   : > { %v5849_v24 = vpack.i.bf16 %v7438_v31, %v7452_v56  ;;  %v7466_v63 = vrot.slane %v1691_v60, %v6563_v38  ;;  %v7469_v13 = vrot.slane %v2386_v8, %v6563_v38  ;;  %v7479_v52 = vrot.slane %v2406_v0, %v6555_v18 }
 0x30e   : > { %5815 = vrot.lane.b32.xlu0 %v5814_v2, %s6386_s28  ;;  %5835 = vrot.lane.b32.xlu1 %v5834_v23, %s6384_s29  ;;  %v1921_v2 = vcombine.low %v1888_v41, %v1904_v19  ;;  %v7455_v23 = vrot.slane %v1941_v6, %v6555_v18  ;;  %v7472_v34 = vrot.slane %v2422_v14, %v6555_v18 }
 0x30f   : > { %v2545_v12 = vpop.permute.xlu1 %2544  ;;  %v7428_v5 = vpop.permute.xlu0 %1625  ;;  %v5854_v6 = vpack.i.bf16 %v7356_v3, %v7445_v55  ;;  %v1922_v10 = vcombine.high %v1888_v41, %v1904_v19  ;;  %v1711_v60 = vcombine.low %v7244_v37, %v7266_v48  ;;  %v2584_v14 = vcombine.low %v7246_v4, %v7268_v26 }
 0x310   : > { %v7484_v8 = vrot.slane %v1921_v2, %v6563_v38  ;;  %v2423_v41 = vcombine.high %v7366_v46, %v7404_v32  ;;  %v5864_v19 = vpack.i.bf16 %v7431_v22, %v7466_v63  ;;  %v7503_v2 = vrot.slane %v1692_v27, %v6563_v38 }
 0x311   : > { %v2407_v46 = vcombine.high %v9892_v51, %v9891_v17  ;;  %v7516_v32 = vrot.slane %v1711_v60, %v6555_v18  ;;  %v2585_v27 = vcombine.high %v7246_v4, %v7268_v26  ;;  %v7521_v45 = vrot.slane %v1922_v10, %v6563_v38 }
 0x312   : > { %5845 = vrot.lane.b32.xlu0 %v5844_v57, %s6384_s29  ;;  %5840 = vrot.lane.b32.xlu1 %v5839_v47, %s6384_s29  ;;  %v7489_v57 = vrot.slane %v1957_v28, %v6555_v18  ;;  %v7494_v47 = vrot.slane %v2387_v54, %v6563_v38  ;;  %v5859_v0 = vpack.i.bf16 %v7469_v13, %v7484_v8 }
 0x313   : > { %v2553_v42 = vpop.permute.xlu1 %2552  ;;  %v7461_v53 = vpop.permute.xlu0 %1633  ;;  %v2439_v28 = vcombine.high %v7479_v52, %v7472_v34  ;;  %v2370_v17 = vcombine.low %v7377_v61, %v7391_v40  ;;  %v7535_v4 = vrot.slane %v2423_v41, %v6555_v18  ;;  %v5874_v51 = vpack.i.bf16 %v7434_v21, %v7503_v2 }
 0x314   : > { %v2568_v9 = vcombine.low %v2545_v12, %v2553_v42  ;;  %v1727_v7 = vcombine.low %v7428_v5, %v7461_v53  ;;  %v5869_v26 = vpack.i.bf16 %v7494_v47, %v7521_v45  ;;  %v7552_v40 = vrot.slane %v2407_v46, %v6555_v18 }
 0x315   : > { %v7549_v61 = vrot.slane %v2439_v28, %v6563_v38  ;;  %v1905_v10 = vcombine.low %v7386_v58, %v7407_v29  ;;  %v2209_v60 = vcombine.high %v7279_v16, %v7310_v59  ;;  %v7573_v58 = vrot.slane %v2370_v17, %v6563_v38 }
 0x316   : > { %5850 = vrot.lane.b32.xlu1 %v5849_v24, %s6379_s12  ;;  %5855 = vrot.lane.b32.xlu0 %v5854_v6, %s6379_s12  ;;  %v2569_v24 = vcombine.high %v2545_v12, %v2553_v42  ;;  %v7508_v6 = vrot.slane %v2568_v9, %v6555_v18  ;;  %v7511_v54 = vrot.slane %v1727_v7, %v6555_v18 }
 0x317   : > { %v7524_v12 = vrot.slane %v2584_v14, %v6555_v18  ;;  %v1958_v42 = vcombine.high %v7296_v33, %v7328_v30  ;;  %v1974_v9 = vcombine.high %v7455_v23, %v7489_v57  ;;  %v7559_v14 = vrot.slane %v2585_v27, %v6555_v18 }
 0x318   : > { %v7542_v33 = vrot.slane %v2569_v24, %v6555_v18  ;;  %v1744_v7 = vcombine.high %v7516_v32, %v7511_v54  ;;  %v1675_v29 = vcombine.low %v7383_v15, %v7398_v50  ;;  %v2454_v28 = vcombine.low %v7552_v40, %v7535_v4 }
 0x319   : > { %v2601_v30 = vcombine.high %v7508_v6, %v7524_v12  ;;  %v7562_v41 = vrot.slane %v1958_v42, %v6555_v18  ;;  %v7590_v42 = vrot.slane %v1905_v10, %v6563_v38  ;;  %v2140_v15 = vcombine.low %v7288_v44, %v7285_v11 }
 0x31a   : > { %5865 = vrot.lane.b32.xlu1 %v5864_v19, %s6380_s14  ;;  %5860 = vrot.lane.b32.xlu0 %v5859_v0, %s6380_s14  ;;  %v7567_v19 = vrot.slane %v1974_v9, %v6563_v38  ;;  %v7570_v0 = vrot.slane %v1942_v43, %v6555_v18  ;;  %v2616_v24 = vcombine.low %v7542_v33, %v7559_v14 }
 0x31b   : > { %v7582_v46 = vrot.slane %v2601_v30, %v6563_v38  ;;  %v7587_v43 = vrot.slane %v1744_v7, %v6563_v38  ;;  %v7600_v9 = vrot.slane %v2209_v60, %v6563_v38  ;;  %v7603_v17 = vrot.slane %v1675_v29, %v6563_v38 }
 0x31c   : > { %v5884_v27 = vpack.i.bf16 %v7549_v61, %v7567_v19  ;;  %v1989_v50 = vcombine.low %v7570_v0, %v7562_v41  ;;  %v1728_v11 = vcombine.high %v7428_v5, %v7461_v53  ;;  %v7610_v44 = vrot.slane %v2616_v24, %v6563_v38 }
 0x31d   : > { %v7615_v30 = vrot.slane %v2454_v28, %v6563_v38  ;;  %v2193_v7 = vcombine.high %v6878_v36, %v6888_v39  ;;  %v1937_v10 = vcombine.high %v7590_v42, %v9878_v49  ;;  %v1712_v60 = vcombine.high %v7244_v37, %v7266_v48  ;;  %v2551_v39 = vpop.permute.xlu0 %2550 }
 0x31e   : > { %5870 = vrot.lane.b32.xlu1 %v5869_v26, %s6385_s26  ;;  %5875 = vrot.lane.b32.xlu0 %v5874_v51, %s6385_s26  ;;  %v2402_v26 = vcombine.high %v7573_v58, %v9878_v49  ;;  %v5894_v51 = vpack.i.bf16 %v7600_v9, %v7587_v43  ;;  %v7627_v5 = vrot.slane %v1989_v50, %v6563_v38 }
 0x31f   : > { %v7630_v53 = vrot.slane %v2140_v15, %v6563_v38  ;;  %v2177_v36 = vcombine.high %v6823_v35, %v6831_v25  ;;  %v1742_v28 = vrot.slane %v1728_v11, %v6555_v18  ;;  %v1707_v48 = vcombine.high %v7603_v17, %v9878_v49 }
 0x320   : > { %v5879_v29 = vpack.i.bf16 %v2402_v26, %v1937_v10  ;;  %v5904_v37 = vpack.i.bf16 %v7615_v30, %v7627_v5  ;;  %v1708_v24 = vcombine.high %v7445_v55, %v9878_v49  ;;  %v1726_v15 = vrot.slane %v1712_v60, %v6555_v18 }
 0x321   : > { %v2172_v35 = vcombine.high %v7630_v53, %v9878_v49  ;;  %v2173_v25 = vcombine.high %v7356_v3, %v9878_v49  ;;  %v2191_v50 = vrot.slane %v2177_v36, %v6555_v18  ;;  %v2403_v26 = vcombine.high %v7438_v31, %v9878_v49  ;;  %v2559_v10 = vpop.permute.xlu0 %2558 }
 0x322   : > { %2709 = vrot.lane.b32.xlu0 %v7582_v46, %s6379_s12  ;;  %5885 = vrot.lane.b32.xlu1 %v5884_v27, %s6379_s12  ;;  %v2207_v27 = vrot.slane %v2193_v7, %v6555_v18  ;;  %v1759_v55 = vcombine.low %v1726_v15, %v1742_v28  ;;  %v2404_v7 = vcombine.high %v7469_v13, %v9878_v49 }
 0x323   : > { %v5889_v11 = vpack.i.bf16 %v2172_v35, %v1707_v48  ;;  %v1938_v60 = vcombine.high %v7452_v56, %v9878_v49  ;;  %v1939_v3 = vcombine.high %v7484_v8, %v9878_v49  ;;  %v2455_v31 = vcombine.high %v7552_v40, %v7535_v4 }
 0x324   : > { %v2224_v36 = vcombine.low %v2191_v50, %v2207_v27  ;;  %v2174_v35 = vcombine.high %v7431_v22, %v9878_v49  ;;  %v1990_v56 = vcombine.high %v7570_v0, %v7562_v41  ;;  %v2636_v8 = vcombine.low %v7364_v1, %v7402_v62 }
 0x325   : > { %v5899_v13 = vpack.i.bf16 %v2403_v26, %v1938_v60  ;;  %v5919_v48 = vpack.i.bf16 %v2404_v7, %v1939_v3  ;;  %v7679_v40 = vrot.slane %v2455_v31, %v6563_v38  ;;  %v2405_v22 = vcombine.high %v7494_v47, %v9878_v49 }
 0x326   : > { %2717 = vrot.lane.b32.xlu0 %v7610_v44, %s6380_s14  ;;  %5895 = vrot.lane.b32.xlu1 %v5894_v51, %s6379_s12  ;;  %v5909_v51 = vpack.i.bf16 %v2173_v25, %v1708_v24  ;;  %v7665_v24 = vrot.slane %v1759_v55, %v6563_v38  ;;  %v1760_v25 = vcombine.high %v1726_v15, %v1742_v28 }
 0x327   : > { %v2653_v26 = vcombine.high %v2551_v39, %v2559_v10  ;;  %v1940_v55 = vcombine.high %v7521_v45, %v9878_v49  ;;  %v7693_v7 = vrot.slane %v2636_v8, %v6555_v18  ;;  %v7698_v47 = vrot.slane %v1990_v56, %v6563_v38 }
 0x328   : > { %v1973_v15 = vcombine.low %v7455_v23, %v7489_v57  ;;  %v2600_v60 = vcombine.low %v7508_v6, %v7524_v12  ;;  %v2175_v57 = vcombine.high %v7434_v21, %v9878_v49  ;;  %v1743_v6 = vcombine.low %v7516_v32, %v7511_v54 }
 0x329   : > { %v5939_v28 = vpack.i.bf16 %v2405_v22, %v1940_v55  ;;  %v2667_v45 = vrot.slane %v2653_v26, %v6555_v18  ;;  %v2633_v56 = vcombine.high %v7582_v46, %v9878_v49  ;;  %v2007_v22 = vcombine.high %v7627_v5, %v9878_v49 }
 0x32a   : > { %5880 = vrot.lane.b32.xlu0 %v5879_v29, %s6382_s16  ;;  %5905 = vrot.lane.b32.xlu1 %v5904_v37, %s6380_s14  ;;  %v1709_v29 = vcombine.high %v7466_v63, %v9878_v49  ;;  %v2652_v37 = vcombine.low %v2551_v39, %v2559_v10  ;;  %v7676_v63 = vrot.slane %v2224_v36, %v6563_v38 }
 0x32b   : > { %v2438_v39 = vcombine.low %v7479_v52, %v7472_v34  ;;  %v1710_v10 = vcombine.high %v7503_v2, %v9878_v49  ;;  %v7727_v31 = vrot.slane %v1973_v15, %v6563_v38  ;;  %v7750_v32 = vrot.slane %v1743_v6, %v6563_v38 }
 0x32c   : > { %v5929_v4 = vpack.i.bf16 %v2174_v35, %v1709_v29  ;;  %v7684_v41 = vrot.slane %v2652_v37, %v6555_v18  ;;  %v5914_v0 = vpack.i.bf16 %v7676_v63, %v7665_v24  ;;  %v7738_v29 = vrot.slane %v2600_v60, %v6563_v38 }
 0x32d   : > { %v7715_v52 = vrot.slane %v2438_v39, %v6563_v38  ;;  %v5944_v2 = vpack.i.bf16 %v2175_v57, %v1710_v10  ;;  %v2208_v37 = vcombine.low %v7279_v16, %v7310_v59  ;;  %v2005_v54 = vcombine.high %v7727_v31, %v9878_v49 }
 0x32e   : > { %5890 = vrot.lane.b32.xlu0 %v5889_v11, %s6382_s16  ;;  %5910 = vrot.lane.b32.xlu1 %v5909_v51, %s6383_s25  ;;  %v2225_v11 = vcombine.high %v2191_v50, %v2207_v27  ;;  %v2637_v51 = vcombine.high %v7364_v1, %v7402_v62  ;;  %v2669_v27 = vcombine.high %v7693_v7, %v7684_v41  ;;  %v6393_v57 = vmov 0  }
 0x32f   : > { %v5924_v1 = vpack.i.bf16 %v7679_v40, %v7698_v47  ;;  %v1774_v62 = vrot.slane %v1760_v25, %v6563_v38  ;;  %v2470_v21 = vcombine.high %v7715_v52, %v9878_v49  ;;  %v1776_v35 = vcombine.high %v7587_v43, %v9878_v49  ;;  %5989 = vset.pattern.permute.xlu1 %v6393_v57 }
 0x330   : > { %v2651_v50 = vrot.slane %v2637_v51, %v6555_v18  ;;  %v2239_v34 = vrot.slane %v2225_v11, %v6563_v38  ;;  %v7722_v23 = vrot.slane %v2669_v27, %v6563_v38  ;;  %v2241_v16 = vcombine.high %v7600_v9, %v9878_v49  ;;  %6270 = vset.pattern.permute.xlu0 %v6393_v57  ;;  %v9897_v57 = vld [vmem:[#allocation22_spill] sm:$0xff] }
 0x331   : > { %v7761_v59 = vrot.slane %v2208_v37, %v6563_v38  ;;  %v2472_v43 = vcombine.high %v7615_v30, %v9878_v49  ;;  %v2006_v30 = vcombine.high %v7567_v19, %v9878_v49  ;;  %v1777_v11 = vcombine.high %v7665_v24, %v9878_v49 }
 0x332   : > { %5900 = vrot.lane.b32.xlu0 %v5899_v13, %s6383_s25  ;;  %5920 = vrot.lane.b32.xlu1 %v5919_v48, %s6386_s28  ;;  %v2684_v3 = vcombine.low %v2651_v50, %v2667_v45  ;;  %v5934_v36 = vpack.i.bf16 %v2239_v34, %v1774_v62  ;;  %v2632_v13 = vcombine.high %v7738_v29, %v9878_v49 }
 0x333   : > { %v5949_v48 = vpack.i.bf16 %v2470_v21, %v2005_v54  ;;  %v5964_v8 = vpack.i.bf16 %v2241_v16, %v1776_v35  ;;  %v2240_v9 = vcombine.high %v7761_v59, %v9878_v49  ;;  %v2685_v25 = vcombine.high %v2651_v50, %v2667_v45 }
 0x334   : > { %v7735_v12 = vrot.slane %v2684_v3, %v6563_v38  ;;  %v5969_v46 = vpack.i.bf16 %v2472_v43, %v2007_v22  ;;  %v2668_v5 = vcombine.low %v7693_v7, %v7684_v41  ;;  %v2242_v19 = vcombine.high %v7676_v63, %v9878_v49 }
 0x335   : > { %v2243_v45 = vcombine.high %v2239_v34, %v9878_v49  ;;  %v2008_v63 = vcombine.high %v7698_v47, %v9878_v49  ;;  %v2634_v47 = vcombine.high %v7610_v44, %v9878_v49 }
 0x336   : > { %5915 = vrot.lane.b32.xlu0 %v5914_v0, %s6380_s14  ;;  %5930 = vrot.lane.b32.xlu1 %v5929_v4, %s6386_s28  ;;  %v1775_v4 = vcombine.high %v7750_v32, %v9878_v49  ;;  %v2471_v0 = vcombine.high %v7549_v61, %v9878_v49  ;;  %v2699_v61 = vrot.slane %v2685_v25, %v6563_v38 }
 0x337   : > { %v5974_v41 = vpack.i.bf16 %v2242_v19, %v1777_v11  ;;  %v2702_v6 = vcombine.high %v7735_v12, %v9878_v49 }
 0x338   : > { %v5954_v26 = vpack.i.bf16 %v2240_v9, %v1775_v4  ;;  %v5959_v39 = vpack.i.bf16 %v2471_v0, %v2006_v30  ;;  %v2703_v37 = vcombine.high %v2699_v61, %v9878_v49 }
 0x33a   : > { %5925 = vrot.lane.b32.xlu0 %v5924_v1, %s6385_s26  ;;  %5940 = vrot.lane.b32.xlu1 %v5939_v28, %s6384_s29  ;;  %v1778_v28 = vcombine.high %v1774_v62, %v9878_v49  ;;  %v2473_v1 = vcombine.high %v7679_v40, %v9878_v49  ;;  %v7803_v62 = vrot.slane %v2668_v5, %v6563_v38 }
 0x33b   : > { %v2617_v40 = vcombine.high %v7542_v33, %v7559_v14 }
 0x33c   : > { %v5984_v7 = vpack.i.bf16 %v2243_v45, %v1778_v28  ;;  %v5979_v34 = vpack.i.bf16 %v2473_v1, %v2008_v63  ;;  %v2700_v10 = vcombine.high %v7803_v62, %v9878_v49 }
 0x33d   : > { %v2631_v14 = vrot.slane %v2617_v40, %v6563_v38 }
 0x33e   : > { %5935 = vrot.lane.b32.xlu0 %v5934_v36, %s6385_s26  ;;  %2737 = vrot.lane.b32.xlu1 %v7722_v23, %s6379_s12  ;;  %v2701_v36 = vcombine.high %v7722_v23, %v9878_v49 }
 0x33f   : > { %v2635_v21 = vcombine.high %v2631_v14, %v9878_v49 }
 0x342   : > { %5945 = vrot.lane.b32.xlu0 %v5944_v2, %s6384_s29  ;;  %2745 = vrot.lane.b32.xlu1 %v7735_v12, %s6380_s14  ;;  %v2808_v12 = vld [vmem:[%s9810_s2] sm:$0xf] }
 0x346   : > { %2705 = vrot.lane.b32.xlu0 %v2632_v13, %s6382_s16  ;;  %5950 = vrot.lane.b32.xlu1 %v5949_v48, %s6382_s16 }
 0x348   : > { %v7777_v55 = vpop.permute.xlu1 %5710 }
 0x349   : > { %v5713_v48 = vunpack.i.h.bf16 %v7777_v55  ;;  %v5712_v35 = vunpack.i.l.bf16 %v7777_v55 }
 0x34a   : > { %2713 = vrot.lane.b32.xlu0 %v2633_v56, %s6383_s25  ;;  %5965 = vrot.lane.b32.xlu1 %v5964_v8, %s6383_s25 }
 0x34c   : > { %v7796_v24 = vpop.permute.xlu1 %5715 }
 0x34d   : > { %v5718_v16 = vunpack.i.h.bf16 %v7796_v24  ;;  %v5717_v56 = vunpack.i.l.bf16 %v7796_v24 }
 0x34e   : > { %5955 = vrot.lane.b32.xlu0 %v5954_v26, %s6382_s16  ;;  %5970 = vrot.lane.b32.xlu1 %v5969_v46, %s6386_s28 }
 0x350   : > { %v7787_v51 = vpop.permute.xlu0 %5720 }
 0x351   : > { %v5723_v8 = vunpack.i.h.bf16 %v7787_v51  ;;  %v5722_v4 = vunpack.i.l.bf16 %v7787_v51 }
 0x352   : > { %5960 = vrot.lane.b32.xlu0 %v5959_v39, %s6383_s25  ;;  %2753 = vrot.lane.b32.xlu1 %v2699_v61, %s6385_s26 }
 0x354   : > { %v7798_v27 = vpop.permute.xlu0 %5725 }
 0x355   : > { %v5728_v22 = vunpack.i.h.bf16 %v7798_v27  ;;  %v5727_v25 = vunpack.i.l.bf16 %v7798_v27 }
 0x356   : > { %5975 = vrot.lane.b32.xlu0 %v5974_v41, %s6386_s28  ;;  %5985 = vrot.lane.b32.xlu1 %v5984_v7, %s6384_s29 }
 0x358   : > { %v7809_v15 = vpop.permute.xlu1 %5730  ;;  %v7811_v50 = vpop.permute.xlu0 %5750 }
 0x359   : > { %v5733_v26 = vunpack.i.h.bf16 %v7809_v15  ;;  %v5732_v46 = vunpack.i.l.bf16 %v7809_v15  ;;  %v5753_v0 = vunpack.i.h.bf16 %v7811_v50  ;;  %v5752_v55 = vunpack.i.l.bf16 %v7811_v50 }
 0x35a   : > { %5980 = vrot.lane.b32.xlu0 %v5979_v34, %s6384_s29  ;;  %2733 = vrot.lane.b32.xlu1 %v2700_v10, %s6382_s16 }
 0x35c   : > { %v7819_v60 = vpop.permute.xlu1 %5735  ;;  %v7821_v3 = vpop.permute.xlu0 %5755 }
 0x35d   : > { %v5738_v30 = vunpack.i.h.bf16 %v7819_v60  ;;  %v5737_v11 = vunpack.i.l.bf16 %v7819_v60 }
 0x35e   : > { %2721 = vrot.lane.b32.xlu0 %v2634_v47, %s6386_s28  ;;  %2741 = vrot.lane.b32.xlu1 %v2701_v36, %s6383_s25 }
 0x360   : > { %v7829_v2 = vpop.permute.xlu1 %5740  ;;  %v7831_v33 = vpop.permute.xlu0 %5760 }
 0x361   : > { %v5743_v1 = vunpack.i.h.bf16 %v7829_v2  ;;  %v5742_v63 = vunpack.i.l.bf16 %v7829_v2 }
 0x362   : > { %2725 = vrot.lane.b32.xlu0 %v2631_v14, %s6385_s26  ;;  %2749 = vrot.lane.b32.xlu1 %v2702_v6, %s6386_s28  ;;  %v9893_v6 = vld [vmem:[#allocation17_spill] sm:$0xff] }
 0x364   : > { %v7838_v44 = vpop.permute.xlu1 %5745  ;;  %v7840_v23 = vpop.permute.xlu0 %5765 }
 0x365   : > { %v5748_v40 = vunpack.i.h.bf16 %v7838_v44  ;;  %v5747_v47 = vunpack.i.l.bf16 %v7838_v44 }
 0x366   : > { %2729 = vrot.lane.b32.xlu0 %v2635_v21, %s6384_s29  ;;  %2757 = vrot.lane.b32.xlu1 %v2703_v37, %s6384_s29 }
 0x368   : > { %v5771_v54 = vpop.permute.xlu1 %5770  ;;  %v5776_v13 = vpop.permute.xlu0 %5775 }
 0x369   : > { %v5773_v39 = vunpack.i.h.bf16 %v5771_v54  ;;  %v5772_v61 = vunpack.i.l.bf16 %v5771_v54  ;;  %v5778_v28 = vunpack.i.h.bf16 %v5776_v13  ;;  %v5777_v19 = vunpack.i.l.bf16 %v5776_v13  ;;  %v9895_v13 = vld [vmem:[#allocation18_spill] sm:$0xff] }
 0x36a   : > { %2811 = vperm.xlu1 %5989, %v2808_v12   ;;  %v9894_v12 = vld [vmem:[#allocation19_spill] sm:$0xff] }
 0x36b   : > { %v1612_v14 = vsel %vm891_vm9, %v7204_v20, %v5773_v39  ;;  %v1143_v21 = vsel %vm891_vm9, %v9893_v6, %v5772_v61  ;;  %v1605_v54 = vsel %vm891_vm9, %v9894_v12, %v5778_v28  ;;  %v1136_v44 = vsel %vm891_vm9, %v9895_v13, %v5777_v19 }
 0x36c   : > { %v7855_v43 = vpop.permute.xlu1 %5790  ;;  %v5781_v9 = vpop.permute.xlu0 %5780  ;;  %v1144_v12 = vsel %vm893_vm10, %v1143_v21, %v5712_v35  ;;  %v1613_v19 = vsel %vm893_vm10, %v1612_v14, %v5713_v48  ;;  %v9898_v21 = vld [vmem:[#allocation21_spill] sm:$0xff]  ;;  %v9899_v14 = vld [vmem:[#allocation23_spill] sm:$0xff] }
 0x36d   : > { %v5783_v45 = vunpack.i.h.bf16 %v5781_v9  ;;  %v5782_v24 = vunpack.i.l.bf16 %v5781_v9  ;;  %v9896_v9 = vld [vmem:[#allocation20_spill] sm:$0xff]  ;;  %v5793_v39 = vunpack.i.h.bf16 %v7855_v43  ;;  %v5792_v61 = vunpack.i.l.bf16 %v7855_v43 }
 0x36e   : > { %v1606_v43 = vsel %vm893_vm10, %v1605_v54, %v5718_v16 }
 0x36f   : > { %v1373_v36 = vsel %vm891_vm9, %v9896_v9, %v5783_v45  ;;  %v905_v5 = vsel %vm891_vm9, %v9897_v57, %v5782_v24  ;;  %v1137_v9 = vsel %vm893_vm10, %v1136_v44, %v5717_v56  ;;  %v1366_v48 = vsel %vm891_vm9, %v9898_v21, %v5793_v39 }
 0x370   : > { %v5796_v41 = vpop.permute.xlu1 %5795  ;;  %v5786_v7 = vpop.permute.xlu0 %5785  ;;  %v906_v24 = vsel %vm893_vm10, %v905_v5, %v5722_v4  ;;  %v1374_v57 = vsel %vm893_vm10, %v1373_v36, %v5723_v8 }
 0x371   : > { %v5788_v2 = vunpack.i.h.bf16 %v5786_v7  ;;  %v5787_v37 = vunpack.i.l.bf16 %v5786_v7  ;;  %v5798_v34 = vunpack.i.h.bf16 %v5796_v41  ;;  %v5797_v28 = vunpack.i.l.bf16 %v5796_v41 }
 0x373   : > { %v1614_v45 = vsel %vm9832_vm11, %v1613_v19, %v5788_v2  ;;  %v1145_v13 = vsel %vm9832_vm11, %v1144_v12, %v5787_v37  ;;  %v892_v2 = vsel %vm891_vm9, %v9899_v14, %v5792_v61  ;;  %v1138_v8 = vsel %vm9832_vm11, %v1137_v9, %v5797_v28 }
 0x374   : > { %v5821_v51 = vpop.permute.xlu1 %5820  ;;  %v5801_v20 = vpop.permute.xlu0 %5800  ;;  %v1607_v56 = vsel %vm9832_vm11, %v1606_v43, %v5798_v34  ;;  %v1146_v16 = vsel %vm897_vm12, %v1145_v13, %v5727_v25  ;;  %v1615_v5 = vsel %vm897_vm12, %v1614_v45, %v5728_v22  ;;  %v894_v45 = vsel %vm893_vm10, %v892_v2, %v5732_v46 }
 0x375   : > { %v5803_v7 = vunpack.i.h.bf16 %v5801_v20  ;;  %v5802_v6 = vunpack.i.l.bf16 %v5801_v20  ;;  %v5823_v61 = vunpack.i.h.bf16 %v5821_v51  ;;  %v1608_v9 = vsel %vm897_vm12, %v1607_v56, %v5738_v30 }
 0x377   : > { %v907_v20 = vsel %vm9832_vm11, %v906_v24, %v5802_v6  ;;  %v1375_v41 = vsel %vm9832_vm11, %v1374_v57, %v5803_v7  ;;  %v5822_v7 = vunpack.i.l.bf16 %v5821_v51  ;;  %v1139_v57 = vsel %vm897_vm12, %v1138_v8, %v5737_v11 }
 0x378   : > { %v5826_v10 = vpop.permute.xlu1 %5825  ;;  %v5806_v35 = vpop.permute.xlu0 %5805  ;;  %v908_v44 = vsel %vm897_vm12, %v907_v20, %v5742_v63  ;;  %v1376_v39 = vsel %vm897_vm12, %v1375_v41, %v5743_v1  ;;  %v1367_v1 = vsel %vm893_vm10, %v1366_v48, %v5733_v26 }
 0x379   : > { %v5808_v37 = vunpack.i.h.bf16 %v5806_v35  ;;  %v5807_v4 = vunpack.i.l.bf16 %v5806_v35  ;;  %v5828_v12 = vunpack.i.h.bf16 %v5826_v10  ;;  %v5827_v27 = vunpack.i.l.bf16 %v5826_v10 }
 0x37a   : > { %v909_v51 = vsel %vm899_vm13, %v908_v44, %v5822_v7  ;;  %v1377_v63 = vsel %vm899_vm13, %v1376_v39, %v5823_v61  ;;  %v9904_v7 = vunpack.i.l.bf16 %v7840_v23 }
 0x37b   : > { %v1147_v36 = vsel %vm899_vm13, %v1146_v16, %v5807_v4  ;;  %v1616_v54 = vsel %vm899_vm13, %v1615_v5, %v5808_v37  ;;  %v9902_v16 = vunpack.i.l.bf16 %v7821_v3  ;;  %v9903_v5 = vunpack.i.h.bf16 %v7821_v3 }
 0x37c   : > { %v5831_v6 = vpop.permute.xlu1 %5830  ;;  %v5811_v34 = vpop.permute.xlu0 %5810  ;;  %v1148_v28 = vsel %vm901_vm14, %v1147_v36, %v5747_v47  ;;  %v1617_v25 = vsel %vm901_vm14, %v1616_v54, %v5748_v40 }
 0x37d   : > { %v5813_v19 = vunpack.i.h.bf16 %v5811_v34  ;;  %v5812_v22 = vunpack.i.l.bf16 %v5811_v34  ;;  %v1149_v10 = vsel %vm903_vm15, %v1148_v28, %v5827_v27  ;;  %v1618_v13 = vsel %vm903_vm15, %v1617_v25, %v5828_v12 }
 0x37e   : > { %v5833_v43 = vunpack.i.h.bf16 %v5831_v6  ;;  %v5832_v20 = vunpack.i.l.bf16 %v5831_v6  ;;  %v2777_v48 = vrot.slane %v1149_v10, 4  ;;  %v2783_v14 = vrot.slane %v1618_v13, 4 }
 0x37f   : > { %v1368_v47 = vsel %vm9832_vm11, %v1367_v1, %v5813_v19  ;;  %v896_v40 = vsel %vm9832_vm11, %v894_v45, %v5812_v22  ;;  %v9905_v28 = vunpack.i.h.bf16 %v7840_v23 }
 0x380   : > { %v898_v46 = vsel %vm897_vm12, %v896_v40, %v5752_v55  ;;  %v1369_v15 = vsel %vm897_vm12, %v1368_v47, %v5753_v0  ;;  %v5836_v26 = vpop.permute.xlu1 %5835  ;;  %v5816_v24 = vpop.permute.xlu0 %5815  ;;  %v9900_v55 = vunpack.i.l.bf16 %v7831_v33  ;;  %v9901_v0 = vunpack.i.h.bf16 %v7831_v33 }
 0x381   : > { %v5818_v41 = vunpack.i.h.bf16 %v5816_v24  ;;  %v5817_v35 = vunpack.i.l.bf16 %v5816_v24  ;;  %v900_v30 = vsel %vm899_vm13, %v898_v46, %v5832_v20  ;;  %v1370_v2 = vsel %vm899_vm13, %v1369_v15, %v5833_v43 }
 0x382   : > { %v910_v50 = vsel %vm901_vm14, %v909_v51, %v9900_v55  ;;  %v1378_v21 = vsel %vm901_vm14, %v1377_v63, %v9901_v0  ;;  %v5838_v37 = vunpack.i.h.bf16 %v5836_v26  ;;  %v5837_v4 = vunpack.i.l.bf16 %v5836_v26 }
 0x383   : > { %v1140_v11 = vsel %vm899_vm13, %v1139_v57, %v5817_v35  ;;  %v1609_v60 = vsel %vm899_vm13, %v1608_v9, %v5818_v41  ;;  %v902_v6 = vsel %vm901_vm14, %v900_v30, %v9904_v7  ;;  %v1371_v25 = vsel %vm901_vm14, %v1370_v2, %v9905_v28 }
 0x384   : > { %v5841_v8 = vpop.permute.xlu1 %5840  ;;  %v5846_v56 = vpop.permute.xlu0 %5845  ;;  %v1141_v33 = vsel %vm901_vm14, %v1140_v11, %v9902_v16  ;;  %v1610_v36 = vsel %vm901_vm14, %v1609_v60, %v9903_v5 }
 0x385   : > { %v5843_v54 = vunpack.i.h.bf16 %v5841_v8  ;;  %v5842_v44 = vunpack.i.l.bf16 %v5841_v8  ;;  %v5848_v39 = vunpack.i.h.bf16 %v5846_v56  ;;  %v5847_v61 = vunpack.i.l.bf16 %v5846_v56 }
 0x386   : > { %v1142_v34 = vsel %vm903_vm15, %v1141_v33, %v5837_v4  ;;  %v1611_v12 = vsel %vm903_vm15, %v1610_v36, %v5838_v37 }
 0x387   : > { %v911_v3 = vsel %vm903_vm15, %v910_v50, %v5842_v44  ;;  %v1379_v27 = vsel %vm903_vm15, %v1378_v21, %v5843_v54  ;;  %v904_v19 = vsel %vm903_vm15, %v902_v6, %v5847_v61  ;;  %v1372_v22 = vsel %vm903_vm15, %v1371_v25, %v5848_v39 }
 0x388   : > { %v5851_v45 = vpop.permute.xlu1 %5850  ;;  %v5856_v1 = vpop.permute.xlu0 %5855  ;;  %v2800_v51 = vsel %vm9834_vm2, %v911_v3, %v2777_v48  ;;  %v2802_v63 = vsel %vm9834_vm2, %v1379_v27, %v2783_v14  ;;  %v2776_v47 = vrot.slane %v1142_v34, 4  ;;  %v2782_v23 = vrot.slane %v1611_v12, 4 }
 0x389   : > { %v5632_v40 = vpack.c.bf16 %v2802_v63, %v2800_v51  ;;  %v5853_v6 = vunpack.i.h.bf16 %v5851_v45  ;;  %v5852_v34 = vunpack.i.l.bf16 %v5851_v45  ;;  %v5858_v28 = vunpack.i.h.bf16 %v5856_v1 }
 0x38a   : > { %v2799_v10 = vsel %vm9834_vm2, %v904_v19, %v2776_v47  ;;  %v2801_v13 = vsel %vm9834_vm2, %v1372_v22, %v2782_v23  ;;  %v5857_v25 = vunpack.i.l.bf16 %v5856_v1 }
 0x38b   : > { %v5634_v46 = vpack.c.bf16 %v2801_v13, %v2799_v10  ;;  %5633 = vmatprep.subr.bf16.mxu0 %v5632_v40 }
 0x38c   : > { %v7973_v15 = vpop.permute.xlu1 %5865  ;;  %v5861_v26 = vpop.permute.xlu0 %5860 }
 0x38d   : > { %5635 = vmatpush1.bf16.msra.mxu0 %v5634_v46  ;;  %v5868_v45 = vunpack.i.h.bf16 %v7973_v15  ;;  %v5867_v1 = vunpack.i.l.bf16 %v7973_v15  ;;  %v5863_v63 = vunpack.i.h.bf16 %v5861_v26  ;;  %v5862_v47 = vunpack.i.l.bf16 %v5861_v26 }
 0x390   : > { %v7975_v24 = vpop.permute.xlu1 %5870  ;;  %v7977_v57 = vpop.permute.xlu0 %5875 }
 0x391   : > { %v5873_v23 = vunpack.i.h.bf16 %v7975_v24  ;;  %v5872_v40 = vunpack.i.l.bf16 %v7975_v24  ;;  %v5877_v15 = vunpack.i.l.bf16 %v7977_v57 }
 0x394   : > { %v7979_v9 = vpop.permute.xlu1 %5885  ;;  %v7981_v43 = vpop.permute.xlu0 %2709 }
 0x395   : > { %v5888_v24 = vunpack.i.h.bf16 %v7979_v9 }
 0x398   : > { %v7983_v20 = vpop.permute.xlu1 %5895  ;;  %v7985_v41 = vpop.permute.xlu0 %2717 }
 0x39c   : > { %v7987_v35 = vpop.permute.xlu1 %5905  ;;  %v5881_v55 = vpop.permute.xlu0 %5880 }
 0x39d   : > { %v5883_v2 = vunpack.i.h.bf16 %v5881_v55  ;;  %v5882_v37 = vunpack.i.l.bf16 %v5881_v55 }
 0x39f   : > { %v2530_v33 = vsel %vm891_vm9, %v7573_v58, %v5883_v2  ;;  %v2065_v5 = vsel %vm891_vm9, %v7590_v42, %v5882_v37 }
 0x3a0   : > { %v5911_v50 = vpop.permute.xlu1 %5910  ;;  %v5891_v0 = vpop.permute.xlu0 %5890  ;;  %v2066_v12 = vsel %vm893_vm10, %v2065_v5, %v5852_v34  ;;  %v5897_v5 = vunpack.i.l.bf16 %v7983_v20  ;;  %v5907_v34 = vunpack.i.l.bf16 %v7987_v35 }
 0x3a1   : > { %v5893_v4 = vunpack.i.h.bf16 %v5891_v0  ;;  %v5892_v8 = vunpack.i.l.bf16 %v5891_v0  ;;  %v5913_v3 = vunpack.i.h.bf16 %v5911_v50 }
 0x3a3   : > { %v2300_v36 = vsel %vm891_vm9, %v7630_v53, %v5893_v4  ;;  %v1835_v54 = vsel %vm891_vm9, %v7603_v17, %v5892_v8  ;;  %v2531_v53 = vsel %vm893_vm10, %v2530_v33, %v5853_v6  ;;  %v5912_v17 = vunpack.i.l.bf16 %v5911_v50 }
 0x3a4   : > { %v5921_v21 = vpop.permute.xlu1 %5920  ;;  %v5901_v48 = vpop.permute.xlu0 %5900  ;;  %v1836_v58 = vsel %vm893_vm10, %v1835_v54, %v5857_v25  ;;  %v2301_v42 = vsel %vm893_vm10, %v2300_v36, %v5858_v28  ;;  %v5887_v8 = vunpack.i.l.bf16 %v7979_v9  ;;  %v5898_v33 = vunpack.i.h.bf16 %v7983_v20 }
 0x3a5   : > { %v5903_v44 = vunpack.i.h.bf16 %v5901_v48  ;;  %v5902_v39 = vunpack.i.l.bf16 %v5901_v48  ;;  %v1837_v10 = vsel %vm9832_vm11, %v1836_v58, %v5912_v17  ;;  %v2302_v13 = vsel %vm9832_vm11, %v2301_v42, %v5913_v3 }
 0x3a6   : > { %v5878_v48 = vunpack.i.h.bf16 %v7977_v57  ;;  %v5923_v2 = vunpack.i.h.bf16 %v5921_v21  ;;  %v5922_v26 = vunpack.i.l.bf16 %v5921_v21  ;;  %v1838_v36 = vsel %vm897_vm12, %v1837_v10, %v5867_v1 }
 0x3a7   : > { %v2067_v27 = vsel %vm9832_vm11, %v2066_v12, %v5902_v39  ;;  %v2532_v19 = vsel %vm9832_vm11, %v2531_v53, %v5903_v44  ;;  %v5908_v9 = vunpack.i.h.bf16 %v7987_v35 }
 0x3a8   : > { %v5931_v14 = vpop.permute.xlu1 %5930  ;;  %v7989_v11 = vpop.permute.xlu0 %5915  ;;  %v2068_v46 = vsel %vm897_vm12, %v2067_v27, %v5862_v47  ;;  %v2533_v55 = vsel %vm897_vm12, %v2532_v19, %v5863_v63 }
 0x3a9   : > { %v5933_v50 = vunpack.i.h.bf16 %v5931_v14  ;;  %v5932_v0 = vunpack.i.l.bf16 %v5931_v14  ;;  %v2303_v14 = vsel %vm897_vm12, %v2302_v13, %v5868_v45  ;;  %v2069_v54 = vsel %vm899_vm13, %v2068_v46, %v5922_v26 }
 0x3aa   : > { %v2534_v57 = vsel %vm899_vm13, %v2533_v55, %v5923_v2  ;;  %v5918_v20 = vunpack.i.h.bf16 %v7989_v11  ;;  %v5917_v28 = vunpack.i.l.bf16 %v7989_v11  ;;  %v2070_v42 = vsel %vm901_vm14, %v2069_v54, %v5872_v40 }
 0x3ab   : > { %v1839_v21 = vsel %vm899_vm13, %v1838_v36, %v5932_v0  ;;  %v2304_v44 = vsel %vm899_vm13, %v2303_v14, %v5933_v50  ;;  %v2535_v12 = vsel %vm901_vm14, %v2534_v57, %v5873_v23 }
 0x3ac   : > { %v7991_v60 = vpop.permute.xlu1 %5940  ;;  %v7993_v30 = vpop.permute.xlu0 %5925  ;;  %v1840_v19 = vsel %vm901_vm14, %v1839_v21, %v5877_v15  ;;  %v2305_v35 = vsel %vm901_vm14, %v2304_v44, %v5878_v48 }
 0x3ad   : > { %v5943_v17 = vunpack.i.h.bf16 %v7991_v60  ;;  %v5942_v27 = vunpack.i.l.bf16 %v7991_v60  ;;  %v5928_v63 = vunpack.i.h.bf16 %v7993_v30  ;;  %v5927_v60 = vunpack.i.l.bf16 %v7993_v30 }
 0x3af   : > { %v2536_v55 = vsel %vm903_vm15, %v2535_v12, %v5943_v17 }
 0x3b0   : > { %v7995_v56 = vpop.permute.xlu1 %2737  ;;  %v7997_v16 = vpop.permute.xlu0 %5935  ;;  %v2794_v21 = vrot.slane %v2536_v55, 4 }
 0x3b4   : > { %v8007_v61 = vpop.permute.xlu1 %2745  ;;  %v8009_v7 = vpop.permute.xlu0 %5945 }
 0x3b5   : > { %v5948_v2 = vunpack.i.h.bf16 %v8009_v7  ;;  %v5947_v26 = vunpack.i.l.bf16 %v8009_v7 }
 0x3b8   : > { %v5951_v22 = vpop.permute.xlu1 %5950  ;;  %v8017_v51 = vpop.permute.xlu0 %2705 }
 0x3b9   : > { %v5953_v39 = vunpack.i.h.bf16 %v5951_v22  ;;  %v5952_v6 = vunpack.i.l.bf16 %v5951_v22 }
 0x3bb   : > { %v2537_v22 = vsel %vm891_vm9, %v7715_v52, %v5953_v39  ;;  %v2072_v11 = vsel %vm891_vm9, %v7727_v31, %v5952_v6 }
 0x3bc   : > { %v5966_v37 = vpop.permute.xlu1 %5965  ;;  %v8029_v4 = vpop.permute.xlu0 %2713  ;;  %v2538_v50 = vsel %vm893_vm10, %v2537_v22, %v5888_v24 }
 0x3bd   : > { %v5968_v10 = vunpack.i.h.bf16 %v5966_v37  ;;  %v5967_v13 = vunpack.i.l.bf16 %v5966_v37 }
 0x3c0   : > { %v5971_v25 = vpop.permute.xlu1 %5970  ;;  %v5956_v58 = vpop.permute.xlu0 %5955 }
 0x3c1   : > { %v5958_v53 = vunpack.i.h.bf16 %v5956_v58  ;;  %v5957_v3 = vunpack.i.l.bf16 %v5956_v58  ;;  %v5973_v36 = vunpack.i.h.bf16 %v5971_v25  ;;  %v5972_v24 = vunpack.i.l.bf16 %v5971_v25 }
 0x3c2   : > { %v5938_v58 = vunpack.i.h.bf16 %v7997_v16  ;;  %v5937_v25 = vunpack.i.l.bf16 %v7997_v16 }
 0x3c3   : > { %v2307_v45 = vsel %vm891_vm9, %v7761_v59, %v5958_v53  ;;  %v1842_v1 = vsel %vm891_vm9, %v7750_v32, %v5957_v3  ;;  %v2071_v59 = vsel %vm903_vm15, %v2070_v42, %v5942_v27  ;;  %v2073_v32 = vsel %vm893_vm10, %v2072_v11, %v5887_v8 }
 0x3c4   : > { %v2308_v47 = vsel %vm893_vm10, %v2307_v45, %v5898_v33  ;;  %v1843_v23 = vsel %vm893_vm10, %v1842_v1, %v5897_v5  ;;  %v8063_v40 = vpop.permute.xlu1 %2753  ;;  %v5961_v52 = vpop.permute.xlu0 %5960  ;;  %v2788_v57 = vrot.slane %v2071_v59, 4  ;;  %v1841_v53 = vsel %vm903_vm15, %v1840_v19, %v5947_v26 }
 0x3c5   : > { %v5963_v31 = vunpack.i.h.bf16 %v5961_v52  ;;  %v5962_v46 = vunpack.i.l.bf16 %v5961_v52  ;;  %v1844_v48 = vsel %vm9832_vm11, %v1843_v23, %v5967_v13  ;;  %v2309_v15 = vsel %vm9832_vm11, %v2308_v47, %v5968_v10 }
 0x3c6   : > { %v1845_v44 = vsel %vm897_vm12, %v1844_v48, %v5917_v28  ;;  %v2310_v39 = vsel %vm897_vm12, %v2309_v15, %v5918_v20  ;;  %v2306_v28 = vsel %vm903_vm15, %v2305_v35, %v5948_v2  ;;  %v2760_v20 = vsel %vm891_vm9, %v7738_v29, %v8017_v51 }
 0x3c7   : > { %v2539_v30 = vsel %vm9832_vm11, %v2538_v50, %v5963_v31  ;;  %v2074_v0 = vsel %vm9832_vm11, %v2073_v32, %v5962_v46  ;;  %v2805_v31 = vsel %vm9834_vm2, %v2306_v28, %v2794_v21  ;;  %v2761_v46 = vsel %vm893_vm10, %v2760_v20, %v7981_v43 }
 0x3c8   : > { %v2540_v37 = vsel %vm897_vm12, %v2539_v30, %v5908_v9  ;;  %v2075_v33 = vsel %vm897_vm12, %v2074_v0, %v5907_v34  ;;  %v5986_v5 = vpop.permute.xlu1 %5985  ;;  %v5976_v8 = vpop.permute.xlu0 %5975 }
 0x3c9   : > { %v5978_v14 = vunpack.i.h.bf16 %v5976_v8  ;;  %v5977_v54 = vunpack.i.l.bf16 %v5976_v8  ;;  %v2076_v9 = vsel %vm899_vm13, %v2075_v33, %v5972_v24  ;;  %v2541_v34 = vsel %vm899_vm13, %v2540_v37, %v5973_v36  ;;  %v2807_v8 = vld [vmem:[%s9809_s1] sm:$0xf] }
 0x3ca   : > { %v2077_v22 = vsel %vm901_vm14, %v2076_v9, %v5927_v60  ;;  %v2542_v11 = vsel %vm901_vm14, %v2541_v34, %v5928_v63  ;;  %v5988_v19 = vunpack.i.h.bf16 %v5986_v5  ;;  %v5987_v1 = vunpack.i.l.bf16 %v5986_v5 }
 0x3cb   : > { %v1846_v6 = vsel %vm899_vm13, %v1845_v44, %v5977_v54  ;;  %v2311_v7 = vsel %vm899_vm13, %v2310_v39, %v5978_v14  ;;  %v2803_v60 = vsel %vm9834_vm2, %v1841_v53, %v2788_v57 }
 0x3cc   : > { %v2734_v42 = vpop.permute.xlu1 %2733  ;;  %v5981_v12 = vpop.permute.xlu0 %5980  ;;  %v1847_v16 = vsel %vm901_vm14, %v1846_v6, %v5937_v25  ;;  %v2312_v45 = vsel %vm901_vm14, %v2311_v7, %v5938_v58  ;;  %v5638_v48 = vpack.c.bf16 %v2805_v31, %v2803_v60 }
 0x3cd   : > { %v2767_v3 = vsel %vm891_vm9, %v7803_v62, %v2734_v42  ;;  %v5983_v17 = vunpack.i.h.bf16 %v5981_v12  ;;  %v5982_v27 = vunpack.i.l.bf16 %v5981_v12  ;;  %v1848_v10 = vsel %vm903_vm15, %v1847_v16, %v5987_v1 }
 0x3ce   : > { %v2768_v62 = vsel %vm893_vm10, %v2767_v3, %v7995_v56  ;;  %v2313_v13 = vsel %vm903_vm15, %v2312_v45, %v5988_v19  ;;  %v2762_v56 = vsel %vm9832_vm11, %v2761_v46, %v8029_v4 }
 0x3cf   : > { %v2078_v35 = vsel %vm903_vm15, %v2077_v22, %v5982_v27  ;;  %v2543_v47 = vsel %vm903_vm15, %v2542_v11, %v5983_v17  ;;  %v2763_v43 = vsel %vm897_vm12, %v2762_v56, %v7985_v41 }
 0x3d0   : > { %v2789_v29 = vrot.slane %v2078_v35, 4  ;;  %v2795_v51 = vrot.slane %v2543_v47, 4  ;;  %v2742_v23 = vpop.permute.xlu1 %2741  ;;  %v2722_v52 = vpop.permute.xlu0 %2721 }
 0x3d1   : > { %v2769_v63 = vsel %vm9832_vm11, %v2768_v62, %v2742_v23  ;;  %v2764_v2 = vsel %vm899_vm13, %v2763_v43, %v2722_v52  ;;  %vm9833_vm11 = vcmask 293888  }
 0x3d2   : > { %v2804_v59 = vsel %vm9834_vm2, %v1848_v10, %v2789_v29  ;;  %v2806_v55 = vsel %vm9834_vm2, %v2313_v13, %v2795_v51  ;;  %v2770_v50 = vsel %vm897_vm12, %v2769_v63, %v8007_v61 }
 0x3d3   : > { %v5636_v32 = vpack.c.bf16 %v2806_v55, %v2804_v59 }
 0x3d4   : > { %v2750_v30 = vpop.permute.xlu1 %2749  ;;  %v2726_v0 = vpop.permute.xlu0 %2725 }
 0x3d5   : > { %v2771_v15 = vsel %vm899_vm13, %v2770_v50, %v2750_v30  ;;  %5637 = vmatprep.subr.bf16.mxu0 %v5636_v32  ;;  %v2765_v26 = vsel %vm901_vm14, %v2764_v2, %v2726_v0 }
 0x3d6   : > { %5639 = vmatpush1.bf16.msra.mxu0 %v5638_v48  ;;  %v2772_v4 = vsel %vm901_vm14, %v2771_v15, %v8063_v40 }
 0x3d8   : > { %v2758_v37 = vpop.permute.xlu1 %2757  ;;  %v2730_v33 = vpop.permute.xlu0 %2729 }
 0x3d9   : > { %v2773_v61 = vsel %vm903_vm15, %v2772_v4, %v2758_v37  ;;  %v2766_v5 = vsel %vm903_vm15, %v2765_v26, %v2730_v33 }
 0x3da   : > { %5619 = vmatprep.subr.msk.mxu0 %vm9834_vm2, %v2773_v61 }
 0x3db   : > { %5620 = vmatpush1.msk.msra.mxu0 %vm9834_vm2, %v2766_v5 }
 0x3dc   : > { %5621 = vmatmul.mubr.msk.f32.vlgmr.msra.gmra.mrb[0].mxu0 %vm9833_vm11, %v2807_v8 }
 0x3e9   : > { %v2812_v41 = vpop.permute.xlu1 %2811 }
 0x4af   : > { %v2890_v36 = vpop.f32.mrb[0].mxu0 }
 0x4b0   : > { %v2891_v40 = vadd.f32 %v2890_v36, %v2812_v41  ;;  %v2892_v24 = vpop.f32.mrb[1].mxu0 }
 0x4b1   : > { %v2893_v14 = vadd.f32 %v2892_v24, %v2812_v41 }
 0x4b2   : > { %v2901_v54 = vmul.f32 %v2891_v40, %v2891_v40  ;;  %v2895_v57 = vsel %vm9834_vm2, %v2891_v40, 0.0 }
 0x4b3   : > { %v2902_v21 = vmul.f32 %v2893_v14, %v2893_v14  ;;  %v2896_v44 = vsel %vm9834_vm2, %v2893_v14, 0.0 }
 0x4b4   : > { %v2897_v39 = vadd.f32 %v2896_v44, %v2895_v57  ;;  %v2903_v6 = vsel %vm9834_vm2, %v2901_v54, 0.0 }
 0x4b5   : > { %v2904_v7 = vsel %vm9834_vm2, %v2902_v21, 0.0 }
 0x4b6   : > { %2898 = vadd.xlane.f32.xlu0 %v2897_v39  ;;  %v2905_v9 = vadd.f32 %v2904_v7, %v2903_v6 }
 0x4b8   : > { %2906 = vadd.xlane.f32.xlu1 %v2905_v9 }
 0x543   : > { %v2899_v34 = vpop.xlane.xlu0 %2898 }
 0x544   : > { %v2900_v58 = vmul.f32 0.00390625, %v2899_v34 }
 0x545   : > { %v2907_v25 = vpop.xlane.xlu1 %2906 }
 0x546   : > { %v2908_v42 = vmul.f32 0.00390625, %v2907_v25  ;;  %v2909_v12 = vmul.f32 %v2900_v58, %v2900_v58  ;;  %v2911_v20 = vsub.f32 %v2891_v40, %v2900_v58  ;;  %v2912_v11 = vsub.f32 %v2893_v14, %v2900_v58 }
 0x548   : > { %v2910_v53 = vsub.f32 %v2908_v42, %v2909_v12 }
 0x54a   : > { %v2913_v28 = vadd.f32 1e-05, %v2910_v53 }
 0x54c   : > { %6275 = vrsqrt.f32 %v2913_v28 }
 0x556   : > { %v6276_v3 = vpop.eup %6275 }
 0x557   : > { %v2915_v17 = vmul.f32 %v6276_v3, %v2911_v20  ;;  %v2916_v16 = vmul.f32 %v6276_v3, %v2912_v11 }
 0x559   : > { %vm2917_vm11 = vcmp.gt.f32.partialorder %v2915_v17, 0.0  ;;  %v2919_v27 = vmul.f32 0.01, %v2915_v17  ;;  %v2920_v45 = vmul.f32 0.01, %v2916_v16  ;;  %vm2918_vm2 = vcmp.gt.f32.partialorder %v2916_v16, 0.0 }
 0x55b   : > { %v2921_v22 = vsel %vm2917_vm11, %v2915_v17, %v2919_v27  ;;  %v2922_v19 = vsel %vm2918_vm2, %v2916_v16, %v2920_v45  ;;  %vm3147_vm11 = vcmask 137230   ;;  %vm9964_vm2 = vcmask 1043456  }
 0x55c   : > { %2927 = vrot.lane.b32.xlu1 %v2921_v22, %s6385_s26  ;;  %2924 = vrot.lane.b32.xlu0 %v2921_v22, %s6384_s29 }
 0x560   : > { %2933 = vrot.lane.b32.xlu1 %v2921_v22, %s6380_s14  ;;  %2930 = vrot.lane.b32.xlu0 %v2921_v22, %s6386_s28 }
 0x564   : > { %2939 = vrot.lane.b32.xlu1 %v2921_v22, %s6379_s12  ;;  %2936 = vrot.lane.b32.xlu0 %v2921_v22, %s6383_s25 }
 0x568   : > { %2946 = vrot.lane.b32.xlu1 %v2922_v19, %s6384_s29  ;;  %2942 = vrot.lane.b32.xlu0 %v2921_v22, %s6382_s16 }
 0x56c   : > { %2952 = vrot.lane.b32.xlu1 %v2922_v19, %s6386_s28  ;;  %2949 = vrot.lane.b32.xlu0 %v2922_v19, %s6385_s26 }
 0x570   : > { %2958 = vrot.lane.b32.xlu1 %v2922_v19, %s6383_s25  ;;  %2955 = vrot.lane.b32.xlu0 %v2922_v19, %s6380_s14 }
 0x574   : > { %2964 = vrot.lane.b32.xlu1 %v2922_v19, %s6382_s16  ;;  %2961 = vrot.lane.b32.xlu0 %v2922_v19, %s6379_s12 }
 0x5ce   : > { %v2928_v1 = vpop.permute.xlu1 %2927  ;;  %v2925_v35 = vpop.permute.xlu0 %2924 }
 0x5cf   : > { %v2967_v52 = vcombine.low %v2921_v22, %v2928_v1 }
 0x5d1   : > { %v2974_v31 = vrot.slane %v2967_v52, %v6555_v18 }
 0x5d2   : > { %v2934_v47 = vpop.permute.xlu1 %2933  ;;  %v2931_v29 = vpop.permute.xlu0 %2930 }
 0x5d3   : > { %v2975_v51 = vcombine.low %v2925_v35, %v2931_v29 }
 0x5d5   : > { %v2982_v60 = vrot.slane %v2975_v51, %v6555_v18 }
 0x5d6   : > { %v2940_v62 = vpop.permute.xlu1 %2939  ;;  %v2937_v23 = vpop.permute.xlu0 %2936 }
 0x5d7   : > { %v2983_v63 = vcombine.low %v2934_v47, %v2940_v62  ;;  %v2999_v59 = vcombine.low %v2974_v31, %v2982_v60  ;;  %v3000_v33 = vcombine.high %v2974_v31, %v2982_v60 }
 0x5d9   : > { %v2990_v55 = vrot.slane %v2983_v63, %v6555_v18  ;;  %v3007_v0 = vrot.slane %v2999_v59, %v6563_v38  ;;  %v3014_v54 = vrot.slane %v3000_v33, %v6563_v38 }
 0x5da   : > { %v2947_v10 = vpop.permute.xlu1 %2946  ;;  %v2943_v13 = vpop.permute.xlu0 %2942 }
 0x5db   : > { %v2991_v46 = vcombine.low %v2937_v23, %v2943_v13 }
 0x5dd   : > { %v2998_v56 = vrot.slane %v2991_v46, %v6555_v18 }
 0x5de   : > { %v2953_v32 = vpop.permute.xlu1 %2952  ;;  %v2950_v50 = vpop.permute.xlu0 %2949 }
 0x5df   : > { %v3015_v30 = vcombine.low %v2990_v55, %v2998_v56  ;;  %v3043_v15 = vcombine.low %v2947_v10, %v2953_v32  ;;  %v3035_v43 = vcombine.low %v2922_v19, %v2950_v50  ;;  %v3016_v4 = vcombine.high %v2990_v55, %v2998_v56 }
 0x5e1   : > { %v3023_v48 = vrot.slane %v3015_v30, %v6563_v38  ;;  %v3050_v61 = vrot.slane %v3043_v15, %v6555_v18  ;;  %v3042_v5 = vrot.slane %v3035_v43, %v6555_v18  ;;  %v3030_v36 = vrot.slane %v3016_v4, %v6563_v38 }
 0x5e2   : > { %v2959_v2 = vpop.permute.xlu1 %2958  ;;  %v2956_v26 = vpop.permute.xlu0 %2955 }
 0x5e3   : > { %v3031_v37 = vcombine.low %v3007_v0, %v3023_v48  ;;  %v3032_v14 = vcombine.high %v3007_v0, %v3023_v48  ;;  %v3067_v57 = vcombine.low %v3042_v5, %v3050_v61  ;;  %v3033_v6 = vcombine.low %v3014_v54, %v3030_v36 }
 0x5e4   : > { %v3034_v58 = vcombine.high %v3014_v54, %v3030_v36  ;;  %v3068_v42 = vcombine.high %v3042_v5, %v3050_v61 }
 0x5e5   : > { %3111 = vrot.lane.b32.xlu0 %v3031_v37, %s6389_s8  ;;  %v3075_v7 = vrot.slane %v3067_v57, %v6563_v38 }
 0x5e6   : > { %v2965_v8 = vpop.permute.xlu1 %2964  ;;  %v2962_v41 = vpop.permute.xlu0 %2961  ;;  %v3082_v28 = vrot.slane %v3068_v42, %v6563_v38 }
 0x5e7   : > { %v3059_v40 = vcombine.low %v2959_v2, %v2965_v8  ;;  %v3051_v24 = vcombine.low %v2956_v26, %v2962_v41 }
 0x5e9   : > { %v3066_v21 = vrot.slane %v3059_v40, %v6555_v18  ;;  %v3058_v44 = vrot.slane %v3051_v24, %v6555_v18  ;;  %3115 = vrot.lane.b32.xlu0 %v3032_v14, %s6389_s8 }
 0x5eb   : > { %v3083_v39 = vcombine.low %v3058_v44, %v3066_v21  ;;  %v3084_v34 = vcombine.high %v3058_v44, %v3066_v21 }
 0x5ed   : > { %v3091_v9 = vrot.slane %v3083_v39, %v6563_v38  ;;  %3119 = vrot.lane.b32.xlu0 %v3033_v6, %s6389_s8  ;;  %v3098_v12 = vrot.slane %v3084_v34, %v6563_v38 }
 0x5ef   : > { %v3099_v25 = vcombine.low %v3075_v7, %v3091_v9  ;;  %v3100_v53 = vcombine.high %v3075_v7, %v3091_v9  ;;  %v3101_v20 = vcombine.low %v3082_v28, %v3098_v12  ;;  %v3102_v3 = vcombine.high %v3082_v28, %v3098_v12 }
 0x5f1   : > { %3123 = vrot.lane.b32.xlu0 %v3034_v58, %s6389_s8  ;;  %3113 = vrot.lane.b32.xlu1 %v3099_v25, %s6389_s8 }
 0x5f5   : > { %3117 = vrot.lane.b32.xlu1 %v3100_v53, %s6389_s8 }
 0x5f9   : > { %3121 = vrot.lane.b32.xlu1 %v3101_v20, %s6389_s8 }
 0x5fd   : > { %3125 = vrot.lane.b32.xlu1 %v3102_v3, %s6389_s8 }
 0x657   : > { %v3112_v17 = vpop.permute.xlu0 %3111 }
 0x658   : > { %3135 = vst.msk [vmem:[#allocation2 + $0x1] sm:$0xff] %vm464_vm0, %v3112_v17 }
 0x659   : > { %3143 = vst.msk [vmem:[#allocation2 - $0x1] sm:$0x2] %vm501_vm1, %v3112_v17 }
 0x65b   : > { %v3116_v27 = vpop.permute.xlu0 %3115 }
 0x65c   : > { %3137 = vst.msk [vmem:[#allocation2 + $0x19] sm:$0xff] %vm464_vm0, %v3116_v27 }
 0x65d   : > { %3144 = vst.msk [vmem:[#allocation2 + $0x17] sm:$0x2] %vm501_vm1, %v3116_v27 }
 0x65f   : > { %v3120_v22 = vpop.permute.xlu0 %3119 }
 0x660   : > { %3139 = vst.msk [vmem:[#allocation2 + $0x31] sm:$0xff] %vm464_vm0, %v3120_v22  ;;  %v3152_v51 = vld [vmem:[#allocation2] sm:$0xff] }
 0x661   : > { %3145 = vst.msk [vmem:[#allocation2 + $0x2f] sm:$0x2] %vm501_vm1, %v3120_v22 }
 0x663   : > { %v3114_v11 = vpop.permute.xlu1 %3113  ;;  %v3124_v16 = vpop.permute.xlu0 %3123 }
 0x664   : > { %3136 = vst.msk [vmem:[#allocation2 + $0x9] sm:$0xff] %vm464_vm0, %v3114_v11  ;;  %3141 = vst.msk [vmem:[#allocation2 + $0x49] sm:$0xff] %vm464_vm0, %v3124_v16  ;;  %v3155_v23 = vld [vmem:[#allocation2 + $0x18] sm:$0xff] }
 0x665   : > { %3148 = vst.msk [vmem:[#allocation2 + $0xb] sm:$0x40] %vm3147_vm11, %v3114_v11 }
 0x666   : > { %3146 = vst.msk [vmem:[#allocation2 + $0x47] sm:$0x2] %vm501_vm1, %v3124_v16 }
 0x667   : > { %v3118_v45 = vpop.permute.xlu1 %3117 }
 0x668   : > { %3138 = vst.msk [vmem:[#allocation2 + $0x21] sm:$0xff] %vm464_vm0, %v3118_v45  ;;  %v3158_v60 = vld [vmem:[#allocation2 + $0x30] sm:$0xff] }
 0x669   : > { %3149 = vst.msk [vmem:[#allocation2 + $0x23] sm:$0x40] %vm3147_vm11, %v3118_v45 }
 0x66b   : > { %v3122_v19 = vpop.permute.xlu1 %3121  ;;  %v3153_v1 = vld [vmem:[#allocation2 + $0x8] sm:$0xff] }
 0x66c   : > { %3140 = vst.msk [vmem:[#allocation2 + $0x39] sm:$0xff] %vm464_vm0, %v3122_v19  ;;  %3178 = vrot.lane.b32.xlu0 %v3153_v1, %s6390_s7  ;;  %v3154_v52 = vld [vmem:[#allocation2 + $0x10] sm:$0x3] }
 0x66d   : > { %3150 = vst.msk [vmem:[#allocation2 + $0x3b] sm:$0x40] %vm3147_vm11, %v3122_v19  ;;  %v3161_v13 = vld [vmem:[#allocation2 + $0x48] sm:$0xff] }
 0x66f   : > { %v3126_v35 = vpop.permute.xlu1 %3125  ;;  %v3156_v47 = vld [vmem:[#allocation2 + $0x20] sm:$0xff] }
 0x670   : > { %3142 = vst.msk [vmem:[#allocation2 + $0x51] sm:$0xff] %vm464_vm0, %v3126_v35  ;;  %3184 = vrot.lane.b32.xlu1 %v3156_v47, %s6390_s7  ;;  %v3157_v63 = vld [vmem:[#allocation2 + $0x28] sm:$0x3]  ;;  %vm9951_vm0 = vcmask 392192  }
 0x671   : > { %3151 = vst.msk [vmem:[#allocation2 + $0x53] sm:$0x40] %vm3147_vm11, %v3126_v35  ;;  %vm9952_vm1 = vmmov %vm9951_vm0 }
 0x672   : > { %vm9965_vm11 = vmmov %vm9964_vm2 }
 0x673   : > { %v3159_v29 = vld [vmem:[#allocation2 + $0x38] sm:$0xff] }
 0x674   : > { %3190 = vrot.lane.b32.xlu0 %v3159_v29, %s6390_s7  ;;  %v3160_v10 = vld [vmem:[#allocation2 + $0x40] sm:$0x3] }
 0x677   : > { %v3162_v62 = vld [vmem:[#allocation2 + $0x50] sm:$0xff] }
 0x678   : > { %3176 = vrot.lane.b32.xlu0 %v3152_v51, %s6390_s7  ;;  %3196 = vrot.lane.b32.xlu1 %v3162_v62, %s6390_s7  ;;  %v3163_v31 = vld [vmem:[#allocation2 + $0x58] sm:$0x3] }
 0x67c   : > { %3182 = vrot.lane.b32.xlu0 %v3155_v23, %s6390_s7  ;;  %3180 = vrot.lane.b32.xlu1 %v3154_v52, %s6390_s7 }
 0x680   : > { %3188 = vrot.lane.b32.xlu0 %v3158_v60, %s6390_s7  ;;  %3186 = vrot.lane.b32.xlu1 %v3157_v63, %s6390_s7 }
 0x684   : > { %3192 = vrot.lane.b32.xlu1 %v3160_v10, %s6390_s7  ;;  %3194 = vrot.lane.b32.xlu0 %v3161_v13, %s6390_s7 }
 0x688   : > { %3198 = vrot.lane.b32.xlu1 %v3163_v31, %s6390_s7 }
 0x6de   : > { %v3179_v46 = vpop.permute.xlu0 %3178 }
 0x6df   : > { %3213 = vst.msk [vmem:[#allocation2 + $0x8] sm:$0xff] %vm599_vm3, %v3179_v46 }
 0x6e2   : > { %v3185_v59 = vpop.permute.xlu1 %3184 }
 0x6e3   : > { %3216 = vst.msk [vmem:[#allocation2 + $0x20] sm:$0xff] %vm599_vm3, %v3185_v59 }
 0x6e6   : > { %v3191_v55 = vpop.permute.xlu0 %3190  ;;  %v3225_v56 = vld [vmem:[#allocation2 + $0x8] sm:$0xff] }
 0x6e7   : > { %3219 = vst.msk [vmem:[#allocation2 + $0x38] sm:$0xff] %vm599_vm3, %v3191_v55  ;;  %3250 = vrot.lane.b32.xlu0 %v3225_v56, %s6391_s9 }
 0x6ea   : > { %v3197_v32 = vpop.permute.xlu1 %3196  ;;  %v3177_v50 = vpop.permute.xlu0 %3176  ;;  %v3228_v30 = vld [vmem:[#allocation2 + $0x20] sm:$0xff] }
 0x6eb   : > { %3222 = vst.msk [vmem:[#allocation2 + $0x50] sm:$0xff] %vm599_vm3, %v3197_v32  ;;  %3212 = vst.msk [vmem:[#allocation2] sm:$0xff] %vm599_vm3, %v3177_v50  ;;  %3256 = vrot.lane.b32.xlu1 %v3228_v30, %s6391_s9 }
 0x6ee   : > { %v3181_v0 = vpop.permute.xlu1 %3180  ;;  %v3183_v48 = vpop.permute.xlu0 %3182  ;;  %v3231_v15 = vld [vmem:[#allocation2 + $0x38] sm:$0xff] }
 0x6ef   : > { %3214 = vst.msk [vmem:[#allocation2 + $0x10] sm:$0x3] %vm602_vm4, %v3181_v0  ;;  %3262 = vrot.lane.b32.xlu0 %v3231_v15, %s6391_s9 }
 0x6f0   : > { %3215 = vst.msk [vmem:[#allocation2 + $0x18] sm:$0xff] %vm599_vm3, %v3183_v48 }
 0x6f2   : > { %v3187_v43 = vpop.permute.xlu1 %3186  ;;  %v3189_v2 = vpop.permute.xlu0 %3188  ;;  %v3234_v26 = vld [vmem:[#allocation2 + $0x50] sm:$0xff]  ;;  %v3224_v4 = vld [vmem:[#allocation2] sm:$0xff] }
 0x6f3   : > { %3217 = vst.msk [vmem:[#allocation2 + $0x28] sm:$0x3] %vm602_vm4, %v3187_v43  ;;  %3268 = vrot.lane.b32.xlu1 %v3234_v26, %s6391_s9  ;;  %3248 = vrot.lane.b32.xlu0 %v3224_v4, %s6391_s9 }
 0x6f4   : > { %3218 = vst.msk [vmem:[#allocation2 + $0x30] sm:$0xff] %vm599_vm3, %v3189_v2 }
 0x6f6   : > { %v3193_v37 = vpop.permute.xlu1 %3192  ;;  %v3195_v33 = vpop.permute.xlu0 %3194  ;;  %v3226_v61 = vld [vmem:[#allocation2 + $0x10] sm:$0x3] }
 0x6f7   : > { %v3227_v5 = vld [vmem:[#allocation2 + $0x18] sm:$0xff]  ;;  %3220 = vst.msk [vmem:[#allocation2 + $0x40] sm:$0x3] %vm602_vm4, %v3193_v37  ;;  %3252 = vrot.lane.b32.xlu1 %v3226_v61, %s6391_s9 }
 0x6f8   : > { %3221 = vst.msk [vmem:[#allocation2 + $0x48] sm:$0xff] %vm599_vm3, %v3195_v33  ;;  %3254 = vrot.lane.b32.xlu0 %v3227_v5, %s6391_s9  ;;  %vm9953_vm3 = vmmov %vm9951_vm0 }
 0x6fa   : > { %v3199_v8 = vpop.permute.xlu1 %3198  ;;  %v3229_v41 = vld [vmem:[#allocation2 + $0x28] sm:$0x3] }
 0x6fb   : > { %v3230_v36 = vld [vmem:[#allocation2 + $0x30] sm:$0xff]  ;;  %3223 = vst.msk [vmem:[#allocation2 + $0x58] sm:$0x3] %vm602_vm4, %v3199_v8  ;;  %3258 = vrot.lane.b32.xlu1 %v3229_v41, %s6391_s9  ;;  %vm9954_vm4 = vmmov %vm9951_vm0 }
 0x6fc   : > { %3260 = vrot.lane.b32.xlu0 %v3230_v36, %s6391_s9 }
 0x6fe   : > { %v3232_v40 = vld [vmem:[#allocation2 + $0x40] sm:$0x3] }
 0x6ff   : > { %v3233_v24 = vld [vmem:[#allocation2 + $0x48] sm:$0xff]  ;;  %3264 = vrot.lane.b32.xlu1 %v3232_v40, %s6391_s9 }
 0x700   : > { %3266 = vrot.lane.b32.xlu0 %v3233_v24, %s6391_s9 }
 0x702   : > { %v3235_v14 = vld [vmem:[#allocation2 + $0x58] sm:$0x3] }
 0x703   : > { %3270 = vrot.lane.b32.xlu1 %v3235_v14, %s6391_s9 }
 0x759   : > { %v3251_v54 = vpop.permute.xlu0 %3250 }
 0x75a   : > { %3285 = vst.msk [vmem:[#allocation2 + $0x8] sm:$0xff] %vm673_vm5, %v3251_v54 }
 0x75d   : > { %v3257_v57 = vpop.permute.xlu1 %3256 }
 0x75e   : > { %3288 = vst.msk [vmem:[#allocation2 + $0x20] sm:$0xff] %vm673_vm5, %v3257_v57 }
 0x761   : > { %v3263_v21 = vpop.permute.xlu0 %3262  ;;  %v8224_v44 = vld [vmem:[#allocation2 + $0x8] sm:$0xff] }
 0x762   : > { %3291 = vst.msk [vmem:[#allocation2 + $0x38] sm:$0xff] %vm673_vm5, %v3263_v21  ;;  %3524 = vrot.lane.b32.xlu0 %v8224_v44, %s6392_s10  ;;  %v3987_v63 = vrot.slane %v8224_v44, 1  ;;  %v4681_v46 = vrot.slane %v8224_v44, 2 }
 0x765   : > { %v3269_v39 = vpop.permute.xlu1 %3268  ;;  %v3249_v6 = vpop.permute.xlu0 %3248  ;;  %v8229_v7 = vld [vmem:[#allocation2 + $0x20] sm:$0xff] }
 0x766   : > { %3294 = vst.msk [vmem:[#allocation2 + $0x50] sm:$0xff] %vm673_vm5, %v3269_v39  ;;  %3284 = vst.msk [vmem:[#allocation2] sm:$0xff] %vm673_vm5, %v3249_v6  ;;  %3528 = vrot.lane.b32.xlu1 %v8229_v7, %s6392_s10  ;;  %v3992_v31 = vrot.slane %v8229_v7, 1  ;;  %v4686_v41 = vrot.slane %v8229_v7, 2 }
 0x769   : > { %v3253_v9 = vpop.permute.xlu1 %3252  ;;  %v8235_v58 = vld [vmem:[#allocation2 + $0x38] sm:$0xff] }
 0x76a   : > { %v3255_v34 = vpop.permute.xlu0 %3254  ;;  %3286 = vst.msk [vmem:[#allocation2 + $0x10] sm:$0x3] %vm676_vm6, %v3253_v9  ;;  %3532 = vrot.lane.b32.xlu0 %v8235_v58, %s6392_s10  ;;  %v3376_v25 = vcombine.low %v8224_v44, %v8235_v58  ;;  %v3377_v42 = vcombine.high %v8224_v44, %v8235_v58  ;;  %v3997_v10 = vrot.slane %v8235_v58, 1  ;;  %v4691_v50 = vrot.slane %v8235_v58, 2 }
 0x76b   : > { %3287 = vst.msk [vmem:[#allocation2 + $0x18] sm:$0xff] %vm673_vm5, %v3255_v34 }
 0x76c   : > { %v8262_v16 = vrot.slane %v3376_v25, %v6555_v18  ;;  %v8268_v19 = vrot.slane %v3377_v42, %v6555_v18 }
 0x76d   : > { %v3259_v12 = vpop.permute.xlu1 %3258  ;;  %v8245_v28 = vld [vmem:[#allocation2 + $0x50] sm:$0xff]  ;;  %v8247_v20 = vld [vmem:[#allocation2] sm:$0xff] }
 0x76e   : > { %v3261_v53 = vpop.permute.xlu0 %3260  ;;  %3289 = vst.msk [vmem:[#allocation2 + $0x28] sm:$0x3] %vm676_vm6, %v3259_v12  ;;  %3536 = vrot.lane.b32.xlu1 %v8245_v28, %s6392_s10  ;;  %3522 = vrot.lane.b32.xlu0 %v8247_v20, %s6392_s10  ;;  %v3392_v3 = vcombine.low %v8229_v7, %v8245_v28  ;;  %v3393_v17 = vcombine.high %v8229_v7, %v8245_v28  ;;  %v3986_v62 = vrot.slane %v8247_v20, 1  ;;  %v4002_v33 = vrot.slane %v8245_v28, 1 }
 0x76f   : > { %3290 = vst.msk [vmem:[#allocation2 + $0x30] sm:$0xff] %vm673_vm5, %v3261_v53  ;;  %v4696_v40 = vrot.slane %v8245_v28, 2 }
 0x770   : > { %v8265_v45 = vrot.slane %v3392_v3, %v6555_v18  ;;  %v8271_v1 = vrot.slane %v3393_v17, %v6555_v18  ;;  %v8302_v30 = vsel %vm1384_vm7, %v3986_v62, %v3987_v63 }
 0x771   : > { %v3265_v27 = vpop.permute.xlu1 %3264  ;;  %v3298_v60 = vld [vmem:[#allocation2 + $0x10] sm:$0x3] }
 0x772   : > { %v3267_v22 = vpop.permute.xlu0 %3266  ;;  %v8259_v11 = vld [vmem:[#allocation2 + $0x18] sm:$0xff]  ;;  %3292 = vst.msk [vmem:[#allocation2 + $0x40] sm:$0x3] %vm676_vm6, %v3265_v27  ;;  %v3409_v35 = vcombine.high %v8262_v16, %v8265_v45  ;;  %v3989_v56 = vrot.slane %v3298_v60, 1  ;;  %v4683_v43 = vrot.slane %v3298_v60, 2 }
 0x773   : > { %3293 = vst.msk [vmem:[#allocation2 + $0x48] sm:$0xff] %vm673_vm5, %v3267_v22  ;;  %3526 = vrot.lane.b32.xlu1 %v8259_v11, %s6392_s10  ;;  %v3991_v4 = vrot.slane %v8259_v11, 1  ;;  %vm9957_vm5 = vmmov %vm9951_vm0 }
 0x774   : > { %v8323_v24 = vsel %vm1384_vm7, %v3987_v63, %v3989_v56  ;;  %v8343_v6 = vsel %vm2079_vm8, %v4681_v46, %v4683_v43 }
 0x775   : > { %v3271_v23 = vpop.permute.xlu1 %3270  ;;  %v3301_v32 = vld [vmem:[#allocation2 + $0x28] sm:$0x3]  ;;  %v8346_v34 = vsel %vm1384_vm7, %v3991_v4, %v3992_v31 }
 0x776   : > { %v8286_v52 = vld [vmem:[#allocation2 + $0x30] sm:$0xff]  ;;  %3295 = vst.msk [vmem:[#allocation2 + $0x58] sm:$0x3] %vm676_vm6, %v3271_v23  ;;  %v3994_v8 = vrot.slane %v3301_v32, 1  ;;  %v4688_v36 = vrot.slane %v3301_v32, 2  ;;  %vm9958_vm6 = vmmov %vm9951_vm0 }
 0x777   : > { %3530 = vrot.lane.b32.xlu0 %v8286_v52, %s6392_s10  ;;  %v3996_v13 = vrot.slane %v8286_v52, 1  ;;  %v3309_v59 = vcombine.high %v8247_v20, %v8286_v52  ;;  %v3308_v55 = vcombine.low %v8247_v20, %v8286_v52 }
 0x778   : > { %v8357_v3 = vsel %vm1384_vm7, %v3992_v31, %v3994_v8  ;;  %v8364_v27 = vsel %vm2079_vm8, %v4686_v41, %v4688_v36 }
 0x779   : > { %v8305_v0 = vsel %vm1384_vm7, %v3996_v13, %v3997_v10  ;;  %v3304_v15 = vld [vmem:[#allocation2 + $0x40] sm:$0x3] }
 0x77a   : > { %v8307_v48 = vld [vmem:[#allocation2 + $0x48] sm:$0xff]  ;;  %v4014_v2 = vcombine.low %v8302_v30, %v8305_v0  ;;  %v4015_v26 = vcombine.high %v8302_v30, %v8305_v0  ;;  %v3999_v37 = vrot.slane %v3304_v15, 1  ;;  %v4693_v61 = vrot.slane %v3304_v15, 2 }
 0x77b   : > { %3754 = vrot.lane.b32.xlu0 %v8224_v44, %s6390_s7  ;;  %3534 = vrot.lane.b32.xlu1 %v8307_v48, %s6392_s10  ;;  %v4001_v5 = vrot.slane %v8307_v48, 1 }
 0x77c   : > { %v8326_v14 = vsel %vm1384_vm7, %v3997_v10, %v3999_v37  ;;  %v8331_v54 = vsel %vm2079_vm8, %v4691_v50, %v4693_v61  ;;  %v8375_v23 = vrot.slane %v4014_v2, %v6555_v18  ;;  %v4685_v61 = vrot.slane %v8259_v11, 2 }
 0x77d   : > { %v8334_v57 = vsel %vm1384_vm7, %v4001_v5, %v4002_v33  ;;  %v4082_v21 = vcombine.low %v8323_v24, %v8326_v14  ;;  %v4083_v39 = vcombine.high %v8323_v24, %v8326_v14  ;;  %v3307_v9 = vld [vmem:[#allocation2 + $0x58] sm:$0x3]  ;;  %v4776_v17 = vcombine.low %v8343_v6, %v8331_v54 }
 0x77e   : > { %v4004_v25 = vrot.slane %v3307_v9, 1  ;;  %v4698_v42 = vrot.slane %v3307_v9, 2  ;;  %v4030_v12 = vcombine.low %v8346_v34, %v8334_v57  ;;  %v4031_v53 = vcombine.high %v8346_v34, %v8334_v57 }
 0x77f   : > { %3762 = vrot.lane.b32.xlu0 %v8235_v58, %s6390_s7  ;;  %3758 = vrot.lane.b32.xlu1 %v8229_v7, %s6390_s7  ;;  %v8391_v31 = vrot.slane %v4082_v21, %v6555_v18  ;;  %v8394_v56 = vrot.slane %v4083_v39, %v6555_v18  ;;  %v8405_v2 = vrot.slane %v4776_v17, %v6555_v18 }
 0x780   : > { %v8367_v22 = vsel %vm1384_vm7, %v4002_v33, %v4004_v25  ;;  %v8372_v62 = vsel %vm2079_vm8, %v4696_v40, %v4698_v42  ;;  %v8378_v60 = vrot.slane %v4030_v12, %v6555_v18  ;;  %v8411_v37 = vrot.slane %v4031_v53, %v6555_v18  ;;  %vm9959_vm7 = vmmov %vm9951_vm0 }
 0x781   : > { %v4098_v63 = vcombine.low %v8357_v3, %v8367_v22  ;;  %v4099_v10 = vcombine.high %v8357_v3, %v8367_v22  ;;  %v4792_v13 = vcombine.low %v8364_v27, %v8372_v62  ;;  %9906 = vst [vmem:[#allocation15_spill] sm:$0xff] %v8405_v2  ;;  %v8428_v21 = vrot.slane %v4015_v26, %v6555_v18 }
 0x782   : > { %v4047_v33 = vcombine.high %v8375_v23, %v8378_v60  ;;  %v3325_v39 = vcombine.high %v8259_v11, %v8307_v48  ;;  %v8436_v9 = vrot.slane %v3309_v59, %v6555_v18  ;;  %v3324_v25 = vcombine.low %v8259_v11, %v8307_v48 }
 0x783   : > { %3752 = vrot.lane.b32.xlu0 %v8247_v20, %s6390_s7  ;;  %3766 = vrot.lane.b32.xlu1 %v8245_v28, %s6390_s7  ;;  %v8399_v15 = vrot.slane %v4098_v63, %v6555_v18  ;;  %v8402_v43 = vrot.slane %v4099_v10, %v6555_v18  ;;  %v8408_v4 = vrot.slane %v4792_v13, %v6555_v18 }
 0x784   : > { %v8441_v42 = vrot.slane %v3325_v39, %v6555_v18  ;;  %v4793_v17 = vcombine.high %v8364_v27, %v8372_v62  ;;  %v8455_v59 = vrot.slane %v3308_v55, %v6555_v18  ;;  %v8458_v63 = vrot.slane %v3324_v25, %v6555_v18 }
 0x785   : > { %9907 = vst [vmem:[#allocation16_spill] sm:$0xff] %v8408_v4  ;;  %v4115_v8 = vcombine.high %v8391_v31, %v8399_v15  ;;  %v4130_v36 = vcombine.low %v8394_v56, %v8402_v43  ;;  %v4777_v13 = vcombine.high %v8343_v6, %v8331_v54  ;;  %v4690_v25 = vrot.slane %v8286_v52, 2 }
 0x786   : > { %v3356_v10 = vcombine.low %v8436_v9, %v8441_v42  ;;  %v8475_v5 = vrot.slane %v4793_v17, %v6555_v18  ;;  %v4680_v17 = vrot.slane %v8247_v20, 2  ;;  %v8526_v44 = vsel %vm2079_vm8, %v4685_v61, %v4686_v41 }
 0x787   : > { %3760 = vrot.lane.b32.xlu0 %v8286_v52, %s6390_s7  ;;  %3756 = vrot.lane.b32.xlu1 %v8259_v11, %s6390_s7  ;;  %v8482_v51 = vrot.slane %v4777_v13, %v6555_v18  ;;  %v8521_v20 = vsel %vm2079_vm8, %v4690_v25, %v4691_v50  ;;  %v4695_v52 = vrot.slane %v8307_v48, 2 }
 0x788   : > { %9908 = vst [vmem:[#allocation14_spill] sm:$0xff] %v8475_v5  ;;  %v8510_v13 = vsel %vm2079_vm8, %v4680_v17, %v4681_v46 }
 0x789   : > { %9909 = vst [vmem:[#allocation12_spill] sm:$0xff] %v8482_v51  ;;  %v8536_v58 = vsel %vm2079_vm8, %v4695_v52, %v4696_v40  ;;  %vm9960_vm8 = vmmov %vm9951_vm0 }
 0x78b   : > { %4452 = vrot.lane.b32.xlu0 %v8323_v24, %s6390_s7  ;;  %3764 = vrot.lane.b32.xlu1 %v8307_v48, %s6390_s7 }
 0x78f   : > { %4460 = vrot.lane.b32.xlu0 %v8326_v14, %s6390_s7  ;;  %4456 = vrot.lane.b32.xlu1 %v8357_v3, %s6390_s7 }
 0x793   : > { %4916 = vrot.lane.b32.xlu0 %v8343_v6, %s6392_s10  ;;  %4464 = vrot.lane.b32.xlu1 %v8367_v22, %s6390_s7 }
 0x797   : > { %4924 = vrot.lane.b32.xlu0 %v8331_v54, %s6392_s10  ;;  %4920 = vrot.lane.b32.xlu1 %v8364_v27, %s6392_s10 }
 0x79b   : > { %4450 = vrot.lane.b32.xlu0 %v8302_v30, %s6390_s7  ;;  %4928 = vrot.lane.b32.xlu1 %v8372_v62, %s6392_s10 }
 0x79f   : > { %4458 = vrot.lane.b32.xlu0 %v8305_v0, %s6390_s7  ;;  %4454 = vrot.lane.b32.xlu1 %v8346_v34, %s6390_s7 }
 0x7a3   : > { %4914 = vrot.lane.b32.xlu0 %v8510_v13, %s6392_s10  ;;  %4462 = vrot.lane.b32.xlu1 %v8334_v57, %s6390_s7 }
 0x7a7   : > { %4922 = vrot.lane.b32.xlu0 %v8521_v20, %s6392_s10  ;;  %4918 = vrot.lane.b32.xlu1 %v8526_v44, %s6392_s10 }
 0x7ab   : > { %4222 = vrot.lane.b32.xlu0 %v8323_v24, %s6392_s10  ;;  %4926 = vrot.lane.b32.xlu1 %v8536_v58, %s6392_s10 }
 0x7af   : > { %4230 = vrot.lane.b32.xlu0 %v8326_v14, %s6392_s10  ;;  %4226 = vrot.lane.b32.xlu1 %v8357_v3, %s6392_s10  ;;  %v8587_v14 = vrot.slane %v4115_v8, %v6563_v38 }
 0x7b3   : > { %4220 = vrot.lane.b32.xlu0 %v8302_v30, %s6392_s10  ;;  %4234 = vrot.lane.b32.xlu1 %v8367_v22, %s6392_s10 }
 0x7b7   : > { %4228 = vrot.lane.b32.xlu0 %v8305_v0, %s6392_s10  ;;  %4224 = vrot.lane.b32.xlu1 %v8346_v34, %s6392_s10 }
 0x7bb   : > { %5146 = vrot.lane.b32.xlu0 %v8343_v6, %s6390_s7  ;;  %4232 = vrot.lane.b32.xlu1 %v8334_v57, %s6392_s10  ;;  %s5522_s10 = scalar_lea.sflag [#allocation5], %s6530_s13 }
 0x7bf   : > { %5154 = vrot.lane.b32.xlu0 %v8331_v54, %s6390_s7  ;;  %5150 = vrot.lane.b32.xlu1 %v8364_v27, %s6390_s7 }
 0x7c3   : > { %5144 = vrot.lane.b32.xlu0 %v8510_v13, %s6390_s7  ;;  %5158 = vrot.lane.b32.xlu1 %v8372_v62, %s6390_s7 }
 0x7c7   : > { %5152 = vrot.lane.b32.xlu0 %v8521_v20, %s6390_s7  ;;  %5148 = vrot.lane.b32.xlu1 %v8526_v44, %s6390_s7 }
 0x7cb   : > { %5156 = vrot.lane.b32.xlu1 %v8536_v58, %s6390_s7 }
 0x7d4   : > { %v3525_v7 = vpop.permute.xlu0 %3524 }
 0x7d8   : > { %v3529_v28 = vpop.permute.xlu1 %3528 }
 0x7dc   : > { %v3533_v11 = vpop.permute.xlu0 %3532 }
 0x7dd   : > { %v3614_v46 = vcombine.low %v3525_v7, %v3533_v11 }
 0x7df   : > { %v8573_v0 = vrot.slane %v3614_v46, %v6555_v18  ;;  %v3615_v46 = vcombine.high %v3525_v7, %v3533_v11 }
 0x7e0   : > { %v3537_v50 = vpop.permute.xlu1 %3536  ;;  %v3523_v41 = vpop.permute.xlu0 %3522 }
 0x7e1   : > { %v3630_v30 = vcombine.low %v3529_v28, %v3537_v50  ;;  %v3631_v25 = vcombine.high %v3529_v28, %v3537_v50  ;;  %v8615_v7 = vrot.slane %v3615_v46, %v6555_v18 }
 0x7e3   : > { %v8576_v48 = vrot.slane %v3630_v30, %v6555_v18 }
 0x7e5   : > { %v3647_v40 = vcombine.high %v8573_v0, %v8576_v48  ;;  %v3527_v54 = vpop.permute.xlu1 %3526 }
 0x7e7   : > { %v8581_v24 = vrot.slane %v3647_v40, %v6563_v38 }
 0x7e9   : > { %v3531_v57 = vpop.permute.xlu0 %3530  ;;  %v5990_v6 = vpack.i.bf16 %v8587_v14, %v8581_v24 }
 0x7ea   : > { %v3546_v34 = vcombine.low %v3523_v41, %v3531_v57  ;;  %v3547_v47 = vcombine.high %v3523_v41, %v3531_v57 }
 0x7eb   : > { %5991 = vrot.lane.b32.xlu0 %v5990_v6, %s6379_s12  ;;  %v8607_v6 = vrot.slane %v4047_v33, %v6563_v38 }
 0x7ec   : > { %v8593_v62 = vrot.slane %v3546_v34, %v6555_v18  ;;  %v8610_v34 = vrot.slane %v3631_v25, %v6555_v18 }
 0x7ed   : > { %v3535_v3 = vpop.permute.xlu1 %3534  ;;  %v3755_v27 = vpop.permute.xlu0 %3754 }
 0x7ee   : > { %v3562_v22 = vcombine.low %v3527_v54, %v3535_v3  ;;  %v3662_v33 = vcombine.low %v8615_v7, %v8610_v34  ;;  %v3563_v25 = vcombine.high %v3527_v54, %v3535_v3 }
 0x7f0   : > { %v8596_v61 = vrot.slane %v3562_v22, %v6555_v18  ;;  %v8641_v12 = vrot.slane %v3662_v33, %v6563_v38 }
 0x7f1   : > { %v3759_v8 = vpop.permute.xlu1 %3758  ;;  %v3763_v17 = vpop.permute.xlu0 %3762 }
 0x7f2   : > { %v3579_v52 = vcombine.high %v8593_v62, %v8596_v61  ;;  %v3844_v30 = vcombine.low %v3755_v27, %v3763_v17  ;;  %v3845_v39 = vcombine.high %v3755_v27, %v3763_v17 }
 0x7f4   : > { %v8601_v40 = vrot.slane %v3579_v52, %v6563_v38  ;;  %v8618_v11 = vrot.slane %v3844_v30, %v6555_v18  ;;  %v8632_v30 = vrot.slane %v3409_v35, %v6563_v38  ;;  %v3561_v35 = vrot.slane %v3547_v47, %v6555_v18 }
 0x7f5   : > { %v3767_v28 = vpop.permute.xlu1 %3766  ;;  %v3753_v50 = vpop.permute.xlu0 %3752 }
 0x7f6   : > { %v3860_v22 = vcombine.low %v3759_v8, %v3767_v28  ;;  %v5995_v53 = vpack.i.bf16 %v8607_v6, %v8601_v40  ;;  %v3861_v41 = vcombine.high %v3759_v8, %v3767_v28 }
 0x7f8   : > { %v8621_v52 = vrot.slane %v3860_v22, %v6555_v18  ;;  %5996 = vrot.lane.b32.xlu0 %v5995_v53, %s6379_s12  ;;  %v3577_v22 = vrot.slane %v3563_v25, %v6555_v18 }
 0x7f9   : > { %v3757_v32 = vpop.permute.xlu1 %3756  ;;  %v3761_v55 = vpop.permute.xlu0 %3760 }
 0x7fa   : > { %v3877_v29 = vcombine.high %v8618_v11, %v8621_v52  ;;  %v3776_v46 = vcombine.low %v3753_v50, %v3761_v55  ;;  %v3777_v26 = vcombine.high %v3753_v50, %v3761_v55  ;;  %v3594_v47 = vcombine.low %v3561_v35, %v3577_v22 }
 0x7fb   : > { %v3595_v27 = vcombine.high %v3561_v35, %v3577_v22  ;;  %v3859_v22 = vrot.slane %v3845_v39, %v6555_v18 }
 0x7fc   : > { %v8635_v53 = vrot.slane %v3877_v29, %v6563_v38  ;;  %v8650_v29 = vrot.slane %v4130_v36, %v6563_v38  ;;  %v8653_v25 = vrot.slane %v3776_v46, %v6555_v18  ;;  %v3791_v33 = vrot.slane %v3777_v26, %v6555_v18 }
 0x7fd   : > { %v3765_v54 = vpop.permute.xlu1 %3764  ;;  %v8638_v3 = vpop.permute.xlu0 %4452  ;;  %v3875_v36 = vrot.slane %v3861_v41, %v6555_v18  ;;  %v9911_v41 = vcombine.high %v8455_v59, %v8458_v63  ;;  %v8695_v39 = vrot.slane %v3595_v27, %v6563_v38 }
 0x7fe   : > { %v3792_v57 = vcombine.low %v3757_v32, %v3765_v54  ;;  %v3793_v55 = vcombine.high %v3757_v32, %v3765_v54  ;;  %v6000_v50 = vpack.i.bf16 %v8635_v53, %v8632_v30  ;;  %v6005_v26 = vpack.i.bf16 %v8650_v29, %v8641_v12 }
 0x7ff   : > { %v3893_v2 = vcombine.high %v3859_v22, %v3875_v36 }
 0x800   : > { %v8657_v8 = vrot.slane %v3792_v57, %v6555_v18  ;;  %v3807_v32 = vrot.slane %v3793_v55, %v6555_v18  ;;  %6001 = vrot.lane.b32.xlu1 %v6000_v50, %s6379_s12  ;;  %v8674_v57 = vrot.slane %v3356_v10, %v6563_v38  ;;  %v8685_v50 = vrot.slane %v9911_v41, %v6563_v38 }
 0x801   : > { %v8661_v17 = vpop.permute.xlu1 %4456  ;;  %v8663_v28 = vpop.permute.xlu0 %4460 }
 0x802   : > { %v3809_v46 = vcombine.high %v8653_v25, %v8657_v8  ;;  %v3824_v54 = vcombine.low %v3791_v33, %v3807_v32 }
 0x804   : > { %6006 = vrot.lane.b32.xlu1 %v6005_v26, %s6380_s14  ;;  %v8679_v55 = vrot.slane %v3824_v54, %v6563_v38  ;;  %v8688_v35 = vrot.slane %v3809_v46, %v6563_v38  ;;  %v8698_v26 = vrot.slane %v3594_v47, %v6563_v38  ;;  %v3892_v54 = vcombine.low %v3859_v22, %v3875_v36 }
 0x805   : > { %v8690_v4 = vpop.permute.xlu1 %4464  ;;  %v8692_v10 = vpop.permute.xlu0 %4916  ;;  %v9913_v46 = vcombine.high %v8428_v21, %v8411_v37  ;;  %v9914_v47 = vcombine.low %v8428_v21, %v8411_v37  ;;  %v3578_v36 = vcombine.low %v8593_v62, %v8596_v61  ;;  %v3646_v21 = vcombine.low %v8573_v0, %v8576_v48 }
 0x806   : > { %9910 = vst [vmem:[#allocation10_spill] sm:$0xff] %v8679_v55  ;;  %9912 = vst [vmem:[#allocation9_spill] sm:$0xff] %v8692_v10  ;;  %v6030_v5 = vpack.i.bf16 %v8679_v55, %v8674_v57  ;;  %v6010_v41 = vpack.i.bf16 %v8688_v35, %v8685_v50  ;;  %v3825_v10 = vcombine.high %v3791_v33, %v3807_v32 }
 0x807   : > { %v8708_v51 = vrot.slane %v9913_v46, %v6563_v38  ;;  %v8716_v27 = vrot.slane %v9914_v47, %v6563_v38  ;;  %v8732_v37 = vrot.slane %v3892_v54, %v6563_v38  ;;  %v3663_v62 = vcombine.high %v8615_v7, %v8610_v34 }
 0x808   : > { %6031 = vrot.lane.b32.xlu1 %v6030_v5, %s6380_s14  ;;  %6011 = vrot.lane.b32.xlu0 %v6010_v41, %s6379_s12  ;;  %v8729_v41 = vrot.slane %v3893_v2, %v6563_v38  ;;  %v9915_v61 = vcombine.high %v8268_v19, %v8271_v1  ;;  %v9916_v2 = vcombine.low %v8268_v19, %v8271_v1 }
 0x809   : > { %v8720_v22 = vpop.permute.xlu1 %4920  ;;  %v8722_v55 = vpop.permute.xlu0 %4924  ;;  %v6035_v46 = vpack.i.bf16 %v8708_v51, %v8695_v39  ;;  %v6015_v5 = vpack.i.bf16 %v8716_v27, %v8698_v26  ;;  %v8753_v0 = vrot.slane %v3578_v36, %v6563_v38  ;;  %v3876_v7 = vcombine.low %v8618_v11, %v8621_v52 }
 0x80a   : > { %v8744_v33 = vrot.slane %v9915_v61, %v6563_v38  ;;  %v8750_v32 = vrot.slane %v9916_v2, %v6563_v38  ;;  %v8766_v19 = vrot.slane %v3825_v10, %v6563_v38  ;;  %v8769_v1 = vrot.slane %v3646_v21, %v6563_v38 }
 0x80b   : > { %9917 = vst [vmem:[#allocation13_spill] sm:$0xff] %v8753_v0  ;;  %v3808_v36 = vcombine.low %v8653_v25, %v8657_v8  ;;  %v9919_v11 = vcombine.high %v8436_v9, %v8441_v42  ;;  %v9920_v10 = vcombine.low %v8375_v23, %v8378_v60  ;;  %v9922_v8 = vcombine.high %v8394_v56, %v8402_v43 }
 0x80c   : > { %6036 = vrot.lane.b32.xlu1 %v6035_v46, %s6385_s26  ;;  %6016 = vrot.lane.b32.xlu0 %v6015_v5, %s6380_s14  ;;  %v6040_v54 = vpack.i.bf16 %v8729_v41, %v8744_v33  ;;  %v6020_v47 = vpack.i.bf16 %v8732_v37, %v8750_v32  ;;  %9918 = vst [vmem:[#allocation11_spill] sm:$0xff] %v8769_v1 }
 0x80d   : > { %v8755_v48 = vpop.permute.xlu1 %4928  ;;  %v8757_v34 = vpop.permute.xlu0 %4450  ;;  %v3677_v46 = vrot.slane %v3663_v62, %v6563_v38  ;;  %v8780_v52 = vrot.slane %v9919_v11, %v6563_v38  ;;  %v8786_v5 = vrot.slane %v9920_v10, %v6563_v38  ;;  %v4145_v62 = vrot.slane %v9922_v8, %v6563_v38 }
 0x80e   : > { %v9923_v9 = vcombine.low %v8391_v31, %v8399_v15  ;;  %v8803_v61 = vrot.slane %v3876_v7, %v6563_v38  ;;  %v3610_v60 = vcombine.high %v8753_v0, %v9878_v49  ;;  %v8810_v2 = vrot.slane %v3808_v36, %v6563_v38 }
 0x80f   : > { %9921 = vst [vmem:[#allocation17_spill] sm:$0xff] %v8786_v5  ;;  %v6045_v23 = vpack.i.bf16 %v8766_v19, %v8780_v52  ;;  %v6025_v56 = vpack.i.bf16 %v4145_v62, %v3677_v46  ;;  %v3678_v43 = vcombine.high %v8769_v1, %v9878_v49  ;;  %v4078_v31 = vcombine.high %v8786_v5, %v9878_v49 }
 0x810   : > { %6041 = vrot.lane.b32.xlu1 %v6040_v54, %s6385_s26  ;;  %6021 = vrot.lane.b32.xlu0 %v6020_v47, %s6380_s14  ;;  %v8800_v42 = vrot.slane %v9923_v9, %v6563_v38  ;;  %9925 = vst [vmem:[#allocation18_spill] sm:$0xff] %v8803_v61  ;;  %9926 = vst [vmem:[#allocation20_spill] sm:$0xff] %v8810_v2  ;;  %v9927_v15 = vcombine.low %v8262_v16, %v8265_v45 }
 0x811   : > { %v8788_v21 = vpop.permute.xlu1 %4454  ;;  %v8790_v25 = vpop.permute.xlu0 %4458  ;;  %v9929_v11 = vcombine.low %v8455_v59, %v8458_v63  ;;  %v6055_v8 = vpack.i.bf16 %v4078_v31, %v3610_v60  ;;  %v3908_v16 = vcombine.high %v8803_v61, %v9878_v49  ;;  %v3840_v9 = vcombine.high %v8810_v2, %v9878_v49 }
 0x812   : > { %9924 = vst [vmem:[#allocation19_spill] sm:$0xff] %v8800_v42  ;;  %v8821_v7 = vrot.slane %v9927_v15, %v6563_v38  ;;  %v4146_v36 = vcombine.high %v8800_v42, %v9878_v49  ;;  %v3611_v15 = vcombine.high %v8601_v40, %v9878_v49  ;;  %v4708_v40 = vcombine.low %v8510_v13, %v8521_v20 }
 0x813   : > { %v8834_v10 = vrot.slane %v9929_v11, %v6563_v38  ;;  %v4147_v11 = vcombine.high %v8587_v14, %v9878_v49  ;;  %v3910_v14 = vcombine.high %v8732_v37, %v9878_v49 }
 0x814   : > { %6046 = vrot.lane.b32.xlu1 %v6045_v23, %s6385_s26  ;;  %9928 = vst [vmem:[#allocation22_spill] sm:$0xff] %v8821_v7  ;;  %6026 = vrot.lane.b32.xlu0 %v6025_v56, %s6385_s26  ;;  %v6050_v45 = vpack.i.bf16 %v4146_v36, %v3678_v43  ;;  %v3440_v23 = vcombine.high %v8821_v7, %v9878_v49  ;;  %v9937_v7 = vld [vmem:[#allocation16_spill] sm:$0xff] }
 0x815   : > { %v8824_v54 = vpop.permute.xlu1 %4462  ;;  %v8826_v47 = vpop.permute.xlu0 %4914  ;;  %9930 = vst [vmem:[#allocation21_spill] sm:$0xff] %v8834_v10  ;;  %v3372_v63 = vcombine.high %v8834_v10, %v9878_v49  ;;  %v3679_v43 = vcombine.high %v8581_v24, %v9878_v49  ;;  %v4724_v36 = vcombine.low %v8526_v44, %v8536_v58  ;;  %v4079_v24 = vcombine.high %v8607_v6, %v9878_v49 }
 0x816   : > { %v6060_v60 = vpack.i.bf16 %v3908_v16, %v3440_v23 }
 0x817   : > { %v6070_v31 = vpack.i.bf16 %v3840_v9, %v3372_v63  ;;  %v3909_v9 = vcombine.high %v8635_v53, %v9878_v49  ;;  %v6075_v23 = vpack.i.bf16 %v4079_v24, %v3611_v15  ;;  %v8873_v63 = vrot.slane %v4724_v36, %v6555_v18 }
 0x818   : > { %6056 = vrot.lane.b32.xlu1 %v6055_v8, %s6382_s16  ;;  %6051 = vrot.lane.b32.xlu0 %v6050_v45, %s6382_s16  ;;  %v6065_v45 = vpack.i.bf16 %v4147_v11, %v3679_v43  ;;  %v3442_v53 = vcombine.high %v8750_v32, %v9878_v49  ;;  %v3680_v15 = vcombine.high %v8641_v12, %v9878_v49 }
 0x819   : > { %v8844_v56 = vpop.permute.xlu1 %4918  ;;  %v8846_v59 = vpop.permute.xlu0 %4922  ;;  %v3681_v11 = vcombine.high %v3677_v46, %v9878_v49  ;;  %v4149_v24 = vcombine.high %v4145_v62, %v9878_v49  ;;  %v3373_v32 = vcombine.high %v8685_v50, %v9878_v49  ;;  %v4080_v50 = vcombine.high %v8716_v27, %v9878_v49  ;;  %v9932_v27 = vld [vmem:[#allocation10_spill] sm:$0xff] }
 0x81a   : > { %v6100_v36 = vpack.i.bf16 %v3910_v14, %v3442_v53  ;;  %v8922_v53 = vcombine.high %v8729_v41, %v9878_v49  ;;  %v3842_v10 = vcombine.high %v9932_v27, %v9878_v49  ;;  %v8938_v41 = vcombine.high %v8744_v33, %v9878_v49 }
 0x81c   : > { %6061 = vrot.lane.b32.xlu1 %v6060_v60, %s6382_s16  ;;  %6071 = vrot.lane.b32.xlu0 %v6070_v31, %s6382_s16  ;;  %v3441_v60 = vcombine.high %v8632_v30, %v9878_v49  ;;  %v8886_v31 = vrot.slane %v4708_v40, %v6555_v18  ;;  %v4148_v30 = vcombine.high %v8650_v29, %v9878_v49 }
 0x81d   : > { %v8860_v8 = vpop.permute.xlu1 %4926  ;;  %v8862_v16 = vpop.permute.xlu0 %4222  ;;  %v3374_v40 = vcombine.high %v8674_v57, %v9878_v49  ;;  %v5022_v29 = vcombine.low %v8720_v22, %v8755_v48  ;;  %v3613_v57 = vcombine.high %v8695_v39, %v9878_v49  ;;  %v4081_v39 = vcombine.high %v8708_v51, %v9878_v49 }
 0x81e   : > { %v6080_v37 = vpack.i.bf16 %v3909_v9, %v3441_v60  ;;  %v4741_v12 = vcombine.high %v8886_v31, %v8873_v63  ;;  %v3612_v9 = vcombine.high %v8698_v26, %v9878_v49  ;;  %v6085_v14 = vpack.i.bf16 %v4148_v30, %v3680_v15 }
 0x81f   : > { %v3841_v60 = vcombine.high %v8688_v35, %v9878_v49  ;;  %v3375_v35 = vcombine.high %v8780_v52, %v9878_v49  ;;  %v8944_v30 = vrot.slane %v5022_v29, %v6555_v18  ;;  %v3843_v52 = vcombine.high %v8766_v19, %v9878_v49 }
 0x820   : > { %6066 = vrot.lane.b32.xlu1 %v6065_v45, %s6383_s25  ;;  %6076 = vrot.lane.b32.xlu0 %v6075_v23, %s6383_s25  ;;  %v4558_v45 = vcombine.low %v8661_v17, %v8690_v4  ;;  %v4542_v23 = vcombine.low %v8638_v3, %v8663_v28  ;;  %v8941_v15 = vrot.slane %v4741_v12, %v6563_v38 }
 0x821   : > { %v8879_v6 = vpop.permute.xlu1 %4226  ;;  %v8881_v43 = vpop.permute.xlu0 %4230  ;;  %v4955_v12 = vcombine.high %v8844_v56, %v8860_v8  ;;  %v6120_v29 = vpack.i.bf16 %v8922_v53, %v8938_v41  ;;  %v6110_v19 = vpack.i.bf16 %v3842_v10, %v3374_v40  ;;  %v4490_v10 = vcombine.low %v8788_v21, %v8824_v54 }
 0x822   : > { %v8931_v2 = vrot.slane %v4558_v45, %v6555_v18  ;;  %v6115_v45 = vpack.i.bf16 %v4081_v39, %v3613_v57  ;;  %v8954_v33 = vrot.slane %v4542_v23, %v6555_v18  ;;  %v4559_v57 = vcombine.high %v8661_v17, %v8690_v4 }
 0x823   : > { %v4938_v4 = vcombine.low %v8826_v47, %v8846_v59  ;;  %v8988_v40 = vrot.slane %v4955_v12, %v6555_v18  ;;  %v4313_v41 = vcombine.high %v8862_v16, %v8881_v43  ;;  %v4312_v12 = vcombine.low %v8862_v16, %v8881_v43 }
 0x824   : > { %6081 = vrot.lane.b32.xlu1 %v6080_v37, %s6383_s25  ;;  %6101 = vrot.lane.b32.xlu0 %v6100_v36, %s6386_s28  ;;  %v9931_v37 = vld [vmem:[#allocation9_spill] sm:$0xff]  ;;  %v6105_v36 = vpack.i.bf16 %v4149_v24, %v3681_v11  ;;  %v6095_v24 = vpack.i.bf16 %v4080_v50, %v3612_v9  ;;  %v4491_v9 = vcombine.high %v8788_v21, %v8824_v54 }
 0x825   : > { %v8906_v46 = vpop.permute.xlu1 %4234  ;;  %v8908_v62 = vpop.permute.xlu0 %4220  ;;  %v5006_v26 = vcombine.low %v9931_v37, %v8722_v55  ;;  %v4954_v50 = vcombine.low %v8844_v56, %v8860_v8  ;;  %v4575_v23 = vcombine.high %v8954_v33, %v8931_v2  ;;  %v6125_v56 = vpack.i.bf16 %v3843_v52, %v3375_v35 }
 0x826   : > { %v4475_v8 = vcombine.high %v8757_v34, %v8790_v25  ;;  %v4474_v54 = vcombine.low %v8757_v34, %v8790_v25  ;;  %v4328_v27 = vcombine.low %v8879_v6, %v8906_v46  ;;  %v5023_v25 = vcombine.high %v8720_v22, %v8755_v48 }
 0x828   : > { %6086 = vrot.lane.b32.xlu1 %v6085_v14, %s6386_s28  ;;  %6106 = vrot.lane.b32.xlu0 %v6105_v36, %s6384_s29  ;;  %v6090_v14 = vpack.i.bf16 %v3841_v60, %v3373_v32  ;;  %v8961_v36 = vrot.slane %v5006_v26, %v6555_v18  ;;  %v4939_v32 = vcombine.high %v8826_v47, %v8846_v59 }
 0x829   : > { %v8947_v51 = vpop.permute.xlu1 %4224  ;;  %v8949_v11 = vpop.permute.xlu0 %4228  ;;  %v4329_v26 = vcombine.high %v8879_v6, %v8906_v46  ;;  %v8997_v47 = vrot.slane %v4491_v9, %v6555_v18  ;;  %v9000_v59 = vrot.slane %v4954_v50, %v6555_v18  ;;  %v9021_v6 = vrot.slane %v4490_v10, %v6555_v18 }
 0x82a   : > { %v4244_v60 = vcombine.low %v8908_v62, %v8949_v11  ;;  %v5039_v53 = vcombine.high %v8961_v36, %v8944_v30  ;;  %v9007_v35 = vrot.slane %v4939_v32, %v6555_v18  ;;  %v9024_v46 = vrot.slane %v4938_v4, %v6555_v18 }
 0x82b   : > { %v9032_v9 = vrot.slane %v4475_v8, %v6555_v18  ;;  %v9037_v22 = vrot.slane %v4329_v26, %v6555_v18  ;;  %v9045_v16 = vrot.slane %v4474_v54, %v6555_v18  ;;  %v4543_v10 = vcombine.high %v8638_v3, %v8663_v28 }
 0x82c   : > { %6091 = vrot.lane.b32.xlu1 %v6090_v14, %s6383_s25  ;;  %6111 = vrot.lane.b32.xlu0 %v6110_v19, %s6386_s28  ;;  %v9012_v52 = vrot.slane %v4244_v60, %v6555_v18  ;;  %v9042_v50 = vrot.slane %v5039_v53, %v6563_v38  ;;  %v4971_v43 = vcombine.high %v9024_v46, %v9000_v59 }
 0x82d   : > { %v8983_v17 = vpop.permute.xlu1 %4232  ;;  %v9004_v39 = vpop.permute.xlu0 %5146  ;;  %v5007_v19 = vcombine.high %v9931_v37, %v8722_v55  ;;  %v4522_v32 = vcombine.low %v9032_v9, %v8997_v47  ;;  %v4327_v60 = vrot.slane %v4313_v41, %v6555_v18  ;;  %v4507_v4 = vcombine.high %v9045_v16, %v9021_v6 }
 0x82e   : > { %v4260_v21 = vcombine.low %v8947_v51, %v8983_v17  ;;  %v9066_v8 = vrot.slane %v4312_v12, %v6555_v18  ;;  %v9074_v26 = vrot.slane %v4575_v23, %v6563_v38  ;;  %v9084_v54 = vrot.slane %v4971_v43, %v6563_v38 }
 0x82f   : > { %v4360_v3 = vcombine.low %v4327_v60, %v9037_v22  ;;  %v4261_v23 = vcombine.high %v8947_v51, %v8983_v17  ;;  %v4573_v41 = vrot.slane %v4559_v57, %v6555_v18  ;;  %v9095_v12 = vrot.slane %v4522_v32, %v6563_v38 }
 0x830   : > { %v9015_v34 = vrot.slane %v4260_v21, %v6555_v18  ;;  %6096 = vrot.lane.b32.xlu1 %v6095_v24, %s6386_s28  ;;  %6116 = vrot.lane.b32.xlu0 %v6115_v45, %s6384_s29  ;;  %v4986_v24 = vcombine.low %v9007_v35, %v8988_v40  ;;  %v9050_v45 = vrot.slane %v4328_v27, %v6555_v18 }
 0x831   : > { %v9029_v14 = vpop.permute.xlu1 %5150  ;;  %v9068_v55 = vpop.permute.xlu0 %5154  ;;  %v6130_v27 = vpack.i.bf16 %v9042_v50, %v9074_v26  ;;  %v9103_v51 = vrot.slane %v4507_v4, %v6563_v38  ;;  %v4245_v17 = vcombine.high %v8908_v62, %v8949_v11  ;;  %v4557_v43 = vrot.slane %v4543_v10, %v6555_v18  ;;  %v9933_v10 = vld [vmem:[#allocation12_spill] sm:$0xff] }
 0x832   : > { %v4277_v48 = vcombine.high %v9012_v52, %v9015_v34  ;;  %v9078_v21 = vrot.slane %v4986_v24, %v6563_v38  ;;  %v4709_v24 = vcombine.high %v8510_v13, %v8521_v20  ;;  %v9112_v32 = vrot.slane %v4360_v3, %v6563_v38  ;;  %v9934_v3 = vld [vmem:[#allocation14_spill] sm:$0xff] }
 0x833   : > { %v6135_v11 = vpack.i.bf16 %v9084_v54, %v9103_v51  ;;  %v4591_v4 = vcombine.high %v4557_v43, %v4573_v41  ;;  %v4361_v5 = vcombine.high %v4327_v60, %v9037_v22 }
 0x834   : > { %v9058_v53 = vrot.slane %v4277_v48, %v6563_v38  ;;  %6126 = vrot.lane.b32.xlu1 %v6125_v56, %s6384_s29  ;;  %6121 = vrot.lane.b32.xlu0 %v6120_v29, %s6384_s29  ;;  %v5037_v56 = vrot.slane %v5023_v25, %v6555_v18  ;;  %v4345_v29 = vcombine.high %v9066_v8, %v9050_v45 }
 0x835   : > { %v9071_v37 = vpop.permute.xlu1 %5158  ;;  %v5021_v25 = vrot.slane %v5007_v19, %v6555_v18  ;;  %v4725_v48 = vcombine.high %v8526_v44, %v8536_v58  ;;  %v6155_v13 = vpack.i.bf16 %v9078_v21, %v9095_v12  ;;  %v4275_v58 = vrot.slane %v4261_v23, %v6555_v18  ;;  %v9120_v62 = vpop.permute.xlu0 %5144  ;;  %v9936_v23 = vld [vmem:[#allocation15_spill] sm:$0xff] }
 0x836   : > { %v6150_v28 = vpack.i.bf16 %v8941_v15, %v9058_v53  ;;  %v9117_v44 = vrot.slane %v4345_v29, %v6563_v38  ;;  %v4590_v29 = vcombine.low %v4557_v43, %v4573_v41  ;;  %v9938_v61 = vcombine.high %v9936_v23, %v9937_v7 }
 0x837   : > { %v5055_v19 = vcombine.high %v5021_v25, %v5037_v56  ;;  %v5054_v20 = vcombine.low %v5021_v25, %v5037_v56  ;;  %v4739_v56 = vrot.slane %v4725_v48, %v6555_v18  ;;  %v4259_v25 = vrot.slane %v4245_v17, %v6555_v18 }
 0x838   : > { %6151 = vrot.lane.b32.xlu1 %v6150_v28, %s6379_s12  ;;  %6131 = vrot.lane.b32.xlu0 %v6130_v27, %s6379_s12  ;;  %v9935_v28 = vcombine.low %v9933_v10, %v9934_v3  ;;  %v9138_v0 = vrot.slane %v9938_v61, %v6563_v38  ;;  %v4723_v41 = vrot.slane %v4709_v24, %v6555_v18 }
 0x839   : > { %v9108_v57 = vpop.permute.xlu1 %5148  ;;  %v9148_v48 = vrot.slane %v5054_v20, %v6563_v38  ;;  %v4292_v17 = vcombine.low %v4259_v25, %v4275_v58  ;;  %v9154_v61 = vrot.slane %v4591_v4, %v6563_v38  ;;  %v9158_v22 = vrot.slane %v4590_v29, %v6563_v38 }
 0x83a   : > { %v9129_v27 = vrot.slane %v9935_v28, %v6563_v38  ;;  %v4756_v60 = vcombine.low %v4723_v41, %v4739_v56  ;;  %v9161_v24 = vrot.slane %v4361_v5, %v6563_v38  ;;  %v4293_v20 = vcombine.high %v4259_v25, %v4275_v58 }
 0x83b   : > { %9940 = vst [vmem:[#allocation9_spill] sm:$0xff] %v9154_v61  ;;  %v4987_v4 = vcombine.high %v9007_v35, %v8988_v40  ;;  %v5252_v29 = vcombine.low %v9029_v14, %v9071_v37  ;;  %v9941_v58 = vcombine.high %v9933_v10, %v9934_v3  ;;  %v4757_v40 = vcombine.high %v4723_v41, %v4739_v56 }
 0x83c   : > { %6156 = vrot.lane.b32.xlu1 %v6155_v13, %s6380_s14  ;;  %6136 = vrot.lane.b32.xlu0 %v6135_v11, %s6379_s12  ;;  %v9141_v13 = vrot.slane %v5055_v19, %v6563_v38  ;;  %v6160_v28 = vpack.i.bf16 %v9129_v27, %v9112_v32  ;;  %v6140_v11 = vpack.i.bf16 %v9138_v0, %v9117_v44  ;;  %v5153_v19 = vpop.permute.xlu0 %5152 }
 0x83d   : > { %v5157_v43 = vpop.permute.xlu1 %5156  ;;  %v5168_v5 = vcombine.low %v9120_v62, %v5153_v19  ;;  %v9181_v25 = vrot.slane %v9941_v58, %v6563_v38  ;;  %v4523_v35 = vcombine.high %v9032_v9, %v8997_v47  ;;  %v9201_v47 = vrot.slane %v4987_v4, %v6563_v38 }
 0x83e   : > { %9939 = vst [vmem:[#allocation23_spill] sm:$0xff] %v9141_v13  ;;  %v5184_v1 = vcombine.low %v9108_v57, %v5157_v43  ;;  %v6165_v42 = vpack.i.bf16 %v9141_v13, %v9154_v61  ;;  %v9189_v61 = vrot.slane %v4756_v60, %v6563_v38  ;;  %v5185_v13 = vcombine.high %v9108_v57, %v5157_v43 }
 0x83f   : > { %v6180_v3 = vpack.i.bf16 %v9181_v25, %v9161_v24  ;;  %v5253_v9 = vcombine.high %v9029_v14, %v9071_v37  ;;  %v9206_v56 = vrot.slane %v5252_v29, %v6555_v18  ;;  %v5169_v57 = vcombine.high %v9120_v62, %v5153_v19 }
 0x840   : > { %6161 = vrot.lane.b32.xlu1 %v6160_v28, %s6380_s14  ;;  %6141 = vrot.lane.b32.xlu0 %v6140_v11, %s6379_s12  ;;  %v9169_v28 = vrot.slane %v4292_v17, %v6563_v38  ;;  %v6145_v11 = vpack.i.bf16 %v9148_v48, %v9158_v22  ;;  %v5236_v17 = vcombine.low %v9004_v39, %v9068_v55 }
 0x841   : > { %v9196_v10 = vrot.slane %v5184_v1, %v6555_v18  ;;  %v9212_v1 = vrot.slane %v5168_v5, %v6555_v18  ;;  %v9216_v43 = vrot.slane %v4757_v40, %v6563_v38  ;;  %v9219_v60 = vrot.slane %v4523_v35, %v6563_v38 }
 0x842   : > { %v6170_v41 = vpack.i.bf16 %v9189_v61, %v9169_v28  ;;  %v5237_v14 = vcombine.high %v9004_v39, %v9068_v55  ;;  %v9224_v37 = vrot.slane %v5236_v17, %v6555_v18  ;;  %v5199_v62 = vrot.slane %v5185_v13, %v6555_v18 }
 0x843   : > { %v5201_v19 = vcombine.high %v9212_v1, %v9196_v10  ;;  %v5267_v4 = vrot.slane %v5253_v9, %v6555_v18  ;;  %v6175_v39 = vpack.i.bf16 %v9201_v47, %v9219_v60  ;;  %v5183_v55 = vrot.slane %v5169_v57, %v6555_v18 }
 0x844   : > { %6166 = vrot.lane.b32.xlu1 %v6165_v42, %s6385_s26  ;;  %6146 = vrot.lane.b32.xlu0 %v6145_v11, %s6380_s14  ;;  %v9192_v42 = vrot.slane %v4293_v20, %v6563_v38  ;;  %v5269_v29 = vcombine.high %v9224_v37, %v9206_v56  ;;  %v5251_v13 = vrot.slane %v5237_v14, %v6555_v18 }
 0x845   : > { %v4970_v11 = vcombine.low %v9024_v46, %v9000_v59  ;;  %v5216_v5 = vcombine.low %v5183_v55, %v5199_v62  ;;  %v9244_v58 = vrot.slane %v5201_v19, %v6563_v38  ;;  %v5038_v40 = vcombine.low %v8961_v36, %v8944_v30 }
 0x846   : > { %v6185_v20 = vpack.i.bf16 %v9216_v43, %v9192_v42  ;;  %v5284_v35 = vcombine.low %v5251_v13, %v5267_v4  ;;  %v9249_v17 = vrot.slane %v5269_v29, %v6563_v38  ;;  %v4574_v18 = vcombine.low %v8954_v33, %v8931_v2 }
 0x847   : > { %v9260_v59 = vrot.slane %v4970_v11, %v6563_v38  ;;  %v4344_v30 = vcombine.low %v9066_v8, %v9050_v45  ;;  %v5217_v36 = vcombine.high %v5183_v55, %v5199_v62  ;;  %v9265_v46 = vrot.slane %v5216_v5, %v6563_v38 }
 0x848   : > { %6181 = vrot.lane.b32.xlu1 %v6180_v3, %s6385_s26  ;;  %6171 = vrot.lane.b32.xlu0 %v6170_v41, %s6380_s14  ;;  %v4506_v3 = vcombine.low %v9045_v16, %v9021_v6  ;;  %v9268_v6 = vrot.slane %v5038_v40, %v6563_v38  ;;  %v5285_v16 = vcombine.high %v5251_v13, %v5267_v4 }
 0x849   : > { %v9271_v9 = vrot.slane %v5284_v35, %v6563_v38  ;;  %v9279_v33 = vrot.slane %v4574_v18, %v6563_v38  ;;  %v9284_v45 = vrot.slane %v4344_v30, %v6563_v38  ;;  %v9287_v8 = vrot.slane %v5217_v36, %v6563_v38 }
 0x84a   : > { %v9274_v2 = vrot.slane %v4506_v3, %v6563_v38  ;;  %v5002_v41 = vcombine.high %v9260_v59, %v9878_v49  ;;  %v9292_v57 = vrot.slane %v5285_v16, %v6563_v38  ;;  %v5070_v14 = vcombine.high %v9268_v6, %v9878_v49 }
 0x84b   : > { %v9942_v19 = vcombine.low %v9936_v23, %v9937_v7  ;;  %v4606_v4 = vcombine.high %v9279_v33, %v9878_v49  ;;  %v4276_v29 = vcombine.low %v9012_v52, %v9015_v34  ;;  %v4376_v55 = vcombine.high %v9284_v45, %v9878_v49 }
 0x84c   : > { %6186 = vrot.lane.b32.xlu1 %v6185_v20, %s6385_s26  ;;  %6176 = vrot.lane.b32.xlu0 %v6175_v39, %s6385_s26  ;;  %v4538_v62 = vcombine.high %v9274_v2, %v9878_v49  ;;  %v4377_v11 = vcombine.high %v9117_v44, %v9878_v49  ;;  %v4740_v7 = vcombine.low %v8886_v31, %v8873_v63 }
 0x84d   : > { %v9304_v20 = vrot.slane %v9942_v19, %v6563_v38  ;;  %v6190_v13 = vpack.i.bf16 %v5070_v14, %v4606_v4  ;;  %v4841_v52 = vcombine.high %v9138_v0, %v9878_v49  ;;  %v9325_v34 = vrot.slane %v4276_v29, %v6563_v38 }
 0x84e   : > { %v6195_v39 = vpack.i.bf16 %v5002_v41, %v4538_v62  ;;  %v5071_v44 = vcombine.high %v9042_v50, %v9878_v49  ;;  %v5072_v63 = vcombine.high %v9148_v48, %v9878_v49  ;;  %v4607_v31 = vcombine.high %v9074_v26, %v9878_v49 }
 0x84f   : > { %v4840_v23 = vcombine.high %v9304_v20, %v9878_v49  ;;  %v6220_v40 = vpack.i.bf16 %v4841_v52, %v4377_v11  ;;  %v9335_v35 = vrot.slane %v4740_v7, %v6563_v38  ;;  %v4608_v0 = vcombine.high %v9158_v22, %v9878_v49 }
 0x850   : > { %5309 = vrot.lane.b32.xlu1 %v9244_v58, %s6379_s12  ;;  %5337 = vrot.lane.b32.xlu0 %v9249_v17, %s6379_s12  ;;  %v6205_v3 = vpack.i.bf16 %v5071_v44, %v4607_v31  ;;  %v4308_v50 = vcombine.high %v9325_v34, %v9878_v49  ;;  %v4309_v48 = vcombine.high %v9058_v53, %v9878_v49 }
 0x851   : > { %v6200_v5 = vpack.i.bf16 %v4840_v23, %v4376_v55  ;;  %v6225_v18 = vpack.i.bf16 %v5072_v63, %v4608_v0  ;;  %v4772_v26 = vcombine.high %v9335_v35, %v9878_v49  ;;  %v4773_v30 = vcombine.high %v8941_v15, %v9878_v49 }
 0x852   : > { %v5003_v22 = vcombine.high %v9084_v54, %v9878_v49  ;;  %v5004_v41 = vcombine.high %v9078_v21, %v9878_v49  ;;  %v4539_v53 = vcombine.high %v9103_v51, %v9878_v49  ;;  %v4540_v14 = vcombine.high %v9095_v12, %v9878_v49  ;;  %v9943_v12 = vld [vmem:[#allocation23_spill] sm:$0xff] }
 0x853   : > { %v6210_v36 = vpack.i.bf16 %v4772_v26, %v4308_v50  ;;  %v6230_v16 = vpack.i.bf16 %v4773_v30, %v4309_v48  ;;  %v4378_v15 = vcombine.high %v9112_v32, %v9878_v49  ;;  %v4310_v54 = vcombine.high %v9169_v28, %v9878_v49  ;;  %v9944_v28 = vld [vmem:[#allocation9_spill] sm:$0xff] }
 0x854   : > { %5317 = vrot.lane.b32.xlu1 %v9265_v46, %s6380_s14  ;;  %5345 = vrot.lane.b32.xlu0 %v9271_v9, %s6380_s14  ;;  %v6215_v62 = vpack.i.bf16 %v5003_v22, %v4539_v53  ;;  %v6235_v19 = vpack.i.bf16 %v5004_v41, %v4540_v14  ;;  %v4842_v21 = vcombine.high %v9129_v27, %v9878_v49 }
 0x855   : > { %v4774_v51 = vcombine.high %v9189_v61, %v9878_v49  ;;  %v5073_v29 = vcombine.high %v9943_v12, %v9878_v49  ;;  %v5005_v32 = vcombine.high %v9201_v47, %v9878_v49  ;;  %v4609_v55 = vcombine.high %v9944_v28, %v9878_v49 }
 0x856   : > { %v6240_v4 = vpack.i.bf16 %v4842_v21, %v4378_v15  ;;  %v4541_v27 = vcombine.high %v9219_v60, %v9878_v49  ;;  %v5200_v61 = vcombine.low %v9212_v1, %v9196_v10  ;;  %v4311_v47 = vcombine.high %v9192_v42, %v9878_v49 }
 0x857   : > { %v6245_v7 = vpack.i.bf16 %v5073_v29, %v4609_v55  ;;  %v5268_v23 = vcombine.low %v9224_v37, %v9206_v56  ;;  %v4775_v10 = vcombine.high %v9216_v43, %v9878_v49  ;;  %v4843_v1 = vcombine.high %v9181_v25, %v9878_v49 }
 0x858   : > { %5325 = vrot.lane.b32.xlu1 %v9287_v8, %s6385_s26  ;;  %5353 = vrot.lane.b32.xlu0 %v9292_v57, %s6385_s26  ;;  %v6255_v52 = vpack.i.bf16 %v5005_v32, %v4541_v27  ;;  %v9399_v60 = vrot.slane %v5200_v61, %v6563_v38  ;;  %v5233_v0 = vcombine.high %v9244_v58, %v9878_v49  ;;  %s240_s26 = scalar_lea.vmem [#allocation6], %s5613_s17 }
 0x859   : > { %v6265_v37 = vpack.i.bf16 %v4775_v10, %v4311_v47  ;;  %v5234_v48 = vcombine.high %v9265_v46, %v9878_v49  ;;  %v5302_v26 = vcombine.high %v9271_v9, %v9878_v49  ;;  %v5407_v9 = vld [vmem:[%s9812_s4] sm:$0xf] }
 0x85a   : > { %v5232_v25 = vcombine.high %v9399_v60, %v9878_v49 }
 0x85c   : > { %6196 = vrot.lane.b32.xlu1 %v6195_v39, %s6382_s16  ;;  %6191 = vrot.lane.b32.xlu0 %v6190_v13, %s6382_s16  ;;  %v6250_v39 = vpack.i.bf16 %v4774_v51, %v4310_v54 }
 0x85d   : > { %v9382_v13 = vpop.permute.xlu0 %5991 }
 0x85e   : > { %v5993_v41 = vunpack.i.l.bf16 %v9382_v13 }
 0x860   : > { %6201 = vrot.lane.b32.xlu1 %v6200_v5, %s6382_s16  ;;  %6221 = vrot.lane.b32.xlu0 %v6220_v40, %s6383_s25  ;;  %v4379_v5 = vcombine.high %v9161_v24, %v9878_v49  ;;  %v9406_v24 = vrot.slane %v5268_v23, %v6563_v38 }
 0x862   : > { %v6260_v44 = vpack.i.bf16 %v4843_v1, %v4379_v5  ;;  %v5300_v63 = vcombine.high %v9406_v24, %v9878_v49 }
 0x864   : > { %6206 = vrot.lane.b32.xlu1 %v6205_v3, %s6383_s25  ;;  %6226 = vrot.lane.b32.xlu0 %v6225_v18, %s6386_s28  ;;  %v5301_v3 = vcombine.high %v9249_v17, %v9878_v49  ;;  %v5235_v17 = vcombine.high %v9287_v8, %v9878_v49 }
 0x868   : > { %6211 = vrot.lane.b32.xlu1 %v6210_v36, %s6382_s16  ;;  %6231 = vrot.lane.b32.xlu0 %v6230_v16, %s6383_s25  ;;  %v5303_v36 = vcombine.high %v9292_v57, %v9878_v49  ;;  %v5994_v16 = vunpack.i.h.bf16 %v9382_v13 }
 0x86a   : > { %v9401_v42 = vpop.permute.xlu0 %5996 }
 0x86b   : > { %v5999_v8 = vunpack.i.h.bf16 %v9401_v42  ;;  %v5998_v53 = vunpack.i.l.bf16 %v9401_v42 }
 0x86c   : > { %6216 = vrot.lane.b32.xlu1 %v6215_v62, %s6383_s25  ;;  %6236 = vrot.lane.b32.xlu0 %v6235_v19, %s6386_s28 }
 0x870   : > { %6241 = vrot.lane.b32.xlu1 %v6240_v4, %s6386_s28  ;;  %6251 = vrot.lane.b32.xlu0 %v6250_v39, %s6386_s28 }
 0x872   : > { %v9384_v11 = vpop.permute.xlu1 %6001 }
 0x873   : > { %v6004_v49 = vunpack.i.h.bf16 %v9384_v11  ;;  %v6003_v57 = vunpack.i.l.bf16 %v9384_v11 }
 0x874   : > { %6246 = vrot.lane.b32.xlu1 %v6245_v7, %s6384_s29  ;;  %6256 = vrot.lane.b32.xlu0 %v6255_v52, %s6384_s29 }
 0x876   : > { %v9403_v56 = vpop.permute.xlu1 %6006 }
 0x877   : > { %v6009_v62 = vunpack.i.h.bf16 %v9403_v56  ;;  %v6008_v15 = vunpack.i.l.bf16 %v9403_v56 }
 0x878   : > { %6266 = vrot.lane.b32.xlu1 %v6265_v37, %s6384_s29  ;;  %6261 = vrot.lane.b32.xlu0 %v6260_v44, %s6384_s29 }
 0x87a   : > { %v9410_v43 = vpop.permute.xlu1 %6031  ;;  %v9412_v40 = vpop.permute.xlu0 %6011 }
 0x87b   : > { %v6034_v19 = vunpack.i.h.bf16 %v9410_v43  ;;  %v6033_v54 = vunpack.i.l.bf16 %v9410_v43  ;;  %v6014_v51 = vunpack.i.h.bf16 %v9412_v40  ;;  %v6013_v4 = vunpack.i.l.bf16 %v9412_v40 }
 0x87c   : > { %5305 = vrot.lane.b32.xlu1 %v5232_v25, %s6382_s16  ;;  %5333 = vrot.lane.b32.xlu0 %v5300_v63, %s6382_s16  ;;  %v9945_v25 = vld [vmem:[#allocation19_spill] sm:$0xff] }
 0x87e   : > { %v9420_v38 = vpop.permute.xlu1 %6036  ;;  %v9422_v31 = vpop.permute.xlu0 %6016 }
 0x87f   : > { %v6038_v29 = vunpack.i.l.bf16 %v9420_v38  ;;  %v6019_v39 = vunpack.i.h.bf16 %v9422_v31  ;;  %v6018_v32 = vunpack.i.l.bf16 %v9422_v31 }
 0x880   : > { %5313 = vrot.lane.b32.xlu1 %v5233_v0, %s6383_s25  ;;  %5341 = vrot.lane.b32.xlu0 %v5301_v3, %s6383_s25  ;;  %v9946_v0 = vld [vmem:[#allocation11_spill] sm:$0xff] }
 0x882   : > { %v9430_v50 = vpop.permute.xlu1 %6041  ;;  %v9432_v18 = vpop.permute.xlu0 %6021 }
 0x883   : > { %v6044_v47 = vunpack.i.h.bf16 %v9430_v50  ;;  %v6043_v23 = vunpack.i.l.bf16 %v9430_v50  ;;  %v6024_v52 = vunpack.i.h.bf16 %v9432_v18  ;;  %v6023_v5 = vunpack.i.l.bf16 %v9432_v18 }
 0x884   : > { %5321 = vrot.lane.b32.xlu1 %v5234_v48, %s6386_s28  ;;  %5349 = vrot.lane.b32.xlu0 %v5302_v26, %s6386_s28  ;;  %s5536_s28 = sshll.u32 %s240_s26, 4  ;;  %s9766_s28 = int_to_ptr.vmem [resolvable:$true] %s5536_s28 }
 0x885   : > { %s6310_s11 = scalar_lea.vmem %s9766_s28, 128 }
 0x886   : > { %v9440_v58 = vpop.permute.xlu1 %6046  ;;  %v9444_v30 = vpop.permute.xlu0 %6026  ;;  %p6311_p6 = scmp.ne.s32.totalorder %s9766_s28, %s6310_s11 }
 0x887   : > { %v6029_v37 = vunpack.i.h.bf16 %v9444_v30  ;;  %v6028_v44 = vunpack.i.l.bf16 %v9444_v30  ;;  %v9962_v50 = vunpack.i.l.bf16 %v9440_v58 }
 0x888   : > { %5329 = vrot.lane.b32.xlu1 %v5235_v17, %s6384_s29  ;;  %5357 = vrot.lane.b32.xlu0 %v5303_v36, %s6384_s29  ;;  %v9947_v17 = vld [vmem:[#allocation17_spill] sm:$0xff]  ;;  %s5631_s29 = sshll.u32 %s6446_s22, 7  ;;  %p6312_p12 = pnand %p6311_p6, %p9987_p11 }
 0x889   : > { %v9948_v36 = vld [vmem:[#allocation13_spill] sm:$0xff]  ;;  %s9764_s9 = scalar_lea.hbm %s9813_s5, %s5631_s29  ;;  %s6394_s22 = smov [#allocation6]  }
 0x88a   : > { %v6057_v46 = vpop.permute.xlu1 %6056  ;;  %v6052_v22 = vpop.permute.xlu0 %6051  ;;  %p6313_p13 = pneg %p6312_p12  ;;  %s6314_s17 = sshll.u32 %s6394_s22, 4  ;;  %s6315_s17 = int_to_ptr.vmem [resolvable:$false] %s6314_s17 }
 0x88b   : > { %v6054_v28 = vunpack.i.h.bf16 %v6052_v22  ;;  %v6053_v55 = vunpack.i.l.bf16 %v6052_v22  ;;  %v6059_v27 = vunpack.i.h.bf16 %v6057_v46  ;;  %v6058_v61 = vunpack.i.l.bf16 %v6057_v46  ;;  %p6317_p7 = scmp.lt.s32.totalorder %s9766_s28, %s6315_s17 }
 0x88c   : > { %5410 = vperm.xlu0 %6270, %v5407_v9   ;;  %v9949_v9 = vld [vmem:[#allocation18_spill] sm:$0xff] }
 0x88d   : > { %v4213_v63 = vsel %vm891_vm9, %v9945_v25, %v6054_v28  ;;  %v3745_v3 = vsel %vm891_vm9, %v9946_v0, %v6053_v55  ;;  %v4206_v18 = vsel %vm891_vm9, %v9947_v17, %v6059_v27  ;;  %v3738_v46 = vsel %vm891_vm9, %v9948_v36, %v6058_v61 }
 0x88e   : > { %v6062_v14 = vpop.permute.xlu1 %6061  ;;  %v6072_v21 = vpop.permute.xlu0 %6071  ;;  %v4214_v0 = vsel %vm893_vm10, %v4213_v63, %v5994_v16  ;;  %v9955_v16 = vld [vmem:[#allocation20_spill] sm:$0xff]  ;;  %v9956_v63 = vld [vmem:[#allocation21_spill] sm:$0xff] }
 0x88f   : > { %v6064_v13 = vunpack.i.h.bf16 %v6062_v14  ;;  %v6063_v11 = vunpack.i.l.bf16 %v6062_v14  ;;  %v9950_v14 = vld [vmem:[#allocation22_spill] sm:$0xff]  ;;  %v6074_v42 = vunpack.i.h.bf16 %v6072_v21  ;;  %v6073_v28 = vunpack.i.l.bf16 %v6072_v21 }
 0x890   : > { %v4207_v21 = vsel %vm893_vm10, %v4206_v18, %v5999_v8 }
 0x891   : > { %v3975_v22 = vsel %vm891_vm9, %v9949_v9, %v6064_v13  ;;  %v3507_v30 = vsel %vm891_vm9, %v9950_v14, %v6063_v11  ;;  %v3739_v9 = vsel %vm893_vm10, %v3738_v46, %v5998_v53 }
 0x892   : > { %v6067_v7 = vpop.permute.xlu1 %6066  ;;  %v6077_v10 = vpop.permute.xlu0 %6076  ;;  %v3508_v13 = vsel %vm893_vm10, %v3507_v30, %v6003_v57  ;;  %v3976_v11 = vsel %vm893_vm10, %v3975_v22, %v6004_v49 }
 0x893   : > { %v6069_v48 = vunpack.i.h.bf16 %v6067_v7  ;;  %v6068_v26 = vunpack.i.l.bf16 %v6067_v7  ;;  %v3746_v7 = vsel %vm893_vm10, %v3745_v3, %v5993_v41  ;;  %v6079_v27 = vunpack.i.h.bf16 %v6077_v10 }
 0x894   : > { %v6078_v17 = vunpack.i.l.bf16 %v6077_v10  ;;  %v3968_v10 = vsel %vm891_vm9, %v9955_v16, %v6074_v42 }
 0x895   : > { %v3747_v61 = vsel %vm9951_vm0, %v3746_v7, %v6068_v26  ;;  %v4215_v36 = vsel %vm9952_vm1, %v4214_v0, %v6069_v48  ;;  %v3500_v26 = vsel %vm891_vm9, %v9956_v63, %v6073_v28  ;;  %v4208_v53 = vsel %vm9958_vm6, %v4207_v21, %v6079_v27  ;;  %vm9966_vm0 = vmmov %vm9964_vm2 }
 0x896   : > { %v6082_v1 = vpop.permute.xlu1 %6081  ;;  %v6102_v55 = vpop.permute.xlu0 %6101  ;;  %v3740_v49 = vsel %vm9957_vm5, %v3739_v9, %v6078_v17  ;;  %v3748_v8 = vsel %vm897_vm12, %v3747_v61, %v6008_v15  ;;  %v3501_v7 = vsel %vm893_vm10, %v3500_v26, %v6013_v4  ;;  %v3969_v56 = vsel %vm893_vm10, %v3968_v10, %v6014_v51  ;;  %vm9967_vm1 = vmmov %vm9966_vm0 }
 0x897   : > { %v6084_v25 = vunpack.i.h.bf16 %v6082_v1  ;;  %v6083_v12 = vunpack.i.l.bf16 %v6082_v1  ;;  %v6104_v30 = vunpack.i.h.bf16 %v6102_v55  ;;  %v6103_v28 = vunpack.i.l.bf16 %v6102_v55  ;;  %vm9969_vm5 = vmmov %vm9953_vm3 }
 0x898   : > { %v4209_v55 = vsel %vm897_vm12, %v4208_v53, %v6019_v39  ;;  %vm9970_vm6 = vmmov %vm9953_vm3 }
 0x899   : > { %v3509_v1 = vsel %vm9953_vm3, %v3508_v13, %v6083_v12  ;;  %v3977_v41 = vsel %vm9954_vm4, %v3976_v11, %v6084_v25  ;;  %v4216_v12 = vsel %vm897_vm12, %v4215_v36, %v6009_v62  ;;  %vm9968_vm4 = vmmov %vm9953_vm3 }
 0x89a   : > { %v6087_v3 = vpop.permute.xlu1 %6086  ;;  %v6107_v57 = vpop.permute.xlu0 %6106  ;;  %v3510_v18 = vsel %vm897_vm12, %v3509_v1, %v6023_v5  ;;  %v3978_v42 = vsel %vm897_vm12, %v3977_v41, %v6024_v52  ;;  %v3741_v52 = vsel %vm897_vm12, %v3740_v49, %v6018_v32 }
 0x89b   : > { %v6089_v48 = vunpack.i.h.bf16 %v6087_v3  ;;  %v6088_v14 = vunpack.i.l.bf16 %v6087_v3  ;;  %v3511_v0 = vsel %vm899_vm13, %v3510_v18, %v6103_v28  ;;  %v3979_v27 = vsel %vm899_vm13, %v3978_v42, %v6104_v30 }
 0x89c   : > { %v6109_v13 = vunpack.i.h.bf16 %v6107_v57  ;;  %v6108_v32 = vunpack.i.l.bf16 %v6107_v57  ;;  %v3512_v41 = vsel %vm901_vm14, %v3511_v0, %v6043_v23  ;;  %v3980_v43 = vsel %vm901_vm14, %v3979_v27, %v6044_v47 }
 0x89d   : > { %v3749_v46 = vsel %vm899_vm13, %v3748_v8, %v6088_v14  ;;  %v4217_v22 = vsel %vm899_vm13, %v4216_v12, %v6089_v48  ;;  %v9961_v23 = vunpack.i.h.bf16 %v9420_v38  ;;  %v9963_v57 = vunpack.i.h.bf16 %v9440_v58 }
 0x89e   : > { %v6092_v25 = vpop.permute.xlu1 %6091  ;;  %v6112_v5 = vpop.permute.xlu0 %6111  ;;  %v3750_v4 = vsel %vm901_vm14, %v3749_v46, %v6028_v44  ;;  %v4218_v40 = vsel %vm901_vm14, %v4217_v22, %v6029_v37 }
 0x89f   : > { %v6094_v62 = vunpack.i.h.bf16 %v6092_v25  ;;  %v6093_v15 = vunpack.i.l.bf16 %v6092_v25  ;;  %v6114_v61 = vunpack.i.h.bf16 %v6112_v5  ;;  %v6113_v36 = vunpack.i.l.bf16 %v6112_v5 }
 0x8a0   : > { %v3751_v3 = vsel %vm903_vm15, %v3750_v4, %v6108_v32 }
 0x8a1   : > { %v3502_v51 = vsel %vm9959_vm7, %v3501_v7, %v6093_v15  ;;  %v3970_v17 = vsel %vm9960_vm8, %v3969_v56, %v6094_v62  ;;  %v5377_v30 = vrot.slane %v3751_v3, 4  ;;  %vm9971_vm7 = vmmov %vm9953_vm3 }
 0x8a2   : > { %v3503_v31 = vsel %vm897_vm12, %v3502_v51, %v6033_v54  ;;  %v3971_v39 = vsel %vm897_vm12, %v3970_v17, %v6034_v19  ;;  %v6097_v11 = vpop.permute.xlu1 %6096  ;;  %v6117_v1 = vpop.permute.xlu0 %6116  ;;  %v4219_v19 = vsel %vm903_vm15, %v4218_v40, %v6109_v13  ;;  %vm9972_vm8 = vmmov %vm9953_vm3 }
 0x8a3   : > { %v3504_v44 = vsel %vm899_vm13, %v3503_v31, %v6113_v36  ;;  %v3972_v37 = vsel %vm899_vm13, %v3971_v39, %v6114_v61  ;;  %v6099_v9 = vunpack.i.h.bf16 %v6097_v11  ;;  %v6098_v21 = vunpack.i.l.bf16 %v6097_v11 }
 0x8a4   : > { %v6119_v10 = vunpack.i.h.bf16 %v6117_v1  ;;  %v6118_v63 = vunpack.i.l.bf16 %v6117_v1  ;;  %v3505_v47 = vsel %vm901_vm14, %v3504_v44, %v9962_v50  ;;  %v3973_v49 = vsel %vm901_vm14, %v3972_v37, %v9963_v57 }
 0x8a5   : > { %v3742_v54 = vsel %vm899_vm13, %v3741_v52, %v6098_v21  ;;  %v4210_v16 = vsel %vm899_vm13, %v4209_v55, %v6099_v9  ;;  %v5383_v28 = vrot.slane %v4219_v19, 4 }
 0x8a6   : > { %v3743_v26 = vsel %vm901_vm14, %v3742_v54, %v6038_v29  ;;  %v4211_v48 = vsel %vm901_vm14, %v4210_v16, %v9961_v23  ;;  %v6127_v14 = vpop.permute.xlu1 %6126  ;;  %v6122_v29 = vpop.permute.xlu0 %6121 }
 0x8a7   : > { %v3744_v53 = vsel %vm903_vm15, %v3743_v26, %v6118_v63  ;;  %v4212_v8 = vsel %vm903_vm15, %v4211_v48, %v6119_v10  ;;  %v6129_v12 = vunpack.i.h.bf16 %v6127_v14  ;;  %v6128_v18 = vunpack.i.l.bf16 %v6127_v14 }
 0x8a8   : > { %v5376_v42 = vrot.slane %v3744_v53, 4  ;;  %v5382_v38 = vrot.slane %v4212_v8, 4  ;;  %v6124_v46 = vunpack.i.h.bf16 %v6122_v29  ;;  %v6123_v22 = vunpack.i.l.bf16 %v6122_v29 }
 0x8a9   : > { %v3506_v25 = vsel %vm903_vm15, %v3505_v47, %v6128_v18  ;;  %v3974_v7 = vsel %vm903_vm15, %v3973_v49, %v6129_v12 }
 0x8aa   : > { %v9565_v58 = vpop.permute.xlu1 %6151  ;;  %v3513_v56 = vsel %vm903_vm15, %v3512_v41, %v6123_v22  ;;  %v3981_v62 = vsel %vm903_vm15, %v3980_v43, %v6124_v46  ;;  %v5398_v15 = vsel %vm9964_vm2, %v3506_v25, %v5376_v42  ;;  %v5400_v5 = vsel %vm9965_vm11, %v3974_v7, %v5382_v38  ;;  %v9571_v52 = vpop.permute.xlu0 %6131  ;;  %vm9973_vm2 = vmmov %vm9953_vm3 }
 0x8ab   : > { %v5399_v55 = vsel %vm9966_vm0, %v3513_v56, %v5377_v30  ;;  %v5401_v0 = vsel %vm9967_vm1, %v3981_v62, %v5383_v28  ;;  %v5642_v4 = vpack.c.bf16 %v5400_v5, %v5398_v15  ;;  %v6154_v19 = vunpack.i.h.bf16 %v9565_v58  ;;  %vm9974_vm11 = vmmov %vm9973_vm2 }
 0x8ac   : > { %v5640_v27 = vpack.c.bf16 %v5401_v0, %v5399_v55  ;;  %v6153_v54 = vunpack.i.l.bf16 %v9565_v58  ;;  %v6134_v16 = vunpack.i.h.bf16 %v9571_v52  ;;  %v6133_v10 = vunpack.i.l.bf16 %v9571_v52  ;;  %vm9975_vm1 = vmmov %vm9966_vm0 }
 0x8ae   : > { %5641 = vmatprep.subr.bf16.mxu1 %v5640_v27  ;;  %v9575_v40 = vpop.permute.xlu1 %6156  ;;  %v9577_v51 = vpop.permute.xlu0 %6136 }
 0x8af   : > { %5643 = vmatpush1.bf16.msra.mxu1 %v5642_v4  ;;  %v6159_v63 = vunpack.i.h.bf16 %v9575_v40  ;;  %v6158_v26 = vunpack.i.l.bf16 %v9575_v40  ;;  %v6139_v48 = vunpack.i.h.bf16 %v9577_v51  ;;  %v6138_v14 = vunpack.i.l.bf16 %v9577_v51 }
 0x8b2   : > { %v9579_v17 = vpop.permute.xlu1 %6161  ;;  %v9581_v61 = vpop.permute.xlu0 %6141 }
 0x8b3   : > { %v6164_v49 = vunpack.i.h.bf16 %v9579_v17  ;;  %v6163_v53 = vunpack.i.l.bf16 %v9579_v17  ;;  %v6144_v8 = vunpack.i.h.bf16 %v9581_v61  ;;  %v6143_v12 = vunpack.i.l.bf16 %v9581_v61 }
 0x8b6   : > { %v9583_v36 = vpop.permute.xlu1 %6166  ;;  %v9585_v13 = vpop.permute.xlu0 %6146 }
 0x8b7   : > { %v6169_v18 = vunpack.i.h.bf16 %v9583_v36  ;;  %v6168_v29 = vunpack.i.l.bf16 %v9583_v36  ;;  %v6149_v46 = vunpack.i.h.bf16 %v9585_v13  ;;  %v6148_v22 = vunpack.i.l.bf16 %v9585_v13 }
 0x8ba   : > { %v9587_v32 = vpop.permute.xlu1 %6181  ;;  %v9589_v31 = vpop.permute.xlu0 %6171 }
 0x8bb   : > { %v6184_v52 = vunpack.i.h.bf16 %v9587_v32  ;;  %v6183_v55 = vunpack.i.l.bf16 %v9587_v32  ;;  %v6174_v0 = vunpack.i.h.bf16 %v9589_v31  ;;  %v6173_v27 = vunpack.i.l.bf16 %v9589_v31 }
 0x8be   : > { %v9591_v39 = vpop.permute.xlu1 %6186  ;;  %v9593_v11 = vpop.permute.xlu0 %6176 }
 0x8bf   : > { %v6189_v4 = vunpack.i.h.bf16 %v9591_v39  ;;  %v6188_v51 = vunpack.i.l.bf16 %v9591_v39 }
 0x8c2   : > { %v9595_v44 = vpop.permute.xlu1 %5309  ;;  %v9597_v37 = vpop.permute.xlu0 %5337 }
 0x8c6   : > { %v9599_v9 = vpop.permute.xlu1 %5317  ;;  %v9601_v21 = vpop.permute.xlu0 %5345 }
 0x8ca   : > { %v9603_v1 = vpop.permute.xlu1 %5325  ;;  %v9605_v41 = vpop.permute.xlu0 %5353 }
 0x8ce   : > { %v6197_v3 = vpop.permute.xlu1 %6196  ;;  %v6192_v43 = vpop.permute.xlu0 %6191 }
 0x8cf   : > { %v6194_v50 = vunpack.i.h.bf16 %v6192_v43  ;;  %v6193_v47 = vunpack.i.l.bf16 %v6192_v43  ;;  %v6199_v42 = vunpack.i.h.bf16 %v6197_v3  ;;  %v6198_v38 = vunpack.i.l.bf16 %v6197_v3 }
 0x8d1   : > { %v5137_v7 = vsel %vm891_vm9, %v9268_v6, %v6194_v50  ;;  %v4673_v56 = vsel %vm891_vm9, %v9279_v33, %v6193_v47  ;;  %v5130_v6 = vsel %vm891_vm9, %v9260_v59, %v6199_v42  ;;  %v4666_v33 = vsel %vm891_vm9, %v9274_v2, %v6198_v38 }
 0x8d2   : > { %v6202_v23 = vpop.permute.xlu1 %6201  ;;  %v6222_v57 = vpop.permute.xlu0 %6221  ;;  %v4674_v3 = vsel %vm893_vm10, %v4673_v56, %v6133_v10  ;;  %v5138_v43 = vsel %vm893_vm10, %v5137_v7, %v6134_v16  ;;  %v6179_v2 = vunpack.i.h.bf16 %v9593_v11  ;;  %v6178_v38 = vunpack.i.l.bf16 %v9593_v11 }
 0x8d3   : > { %v6204_v30 = vunpack.i.h.bf16 %v6202_v23  ;;  %v6203_v28 = vunpack.i.l.bf16 %v6202_v23  ;;  %v6223_v10 = vunpack.i.l.bf16 %v6222_v57 }
 0x8d5   : > { %v4907_v61 = vsel %vm891_vm9, %v9304_v20, %v6204_v30  ;;  %v4443_v13 = vsel %vm891_vm9, %v9284_v45, %v6203_v28  ;;  %v4667_v20 = vsel %vm893_vm10, %v4666_v33, %v6138_v14  ;;  %v5131_v45 = vsel %vm893_vm10, %v5130_v6, %v6139_v48 }
 0x8d6   : > { %v6207_v25 = vpop.permute.xlu1 %6206  ;;  %v6227_v5 = vpop.permute.xlu0 %6226  ;;  %v6224_v30 = vunpack.i.h.bf16 %v6222_v57  ;;  %v4444_v7 = vsel %vm893_vm10, %v4443_v13, %v6143_v12  ;;  %v4908_v56 = vsel %vm893_vm10, %v4907_v61, %v6144_v8 }
 0x8d7   : > { %v6209_v62 = vunpack.i.h.bf16 %v6207_v25  ;;  %v6208_v15 = vunpack.i.l.bf16 %v6207_v25  ;;  %v6229_v33 = vunpack.i.h.bf16 %v6227_v5  ;;  %v4445_v8 = vsel %vm9969_vm5, %v4444_v7, %v6223_v10  ;;  %vm9978_vm5 = vmmov %vm9973_vm2 }
 0x8d9   : > { %v4675_v50 = vsel %vm9953_vm3, %v4674_v3, %v6208_v15  ;;  %v5139_v47 = vsel %vm9968_vm4, %v5138_v43, %v6209_v62  ;;  %vm9976_vm3 = vmmov %vm9966_vm0 }
 0x8da   : > { %v6212_v23 = vpop.permute.xlu1 %6211  ;;  %v6232_v42 = vpop.permute.xlu0 %6231  ;;  %v4676_v62 = vsel %vm897_vm12, %v4675_v50, %v6148_v22  ;;  %v5140_v11 = vsel %vm897_vm12, %v5139_v47, %v6149_v46  ;;  %v4909_v22 = vsel %vm9970_vm6, %v4908_v56, %v6224_v30  ;;  %v4446_v30 = vsel %vm897_vm12, %v4445_v8, %v6163_v53  ;;  %vm9977_vm4 = vmmov %vm9966_vm0 }
 0x8db   : > { %v6214_v25 = vunpack.i.h.bf16 %v6212_v23  ;;  %v6213_v59 = vunpack.i.l.bf16 %v6212_v23  ;;  %v6234_v3 = vunpack.i.h.bf16 %v6232_v42  ;;  %v6233_v12 = vunpack.i.l.bf16 %v6232_v42  ;;  %vm9979_vm6 = vmmov %vm9973_vm2 }
 0x8dc   : > { %v5141_v58 = vsel %vm899_vm13, %v5140_v11, %v6229_v33  ;;  %v4910_v10 = vsel %vm897_vm12, %v4909_v22, %v6164_v49 }
 0x8dd   : > { %v4900_v16 = vsel %vm891_vm9, %v9335_v35, %v6214_v25  ;;  %v4436_v28 = vsel %vm891_vm9, %v9325_v34, %v6213_v59  ;;  %v6228_v34 = vunpack.i.l.bf16 %v6227_v5 }
 0x8de   : > { %v6217_v15 = vpop.permute.xlu1 %6216  ;;  %v4437_v14 = vsel %vm893_vm10, %v4436_v28, %v6153_v54  ;;  %v4901_v48 = vsel %vm893_vm10, %v4900_v16, %v6154_v19  ;;  %v6237_v6 = vpop.permute.xlu0 %6236 }
 0x8df   : > { %v6219_v57 = vunpack.i.h.bf16 %v6217_v15  ;;  %v6218_v35 = vunpack.i.l.bf16 %v6217_v15  ;;  %v4677_v54 = vsel %vm899_vm13, %v4676_v62, %v6228_v34  ;;  %v4902_v19 = vsel %vm9973_vm2, %v4901_v48, %v6234_v3 }
 0x8e0   : > { %v4438_v13 = vsel %vm9974_vm11, %v4437_v14, %v6233_v12  ;;  %v6239_v59 = vunpack.i.h.bf16 %v6237_v6  ;;  %v6238_v42 = vunpack.i.l.bf16 %v6237_v6  ;;  %v4678_v40 = vsel %vm901_vm14, %v4677_v54, %v6168_v29 }
 0x8e1   : > { %v4668_v46 = vsel %vm9971_vm7, %v4667_v20, %v6218_v35  ;;  %v5132_v61 = vsel %vm9972_vm8, %v5131_v45, %v6219_v57  ;;  %v4439_v17 = vsel %vm897_vm12, %v4438_v13, %v6173_v27  ;;  %v4903_v49 = vsel %vm897_vm12, %v4902_v19, %v6174_v0  ;;  %vm9986_vm7 = vmmov %vm9966_vm0 }
 0x8e2   : > { %v6242_v43 = vpop.permute.xlu1 %6241  ;;  %v4669_v5 = vsel %vm897_vm12, %v4668_v46, %v6158_v26  ;;  %v5133_v23 = vsel %vm897_vm12, %v5132_v61, %v6159_v63  ;;  %v6252_v25 = vpop.permute.xlu0 %6251  ;;  %v5142_v63 = vsel %vm901_vm14, %v5141_v58, %v6169_v18 }
 0x8e3   : > { %v6244_v50 = vunpack.i.h.bf16 %v6242_v43  ;;  %v6243_v47 = vunpack.i.l.bf16 %v6242_v43  ;;  %v6254_v20 = vunpack.i.h.bf16 %v6252_v25  ;;  %v6253_v45 = vunpack.i.l.bf16 %v6252_v25 }
 0x8e4   : > { %v4670_v26 = vsel %vm899_vm13, %v4669_v5, %v6238_v42  ;;  %v5134_v16 = vsel %vm899_vm13, %v5133_v23, %v6239_v59 }
 0x8e5   : > { %v4447_v28 = vsel %vm899_vm13, %v4446_v30, %v6243_v47  ;;  %v4911_v53 = vsel %vm899_vm13, %v4910_v10, %v6244_v50  ;;  %v4440_v56 = vsel %vm899_vm13, %v4439_v17, %v6253_v45  ;;  %v4904_v62 = vsel %vm899_vm13, %v4903_v49, %v6254_v20  ;;  %v5406_v17 = vld [vmem:[%s9811_s3] sm:$0xf] }
 0x8e6   : > { %v6247_v7 = vpop.permute.xlu1 %6246  ;;  %v6257_v18 = vpop.permute.xlu0 %6256  ;;  %v4671_v14 = vsel %vm901_vm14, %v4670_v26, %v6178_v38  ;;  %v5135_v48 = vsel %vm901_vm14, %v5134_v16, %v6179_v2  ;;  %v4448_v27 = vsel %vm901_vm14, %v4447_v28, %v6183_v55  ;;  %v4912_v31 = vsel %vm901_vm14, %v4911_v53, %v6184_v52 }
 0x8e7   : > { %v6249_v36 = vunpack.i.h.bf16 %v6247_v7  ;;  %v6248_v29 = vunpack.i.l.bf16 %v6247_v7  ;;  %v6259_v11 = vunpack.i.h.bf16 %v6257_v18  ;;  %v6258_v15 = vunpack.i.l.bf16 %v6257_v18 }
 0x8e8   : > { %v4441_v2 = vsel %vm901_vm14, %v4440_v56, %v6188_v51  ;;  %v4905_v32 = vsel %vm901_vm14, %v4904_v62, %v6189_v4 }
 0x8e9   : > { %v4679_v0 = vsel %vm903_vm15, %v4678_v40, %v6248_v29  ;;  %v5143_v57 = vsel %vm903_vm15, %v5142_v63, %v6249_v36  ;;  %v4672_v35 = vsel %vm903_vm15, %v4671_v14, %v6258_v15  ;;  %v5136_v6 = vsel %vm903_vm15, %v5135_v48, %v6259_v11 }
 0x8ea   : > { %v6267_v33 = vpop.permute.xlu1 %6266  ;;  %v6262_v52 = vpop.permute.xlu0 %6261  ;;  %v5388_v55 = vrot.slane %v4672_v35, 4  ;;  %v5394_v3 = vrot.slane %v5136_v6, 4  ;;  %v5389_v22 = vrot.slane %v4679_v0, 4  ;;  %v5395_v46 = vrot.slane %v5143_v57, 4 }
 0x8eb   : > { %v6269_v38 = vunpack.i.h.bf16 %v6267_v33  ;;  %v6268_v34 = vunpack.i.l.bf16 %v6267_v33  ;;  %v6264_v12 = vunpack.i.h.bf16 %v6262_v52  ;;  %v6263_v8 = vunpack.i.l.bf16 %v6262_v52 }
 0x8ed   : > { %v4442_v61 = vsel %vm903_vm15, %v4441_v2, %v6268_v34  ;;  %v4906_v54 = vsel %vm903_vm15, %v4905_v32, %v6269_v38  ;;  %v4449_v58 = vsel %vm903_vm15, %v4448_v27, %v6263_v8  ;;  %v4913_v19 = vsel %vm903_vm15, %v4912_v31, %v6264_v12 }
 0x8ee   : > { %v5306_v51 = vpop.permute.xlu1 %5305  ;;  %v5402_v39 = vsel %vm9966_vm0, %v4442_v61, %v5388_v55  ;;  %v5404_v4 = vsel %vm9975_vm1, %v4906_v54, %v5394_v3  ;;  %v5334_v43 = vpop.permute.xlu0 %5333  ;;  %v5403_v5 = vsel %vm9976_vm3, %v4449_v58, %v5389_v22  ;;  %v5405_v23 = vsel %vm9977_vm4, %v4913_v19, %v5395_v46  ;;  %v6279_v3 = vld [vmem:[%s6536_s15] sm:$0xff]  ;;  %s6316_s15 = scalar_lea.vmem %s6315_s17, 256 }
 0x8ef   : > { %v5360_v13 = vsel %vm891_vm9, %v9399_v60, %v5306_v51  ;;  %v5646_v50 = vpack.c.bf16 %v5404_v4, %v5402_v39  ;;  %v5367_v47 = vsel %vm891_vm9, %v9406_v24, %v5334_v43  ;;  %v5644_v25 = vpack.c.bf16 %v5405_v23, %v5403_v5  ;;  %vm9980_vm9 = vmmov %vm9966_vm0  ;;  %p6318_p10 = scmp.lt.s32.totalorder %s6316_s15, %s6310_s11 }
 0x8f0   : > { %v5361_v59 = vsel %vm893_vm10, %v5360_v13, %v9595_v44  ;;  %v5368_v60 = vsel %vm893_vm10, %v5367_v47, %v9597_v37  ;;  %vm9981_vm10 = vmmov %vm9966_vm0 }
 0x8f1   : > { %5645 = vmatprep.subr.bf16.mxu1 %v5644_v25  ;;  %p6319_p2 = por %p6318_p10, %p6317_p7 }
 0x8f2   : > { %v5314_v42 = vpop.permute.xlu1 %5313  ;;  %v5342_v45 = vpop.permute.xlu0 %5341  ;;  %5647 = vmatpush1.bf16.msra.mxu1 %v5646_v50 }
 0x8f3   : > { %v5362_v20 = vsel %vm9978_vm5, %v5361_v59, %v5314_v42  ;;  %v5369_v30 = vsel %vm9979_vm6, %v5368_v60, %v5342_v45  ;;  %p6320_p4 = pnand %p6319_p2, %p6313_p13 }
 0x8f4   : > { %v5363_v10 = vsel %vm897_vm12, %v5362_v20, %v9599_v9  ;;  %v5370_v63 = vsel %vm897_vm12, %v5369_v30, %v9601_v21  ;;  %vm9982_vm12 = vcmask 293888  }
 0x8f6   : > { %v5322_v40 = vpop.permute.xlu1 %5321  ;;  %v5350_v44 = vpop.permute.xlu0 %5349 }
 0x8f7   : > { %v5364_v24 = vsel %vm899_vm13, %v5363_v10, %v5322_v40  ;;  %v5371_v26 = vsel %vm899_vm13, %v5370_v63, %v5350_v44  ;;  %vm9983_vm13 = vmmov %vm9966_vm0 }
 0x8f8   : > { %v5365_v16 = vsel %vm901_vm14, %v5364_v24, %v9603_v1  ;;  %v5372_v53 = vsel %vm901_vm14, %v5371_v26, %v9605_v41  ;;  %vm9984_vm14 = vmmov %vm9966_vm0 }
 0x8fa   : > { %v5330_v37 = vpop.permute.xlu1 %5329  ;;  %v5358_v7 = vpop.permute.xlu0 %5357 }
 0x8fb   : > { %v5366_v28 = vsel %vm903_vm15, %v5365_v16, %v5330_v37  ;;  %v5373_v9 = vsel %vm903_vm15, %v5372_v53, %v5358_v7  ;;  %vm9985_vm15 = vmmov %vm9966_vm0 }
 0x8fc   : > { %5622 = vmatprep.subr.msk.mxu1 %vm9980_vm9, %v5373_v9 }
 0x8fd   : > { %5623 = vmatpush1.msk.msra.mxu1 %vm9981_vm10, %v5366_v28 }
 0x8fe   : > { %5624 = vmatmul.mubr.msk.f32.vlgmr.msra.gmra.mrb[0].mxu1 %vm9982_vm12, %v5406_v17 }
 0x90b   : > { %v5411_v21 = vpop.permute.xlu0 %5410 }
 0x9d1   : > { %v5488_v1 = vpop.f32.mrb[0].mxu1 }
 0x9d2   : > { %v5489_v49 = vadd.f32 %v5488_v1, %v5411_v21  ;;  %v5490_v36 = vpop.f32.mrb[1].mxu1 }
 0x9d3   : > { %v5491_v29 = vadd.f32 %v5490_v36, %v5411_v21 }
 0x9d4   : > { %v5499_v18 = vmul.f32 %v5489_v49, %v5489_v49  ;;  %v5493_v41 = vsel %vm9983_vm13, %v5489_v49, 0.0 }
 0x9d5   : > { %v5500_v56 = vmul.f32 %v5491_v29, %v5491_v29  ;;  %v5494_v62 = vsel %vm9984_vm14, %v5491_v29, 0.0 }
 0x9d6   : > { %v5495_v11 = vadd.f32 %v5494_v62, %v5493_v41  ;;  %v5501_v15 = vsel %vm9985_vm15, %v5499_v18, 0.0 }
 0x9d7   : > { %v5502_v14 = vsel %vm9986_vm7, %v5500_v56, 0.0 }
 0x9d8   : > { %5496 = vadd.xlane.f32.xlu1 %v5495_v11  ;;  %v5503_v48 = vadd.f32 %v5502_v14, %v5501_v15 }
 0x9da   : > { %5504 = vadd.xlane.f32.xlu0 %v5503_v48 }
 0xa65   : > { %v5497_v27 = vpop.xlane.xlu1 %5496 }
 0xa66   : > { %v5498_v31 = vmul.f32 0.00390625, %v5497_v27 }
 0xa67   : > { %v5505_v0 = vpop.xlane.xlu0 %5504 }
 0xa68   : > { %v5506_v57 = vmul.f32 0.00390625, %v5505_v0  ;;  %v5507_v35 = vmul.f32 %v5498_v31, %v5498_v31  ;;  %v5509_v38 = vsub.f32 %v5489_v49, %v5498_v31  ;;  %v5510_v34 = vsub.f32 %v5491_v29, %v5498_v31 }
 0xa6a   : > { %v5508_v6 = vsub.f32 %v5506_v57, %v5507_v35 }
 0xa6c   : > { %v5511_v33 = vadd.f32 1e-05, %v5508_v6 }
 0xa6e   : > { %6277 = vrsqrt.f32 %v5511_v33 }
 0xa78   : > { %v6278_v2 = vpop.eup %6277 }
 0xa79   : > { %v5513_v32 = vmul.f32 %v6278_v2, %v5509_v38  ;;  %v5514_v52 = vmul.f32 %v6278_v2, %v5510_v34 }
 0xa7b   : > { %v5517_v55 = vcombine.low %v5513_v32, %v5514_v52 }
 0xa7d   : > { %v5519_v12 = vadd.f32 %v6279_v3, %v5517_v55 }
 0xa7f   : > { %5520 = vst [vmem:[%s240_s26] sm:$0xff] %v5519_v12 }
 0xa80   : > { %6323 = shalt.err (!%p6320_p4)
}
 0xa81   : > { %s6324_s13 = scalar_lea.hbm %s9764_s9, 128  ;;  %s6328_s14 = scalar_lea.hbm %s9813_s5, 256 }
 0xa82   : > { %p6325_p5 = scmp.ne.s32.totalorder %s9764_s9, %s6324_s13  ;;  %p6329_p0 = scmp.lt.u32.totalorder %s9764_s9, %s9813_s5 }
 0xa83   : > { %p6330_p1 = scmp.lt.u32.totalorder %s6328_s14, %s6324_s13  ;;  %p6332_p6 = scmp.lt.u32.totalorder %s6324_s13, %s9764_s9 }
 0xa84   : > { %p6326_p8 = pnand %p6325_p5, %p9987_p11 }
 0xa85   : > { %p6331_p3 = por %p6330_p1, %p6329_p0 }
 0xa86   : > { %p6327_p9 = pneg %p6326_p8 }
 0xa87   : > { %p6333_p12 = por %p6332_p6, %p6331_p3 }
 0xa89   : > { %p6334_p13 = pnand %p6333_p12, %p6327_p9 }
 0xa8b   : > { %6337 = shalt.err (!%p6334_p13)
}
 0xa8c   : > { %5650 = dma.vmem_to_hbm [thread:$0]  (%p9987_p11), %s9766_s28, 128, %s9764_s9, %s5522_s10  }
 0xa8d PF: > { %s5548_s29 = sand.u32 1, %s6364_s18   ;;  %p9988_p7 = scmp.ne.s32.totalorder %s9858_s6, 0 }
 0xa8e   : > { %p9989_p10 = scmp.ge.s32.totalorder %s6376_s21, 2  ;;  %s5549_s26 = scalar_lea.sflag [#allocation5], %s5548_s29 }
 0xa90   : > { %p5657_p2 = pnand %p9989_p10, %p9988_p7 }
 0xa92   : > { %6359 = dma.done.wait (!%p5657_p2), %s5549_s26, 128  }
 0xa93   : > { %6361 = vsyncadd (!%p5657_p2), %s5549_s26, 4294967168  ;;  %p18_p4 = scmp.ge.s32.totalorder %s6450_s24, 4   ;;  %s9990_s18 = smov %s6368_s19 }
 0xa94   : > { %s9991_s19 = smov %s6372_s20  ;;  %s9992_s20 = smov %s6462_s27 }
 0xa95   : > { %s9993_s21 = smov %s6450_s24  ;;  %20 = sbr.rel (!%p18_p4) target bundleno = 5 (0x5), region = 85 }
 0xa9c   :  { %5554 = vsyncpa [#allocation4], 1 }
 0xa9d   :  { %5556 = vsyncpa [#allocation4 + $0x1], 1 }
 0xa9e   :  { %5557 = vsyncpa [#allocation5], 1 }
 0xa9f   :  { %5559 = vsyncpa [#allocation5 + $0x1], 1 }

</bundles_post_ra>
